<compile_context>
chip_gen: v5e
topology: v5e:2x2
jax: 0.10.0
libtpu: 0.0.40
codegen_flags: <defaults>
</compile_context>

<pallas_src>
import functools

import jax
import jax.numpy as jnp
from jax import lax
from jax.experimental import pallas as pl
from jax.experimental.pallas import tpu as pltpu


MAX_TILE_M = 512                  # GEMM rows per grid step; safe for v5e/v6e/v7x VMEM
VMEM_LIMIT = 32 * 1024 * 1024     # explicit scoped-VMEM budget valid on all generations
EPS = 1e-5                        # PyTorch BatchNorm2d default


def _pick_tile_m(m):
    """Largest row tile <= MAX_TILE_M that divides M (multiple of 8 when < M)."""
    if m <= MAX_TILE_M:
        return m
    t = (MAX_TILE_M // 8) * 8
    while t >= 8:
        if m % t == 0:
            return t
        t -= 8
    return m


# ----------------------------- Pallas kernels ------------------------------- #

def _gemm_stats_kernel(x_ref, w_ref, y_ref, s1_ref, s2_ref):
    """bf16 GEMM (f32 accumulate) + per-channel BN sum / sum-of-squares.

    s1/s2 blocks are resident across the whole (phase, m) grid (index_map always
    returns (0, 0)); they are zero-initialized on the very first grid step.
    """
    @pl.when(jnp.logical_and(pl.program_id(0) == 0, pl.program_id(1) == 0))
    def _():
        s1_ref[...] = jnp.zeros_like(s1_ref)
        s2_ref[...] = jnp.zeros_like(s2_ref)

    acc = jnp.dot(x_ref[0], w_ref[0], preferred_element_type=jnp.float32)  # (tm, Cout)
    y_ref[0] = acc
    s1_ref[...] += jnp.sum(acc, axis=0, keepdims=True)
    s2_ref[...] += jnp.sum(acc * acc, axis=0, keepdims=True)


def _gemm_act_kernel(x_ref, w_ref, o_ref, *, act):
    """bf16 GEMM (f32 accumulate) + activation (used for the final Tanh layer)."""
    acc = jnp.dot(x_ref[0], w_ref[0], preferred_element_type=jnp.float32)
    if act == "tanh":
        acc = jnp.tanh(acc)
    elif act == "relu":
        acc = jnp.maximum(acc, 0.0)
    o_ref[0] = acc


def _scale_shift_relu_kernel(y_ref, scale_ref, shift_ref, o_ref):
    """Pass 2 of BatchNorm: per-channel affine (folded mean/var/gamma/beta) + ReLU."""
    o_ref[0] = jnp.maximum(y_ref[0] * scale_ref[...] + shift_ref[...], 0.0)


# --------------------------- pallas_call wrappers ---------------------------- #

def _phase_gemm_stats(xcol, wmat):
    """y[p, m, :] = xcol[p or 0, m, :] @ wmat[p, :, :], plus BN stats accumulation.

    xcol : (Px, M, Kd) bf16 with Px in {1, P}  (Px == 1 -> shared across phases)
    wmat : (P,  Kd, Cout) bf16
    """
    Px, M, Kd = xcol.shape
    P, _, Cout = wmat.shape
    tm = _pick_tile_m(M)
    x_idx = (lambda p, m: (0, m, 0)) if Px == 1 else (lambda p, m: (p, m, 0))
    y, s1, s2 = pl.pallas_call(
        _gemm_stats_kernel,
        out_shape=(jax.ShapeDtypeStruct((P, M, Cout), jnp.float32),
                   jax.ShapeDtypeStruct((1, Cout), jnp.float32),
                   jax.ShapeDtypeStruct((1, Cout), jnp.float32)),
        grid_spec=pltpu.PrefetchScalarGridSpec(
            num_scalar_prefetch=0,
            grid=(P, M // tm),
            in_specs=[pl.BlockSpec((1, tm, Kd), x_idx),
                      pl.BlockSpec((1, Kd, Cout), lambda p, m: (p, 0, 0))],
            out_specs=[pl.BlockSpec((1, tm, Cout), lambda p, m: (p, m, 0)),
                       pl.BlockSpec((1, Cout), lambda p, m: (0, 0)),
                       pl.BlockSpec((1, Cout), lambda p, m: (0, 0))]),
        # stats blocks are resident across BOTH axes -> both must be "arbitrary"
        compiler_params=pltpu.CompilerParams(
            dimension_semantics=("arbitrary", "arbitrary"),
            vmem_limit_bytes=VMEM_LIMIT),
    )(xcol, wmat)
    return y, s1, s2


def _phase_gemm_act(xcol, wmat, act):
    Px, M, Kd = xcol.shape
    P, _, Cout = wmat.shape
    tm = _pick_tile_m(M)
    x_idx = (lambda p, m: (0, m, 0)) if Px == 1 else (lambda p, m: (p, m, 0))
    # NOTE: for the toy final layer Cout=3 the output uses 3/128 lanes (masked
    # stores); with realistic ngf this self-resolves (Cout >= 128).
    return pl.pallas_call(
        functools.partial(_gemm_act_kernel, act=act),
        out_shape=jax.ShapeDtypeStruct((P, M, Cout), jnp.float32),
        grid_spec=pltpu.PrefetchScalarGridSpec(
            num_scalar_prefetch=0,
            grid=(P, M // tm),
            in_specs=[pl.BlockSpec((1, tm, Kd), x_idx),
                      pl.BlockSpec((1, Kd, Cout), lambda p, m: (p, 0, 0))],
            out_specs=pl.BlockSpec((1, tm, Cout), lambda p, m: (p, m, 0))),
        compiler_params=pltpu.CompilerParams(
            dimension_semantics=("parallel", "parallel"),
            vmem_limit_bytes=VMEM_LIMIT),
    )(xcol, wmat)


def _scale_shift_relu(y, scale, shift):
    P, M, Cout = y.shape
    tm = _pick_tile_m(M)
    return pl.pallas_call(
        _scale_shift_relu_kernel,
        out_shape=jax.ShapeDtypeStruct((P, M, Cout), jnp.float32),
        grid_spec=pltpu.PrefetchScalarGridSpec(
            num_scalar_prefetch=0,
            grid=(P, M // tm),
            in_specs=[pl.BlockSpec((1, tm, Cout), lambda p, m: (p, m, 0)),
                      pl.BlockSpec((1, Cout), lambda p, m: (0, 0)),
                      pl.BlockSpec((1, Cout), lambda p, m: (0, 0))],
            out_specs=pl.BlockSpec((1, tm, Cout), lambda p, m: (p, m, 0))),
        compiler_params=pltpu.CompilerParams(
            dimension_semantics=("parallel", "parallel"),
            vmem_limit_bytes=VMEM_LIMIT),
    )(y, scale, shift)


# ------------------- operand construction (plain-JAX glue) ------------------- #

def _operands_first_layer(x_nhwc, w_t):
    """ConvTranspose2d(k=4, s=1, p=0) on a 1x1 latent == per-output-pixel matmul:
       out[n, kh, kw, co] = sum_ci x[n, ci] * w[ci, co, kh, kw]."""
    N, H, W, Cin = x_nhwc.shape
    assert H == 1 and W == 1, "first DCGAN layer expects a 1x1 latent input"
    Cin_w, Cout, K, _ = w_t.shape
    xcol = x_nhwc.reshape(1, N, Cin)                                   # shared by all 16 phases
    wmat = jnp.transpose(w_t, (2, 3, 0, 1)).reshape(K * K, Cin, Cout)  # phase p = K*kh + kw
    return xcol, wmat


def _assemble_first_layer(y, N, Cout, K):
    # y: (K*K, N, Cout) -> (N, K, K, Cout)
    return jnp.transpose(y.reshape(K, K, N, Cout), (2, 0, 1, 3))


def _operands_stride2(x_nhwc, w_t):
    """Sub-pixel decomposition of ConvTranspose2d(k=4, s=2, p=1).

    Output phase (r, c) = (oh % 2, ow % 2) is a stride-1 2x2 convolution over the
    1-padded input; tap (dh, dw) uses kernel element (3 - r - 2*dh, 3 - c - 2*dw).
    Only 4 taps per phase instead of the 16-tap dilated im2col -> 4x fewer MACs.
    """
    N, H, W, Cin = x_nhwc.shape
    Cout = w_t.shape[1]
    xp = jnp.pad(x_nhwc, ((0, 0), (1, 1), (1, 1), (0, 0)))
    xcols, wmats = [], []
    for r in range(2):
        for c in range(2):
            taps, wtaps = [], []
            for dh in range(2):
                for dw in range(2):
                    taps.append(xp[:, r + dh:r + dh + H, c + dw:c + dw + W, :])
                    wtaps.append(w_t[:, :, 3 - r - 2 * dh, 3 - c - 2 * dw])
            xcols.append(jnp.concatenate(taps, axis=-1).reshape(N * H * W, 4 * Cin))
            wmats.append(jnp.concatenate(wtaps, axis=0))                # (4*Cin, Cout)
    return jnp.stack(xcols), jnp.stack(wmats)                           # (4,M,4Cin),(4,4Cin,Cout)


def _assemble_stride2(y, N, H, W, Cout):
    # y: (4, N*H*W, Cout), phase p = 2*r + c -> out[n, 2i+r, 2j+c, :]
    y = y.reshape(2, 2, N, H, W, Cout)
    y = jnp.transpose(y, (2, 3, 0, 4, 1, 5))
    return y.reshape(N, 2 * H, 2 * W, Cout)


# --------------------------- per-layer driver -------------------------------- #

def conv_transpose_block(x_nhwc, w_t, gamma, beta, *, stride, padding, use_bn, act):
    """ConvTranspose2d(k=4, stride, padding, bias=False)
       [+ BatchNorm2d (batch stats)] + activation.  x_nhwc: (N,H,W,Cin) f32."""
    N, H, W, Cin = x_nhwc.shape
    Cout, K = w_t.shape[1], w_t.shape[2]

    if stride == 1:
        assert padding == 0
        xcol, wmat = _operands_first_layer(x_nhwc, w_t)
        assemble = lambda y: _assemble_first_layer(y, N, Cout, K)
    else:
        assert stride == 2 and padding == 1 and K == 4
        xcol, wmat = _operands_stride2(x_nhwc, w_t)
        assemble = lambda y: _assemble_stride2(y, N, H, W, Cout)

    # bf16 MXU operands (f32 accumulation inside the kernel).
    xcol = xcol.astype(jnp.bfloat16)
    wmat = wmat.astype(jnp.bfloat16)

    if use_bn:
        # pass 1: tiled GEMM + per-channel sum / sumsq accumulated across tiles
        y, s1, s2 = _phase_gemm_stats(xcol, wmat)
        count = float(wmat.shape[0] * y.shape[1])            # = N * Ho * Wo
        mean = s1[0] / count
        var = s2[0] / count - mean * mean                    # biased var (training mode)
        scale = gamma.astype(jnp.float32) * lax.rsqrt(var + EPS)
        shift = beta.astype(jnp.float32) - mean * scale
        # pass 2: tiled normalize (+ gamma/beta) + ReLU
        out = _scale_shift_relu(y, scale.reshape(1, Cout), shift.reshape(1, Cout))
    else:
        out = _phase_gemm_act(xcol, wmat, act)

    return assemble(out)


# ------------------------------- Generator ----------------------------------- #

def init_generator_params(key, input_size, hidden_size, output_size):
    chans = [input_size, hidden_size * 8, hidden_size * 4,
             hidden_size * 2, hidden_size, output_size]
    keys = jax.random.split(key, 3 * 5)
    params = []
    for i in range(5):
        kw_, kg_, kb_ = keys[3 * i], keys[3 * i + 1], keys[3 * i + 2]
        w = 0.02 * jax.random.normal(kw_, (chans[i], chans[i + 1], 4, 4), jnp.float32)
        gamma = 1.0 + 0.02 * jax.random.normal(kg_, (chans[i + 1],), jnp.float32)
        beta = 0.02 * jax.random.normal(kb_, (chans[i + 1],), jnp.float32)
        params.append((w, gamma, beta))
    return params


def generator_forward(params, x_nchw):
    x = jnp.transpose(x_nchw, (0, 2, 3, 1)).astype(jnp.float32)     # NCHW -> NHWC
    strides = [1, 2, 2, 2, 2]
    pads = [0, 1, 1, 1, 1]
    n_layers = len(params)
    for i, (w, g, b) in enumerate(params):
        last = (i == n_layers - 1)
        x = conv_transpose_block(x, w, g, b,
                                 stride=strides[i], padding=pads[i],
                                 use_bn=not last,
                                 act="tanh" if last else "relu")
    return jnp.transpose(x, (0, 3, 1, 2))                           # NHWC -> NCHW


# ---------------------- pure-JAX reference (for checking) -------------------- #

def reference_forward(params, x_nchw):
    x = x_nchw.astype(jnp.float32)
    strides = [1, 2, 2, 2, 2]
    pads = [0, 1, 1, 1, 1]
    n_layers = len(params)
    for i, (w, g, b) in enumerate(params):
        K, s, p = 4, strides[i], pads[i]
        w_conv = jnp.transpose(w[:, :, ::-1, ::-1], (1, 0, 2, 3))   # (Cout,Cin,K,K)
        x = lax.conv_general_dilated(
            x, w_conv, window_strides=(1, 1),
            padding=[(K - 1 - p, K - 1 - p)] * 2,
            lhs_dilation=(s, s),
            dimension_numbers=("NCHW", "OIHW", "NCHW"),
            precision=lax.Precision.HIGHEST)
        if i < n_layers - 1:
            mean = jnp.mean(x, axis=(0, 2, 3), keepdims=True)
            var = jnp.mean(jnp.square(x - mean), axis=(0, 2, 3), keepdims=True)
            x = (x - mean) * lax.rsqrt(var + 1e-5)
            x = x * g.reshape(1, -1, 1, 1) + b.reshape(1, -1, 1, 1)
            x = jnp.maximum(x, 0.0)
        else:
            x = jnp.tanh(x)
    return x


# ---------------------------------- main -------------------------------------- #

if __name__ == "__main__":
    input_size, hidden_size, output_size = 8, 8, 3
    batch = 2

    key = jax.random.PRNGKey(0)
    kp, kx = jax.random.split(key)
    params = init_generator_params(kp, input_size, hidden_size, output_size)
    x = jax.random.normal(kx, (batch, input_size, 1, 1), jnp.float32)

    fwd = jax.jit(generator_forward)
    out = jax.block_until_ready(fwd(params, x))
    ref = jax.block_until_ready(reference_forward(params, x))

    assert out.shape == (batch, output_size, 64, 64), out.shape
    assert bool(jnp.all(jnp.isfinite(out)))
    err = float(jnp.max(jnp.abs(out - ref)))
    assert err < 5e-2, f"max abs err vs f32 reference: {err}"

    print("KERNEL_OK")
</pallas_src>

<mosaic_0001>
module attributes {stable_mosaic.version = 11 : i64} {
  func.func @_gemm_stats_kernel(%arg0: i32, %arg1: i32, %arg2: memref<1x2x8xbf16, #tpu.memory_space<vmem>>, %arg3: memref<1x8x64xbf16, #tpu.memory_space<vmem>>, %arg4: memref<1x2x64xf32, #tpu.memory_space<vmem>>, %arg5: memref<1x64xf32, #tpu.memory_space<vmem>>, %arg6: memref<1x64xf32, #tpu.memory_space<vmem>>) attributes {dimension_semantics = [#tpu.dimension_semantics<arbitrary>, #tpu.dimension_semantics<arbitrary>], iteration_bounds = array<i64: 16, 1>, scalar_prefetch = 0 : i64, scratch_operands = 0 : i64, tpu.core_type = #tpu.core_type<tc>, window_params = [{transform_indices = @transform_0, window_bounds = array<i64: 1, 2, 8>}, {transform_indices = @transform_1, window_bounds = array<i64: 1, 8, 64>}, {transform_indices = @transform_2, window_bounds = array<i64: 1, 2, 64>}, {pipeline_mode = #tpu.pipeline_mode<synchronous>, transform_indices = @transform_3, window_bounds = array<i64: 1, 64>}, {pipeline_mode = #tpu.pipeline_mode<synchronous>, transform_indices = @transform_4, window_bounds = array<i64: 1, 64>}]} {
    %c0_i32 = arith.constant 0 : i32
    %0 = arith.cmpi eq, %arg0, %c0_i32 : i32
    %c0_i32_0 = arith.constant 0 : i32
    %1 = arith.cmpi eq, %arg1, %c0_i32_0 : i32
    %2 = arith.andi %0, %1 : i1
    %3 = arith.extui %2 : i1 to i32
    %c0_i32_1 = arith.constant 0 : i32
    %4 = arith.cmpi ne, %3, %c0_i32_1 : i32
    scf.if %4 {
      %cst_20 = arith.constant 0.000000e+00 : f32
      %24 = vector.broadcast %cst_20 : f32 to vector<1x64xf32>
      %c0_21 = arith.constant 0 : index
      %c0_22 = arith.constant 0 : index
      %25 = vector.load %arg5[%c0_21, %c0_22] : memref<1x64xf32, #tpu.memory_space<vmem>>, vector<1x64xf32>
      tpu.vector_store %arg5[%c0_21, %c0_22], %24 {strides = array<i32>} : memref<1x64xf32, #tpu.memory_space<vmem>>, vector<1x64xf32>,
      %cst_23 = arith.constant 0.000000e+00 : f32
      %26 = vector.broadcast %cst_23 : f32 to vector<1x64xf32>
      %c0_24 = arith.constant 0 : index
      %c0_25 = arith.constant 0 : index
      %27 = vector.load %arg6[%c0_24, %c0_25] : memref<1x64xf32, #tpu.memory_space<vmem>>, vector<1x64xf32>
      tpu.vector_store %arg6[%c0_24, %c0_25], %26 {strides = array<i32>} : memref<1x64xf32, #tpu.memory_space<vmem>>, vector<1x64xf32>,
    } else {
    }
    %c0 = arith.constant 0 : index
    %c0_2 = arith.constant 0 : index
    %c0_3 = arith.constant 0 : index
    %5 = vector.load %arg2[%c0, %c0_2, %c0_3] : memref<1x2x8xbf16, #tpu.memory_space<vmem>>, vector<1x2x8xbf16>
    %6 = vector.shape_cast %5 : vector<1x2x8xbf16> to vector<2x8xbf16>
    %c0_4 = arith.constant 0 : index
    %c0_5 = arith.constant 0 : index
    %c0_6 = arith.constant 0 : index
    %7 = vector.load %arg3[%c0_4, %c0_5, %c0_6] : memref<1x8x64xbf16, #tpu.memory_space<vmem>>, vector<1x8x64xbf16>
    %8 = vector.shape_cast %7 : vector<1x8x64xbf16> to vector<8x64xbf16>
    %cst = arith.constant dense<0.000000e+00> : vector<2x64xf32>
    %9 = tpu.matmul %6, %8, %cst {dimension_numbers = #tpu.dot_dimension_numbers<[1], [0], [0], [1], [0, 0, 1, 1], [], []>} : vector<2x8xbf16>, vector<8x64xbf16>, vector<2x64xf32> -> vector<2x64xf32>
    %c0_7 = arith.constant 0 : index
    %c0_8 = arith.constant 0 : index
    %c0_9 = arith.constant 0 : index
    %10 = vector.load %arg4[%c0_7, %c0_8, %c0_9] : memref<1x2x64xf32, #tpu.memory_space<vmem>>, vector<1x2x64xf32>
    %11 = vector.shape_cast %10 : vector<1x2x64xf32> to vector<2x64xf32>
    %12 = vector.shape_cast %9 : vector<2x64xf32> to vector<1x2x64xf32>
    tpu.vector_store %arg4[%c0_7, %c0_8, %c0_9], %12 {strides = array<i32>} : memref<1x2x64xf32, #tpu.memory_space<vmem>>, vector<1x2x64xf32>,
    %c0_10 = arith.constant 0 : index
    %c0_11 = arith.constant 0 : index
    %13 = vector.load %arg5[%c0_10, %c0_11] : memref<1x64xf32, #tpu.memory_space<vmem>>, vector<1x64xf32>
    %cst_12 = arith.constant dense<0.000000e+00> : vector<64xf32>
    %14 = vector.multi_reduction <add>, %9, %cst_12 [0] : vector<2x64xf32> to vector<64xf32>
    %15 = vector.shape_cast %14 : vector<64xf32> to vector<1x64xf32>
    %16 = arith.addf %13, %15 : vector<1x64xf32>
    %c0_13 = arith.constant 0 : index
    %c0_14 = arith.constant 0 : index
    %17 = vector.load %arg5[%c0_13, %c0_14] : memref<1x64xf32, #tpu.memory_space<vmem>>, vector<1x64xf32>
    tpu.vector_store %arg5[%c0_13, %c0_14], %16 {strides = array<i32>} : memref<1x64xf32, #tpu.memory_space<vmem>>, vector<1x64xf32>,
    %c0_15 = arith.constant 0 : index
    %c0_16 = arith.constant 0 : index
    %18 = vector.load %arg6[%c0_15, %c0_16] : memref<1x64xf32, #tpu.memory_space<vmem>>, vector<1x64xf32>
    %19 = arith.mulf %9, %9 : vector<2x64xf32>
    %cst_17 = arith.constant dense<0.000000e+00> : vector<64xf32>
    %20 = vector.multi_reduction <add>, %19, %cst_17 [0] : vector<2x64xf32> to vector<64xf32>
    %21 = vector.shape_cast %20 : vector<64xf32> to vector<1x64xf32>
    %22 = arith.addf %18, %21 : vector<1x64xf32>
    %c0_18 = arith.constant 0 : index
    %c0_19 = arith.constant 0 : index
    %23 = vector.load %arg6[%c0_18, %c0_19] : memref<1x64xf32, #tpu.memory_space<vmem>>, vector<1x64xf32>
    tpu.vector_store %arg6[%c0_18, %c0_19], %22 {strides = array<i32>} : memref<1x64xf32, #tpu.memory_space<vmem>>, vector<1x64xf32>,
    return
  }
  func.func @transform_0(%arg0: i32, %arg1: i32) -> (i32, i32, i32) {
    %c0_i32 = arith.constant 0 : i32
    %c0_i32_0 = arith.constant 0 : i32
    %c0_i32_1 = arith.constant 0 : i32
    return %c0_i32, %arg1, %c0_i32_0 : i32, i32, i32
  }
  func.func @transform_1(%arg0: i32, %arg1: i32) -> (i32, i32, i32) {
    %c0_i32 = arith.constant 0 : i32
    %c0_i32_0 = arith.constant 0 : i32
    %c0_i32_1 = arith.constant 0 : i32
    return %arg0, %c0_i32, %c0_i32_0 : i32, i32, i32
  }
  func.func @transform_2(%arg0: i32, %arg1: i32) -> (i32, i32, i32) {
    %c0_i32 = arith.constant 0 : i32
    %c0_i32_0 = arith.constant 0 : i32
    return %arg0, %arg1, %c0_i32 : i32, i32, i32
  }
  func.func @transform_3(%arg0: i32, %arg1: i32) -> (i32, i32) {
    %c0_i32 = arith.constant 0 : i32
    %c0_i32_0 = arith.constant 0 : i32
    %c0_i32_1 = arith.constant 0 : i32
    return %c0_i32, %c0_i32_0 : i32, i32
  }
  func.func @transform_4(%arg0: i32, %arg1: i32) -> (i32, i32) {
    %c0_i32 = arith.constant 0 : i32
    %c0_i32_0 = arith.constant 0 : i32
    %c0_i32_1 = arith.constant 0 : i32
    return %c0_i32, %c0_i32_0 : i32, i32
  }
}

module attributes {stable_mosaic.version = 11 : i64} {
  func.func @_scale_shift_relu_kernel(%arg0: i32, %arg1: i32, %arg2: memref<1x2x64xf32, #tpu.memory_space<vmem>>, %arg3: memref<1x64xf32, #tpu.memory_space<vmem>>, %arg4: memref<1x64xf32, #tpu.memory_space<vmem>>, %arg5: memref<1x2x64xf32, #tpu.memory_space<vmem>>) attributes {dimension_semantics = [#tpu.dimension_semantics<parallel>, #tpu.dimension_semantics<parallel>], iteration_bounds = array<i64: 16, 1>, scalar_prefetch = 0 : i64, scratch_operands = 0 : i64, tpu.core_type = #tpu.core_type<tc>, window_params = [{transform_indices = @transform_0, window_bounds = array<i64: 1, 2, 64>}, {pipeline_mode = #tpu.pipeline_mode<synchronous>, transform_indices = @transform_1, window_bounds = array<i64: 1, 64>}, {pipeline_mode = #tpu.pipeline_mode<synchronous>, transform_indices = @transform_2, window_bounds = array<i64: 1, 64>}, {transform_indices = @transform_3, window_bounds = array<i64: 1, 2, 64>}]} {
    %c0 = arith.constant 0 : index
    %c0_0 = arith.constant 0 : index
    %c0_1 = arith.constant 0 : index
    %0 = vector.load %arg2[%c0, %c0_0, %c0_1] : memref<1x2x64xf32, #tpu.memory_space<vmem>>, vector<1x2x64xf32>
    %1 = vector.shape_cast %0 : vector<1x2x64xf32> to vector<2x64xf32>
    %c0_2 = arith.constant 0 : index
    %c0_3 = arith.constant 0 : index
    %2 = vector.load %arg3[%c0_2, %c0_3] : memref<1x64xf32, #tpu.memory_space<vmem>>, vector<1x64xf32>
    %3 = vector.broadcast %2 : vector<1x64xf32> to vector<2x64xf32>
    %4 = arith.mulf %1, %3 : vector<2x64xf32>
    %c0_4 = arith.constant 0 : index
    %c0_5 = arith.constant 0 : index
    %5 = vector.load %arg4[%c0_4, %c0_5] : memref<1x64xf32, #tpu.memory_space<vmem>>, vector<1x64xf32>
    %6 = vector.broadcast %5 : vector<1x64xf32> to vector<2x64xf32>
    %7 = arith.addf %4, %6 : vector<2x64xf32>
    %cst = arith.constant 0.000000e+00 : f32
    %8 = vector.broadcast %cst : f32 to vector<2x64xf32>
    %9 = arith.maximumf %7, %8 : vector<2x64xf32>
    %c0_6 = arith.constant 0 : index
    %c0_7 = arith.constant 0 : index
    %c0_8 = arith.constant 0 : index
    %10 = vector.load %arg5[%c0_6, %c0_7, %c0_8] : memref<1x2x64xf32, #tpu.memory_space<vmem>>, vector<1x2x64xf32>
    %11 = vector.shape_cast %10 : vector<1x2x64xf32> to vector<2x64xf32>
    %12 = vector.shape_cast %9 : vector<2x64xf32> to vector<1x2x64xf32>
    tpu.vector_store %arg5[%c0_6, %c0_7, %c0_8], %12 {strides = array<i32>} : memref<1x2x64xf32, #tpu.memory_space<vmem>>, vector<1x2x64xf32>,
    return
  }
  func.func @transform_0(%arg0: i32, %arg1: i32) -> (i32, i32, i32) {
    %c0_i32 = arith.constant 0 : i32
    %c0_i32_0 = arith.constant 0 : i32
    return %arg0, %arg1, %c0_i32 : i32, i32, i32
  }
  func.func @transform_1(%arg0: i32, %arg1: i32) -> (i32, i32) {
    %c0_i32 = arith.constant 0 : i32
    %c0_i32_0 = arith.constant 0 : i32
    %c0_i32_1 = arith.constant 0 : i32
    return %c0_i32, %c0_i32_0 : i32, i32
  }
  func.func @transform_2(%arg0: i32, %arg1: i32) -> (i32, i32) {
    %c0_i32 = arith.constant 0 : i32
    %c0_i32_0 = arith.constant 0 : i32
    %c0_i32_1 = arith.constant 0 : i32
    return %c0_i32, %c0_i32_0 : i32, i32
  }
  func.func @transform_3(%arg0: i32, %arg1: i32) -> (i32, i32, i32) {
    %c0_i32 = arith.constant 0 : i32
    %c0_i32_0 = arith.constant 0 : i32
    return %arg0, %arg1, %c0_i32 : i32, i32, i32
  }
}

module attributes {stable_mosaic.version = 11 : i64} {
  func.func @_scale_shift_relu_kernel(%arg0: i32, %arg1: i32, %arg2: memref<1x32x32xf32, #tpu.memory_space<vmem>>, %arg3: memref<1x32xf32, #tpu.memory_space<vmem>>, %arg4: memref<1x32xf32, #tpu.memory_space<vmem>>, %arg5: memref<1x32x32xf32, #tpu.memory_space<vmem>>) attributes {dimension_semantics = [#tpu.dimension_semantics<parallel>, #tpu.dimension_semantics<parallel>], iteration_bounds = array<i64: 4, 1>, scalar_prefetch = 0 : i64, scratch_operands = 0 : i64, tpu.core_type = #tpu.core_type<tc>, window_params = [{transform_indices = @transform_0, window_bounds = array<i64: 1, 32, 32>}, {pipeline_mode = #tpu.pipeline_mode<synchronous>, transform_indices = @transform_1, window_bounds = array<i64: 1, 32>}, {pipeline_mode = #tpu.pipeline_mode<synchronous>, transform_indices = @transform_2, window_bounds = array<i64: 1, 32>}, {transform_indices = @transform_3, window_bounds = array<i64: 1, 32, 32>}]} {
    %c0 = arith.constant 0 : index
    %c0_0 = arith.constant 0 : index
    %c0_1 = arith.constant 0 : index
    %0 = vector.load %arg2[%c0, %c0_0, %c0_1] : memref<1x32x32xf32, #tpu.memory_space<vmem>>, vector<1x32x32xf32>
    %1 = vector.shape_cast %0 : vector<1x32x32xf32> to vector<32x32xf32>
    %c0_2 = arith.constant 0 : index
    %c0_3 = arith.constant 0 : index
    %2 = vector.load %arg3[%c0_2, %c0_3] : memref<1x32xf32, #tpu.memory_space<vmem>>, vector<1x32xf32>
    %3 = vector.broadcast %2 : vector<1x32xf32> to vector<32x32xf32>
    %4 = arith.mulf %1, %3 : vector<32x32xf32>
    %c0_4 = arith.constant 0 : index
    %c0_5 = arith.constant 0 : index
    %5 = vector.load %arg4[%c0_4, %c0_5] : memref<1x32xf32, #tpu.memory_space<vmem>>, vector<1x32xf32>
    %6 = vector.broadcast %5 : vector<1x32xf32> to vector<32x32xf32>
    %7 = arith.addf %4, %6 : vector<32x32xf32>
    %cst = arith.constant 0.000000e+00 : f32
    %8 = vector.broadcast %cst : f32 to vector<32x32xf32>
    %9 = arith.maximumf %7, %8 : vector<32x32xf32>
    %c0_6 = arith.constant 0 : index
    %c0_7 = arith.constant 0 : index
    %c0_8 = arith.constant 0 : index
    %10 = vector.load %arg5[%c0_6, %c0_7, %c0_8] : memref<1x32x32xf32, #tpu.memory_space<vmem>>, vector<1x32x32xf32>
    %11 = vector.shape_cast %10 : vector<1x32x32xf32> to vector<32x32xf32>
    %12 = vector.shape_cast %9 : vector<32x32xf32> to vector<1x32x32xf32>
    tpu.vector_store %arg5[%c0_6, %c0_7, %c0_8], %12 {strides = array<i32>} : memref<1x32x32xf32, #tpu.memory_space<vmem>>, vector<1x32x32xf32>,
    return
  }
  func.func @transform_0(%arg0: i32, %arg1: i32) -> (i32, i32, i32) {
    %c0_i32 = arith.constant 0 : i32
    %c0_i32_0 = arith.constant 0 : i32
    return %arg0, %arg1, %c0_i32 : i32, i32, i32
  }
  func.func @transform_1(%arg0: i32, %arg1: i32) -> (i32, i32) {
    %c0_i32 = arith.constant 0 : i32
    %c0_i32_0 = arith.constant 0 : i32
    %c0_i32_1 = arith.constant 0 : i32
    return %c0_i32, %c0_i32_0 : i32, i32
  }
  func.func @transform_2(%arg0: i32, %arg1: i32) -> (i32, i32) {
    %c0_i32 = arith.constant 0 : i32
    %c0_i32_0 = arith.constant 0 : i32
    %c0_i32_1 = arith.constant 0 : i32
    return %c0_i32, %c0_i32_0 : i32, i32
  }
  func.func @transform_3(%arg0: i32, %arg1: i32) -> (i32, i32, i32) {
    %c0_i32 = arith.constant 0 : i32
    %c0_i32_0 = arith.constant 0 : i32
    return %arg0, %arg1, %c0_i32 : i32, i32, i32
  }
}

module attributes {stable_mosaic.version = 11 : i64} {
  func.func @_gemm_stats_kernel(%arg0: i32, %arg1: i32, %arg2: memref<1x32x256xbf16, #tpu.memory_space<vmem>>, %arg3: memref<1x256x32xbf16, #tpu.memory_space<vmem>>, %arg4: memref<1x32x32xf32, #tpu.memory_space<vmem>>, %arg5: memref<1x32xf32, #tpu.memory_space<vmem>>, %arg6: memref<1x32xf32, #tpu.memory_space<vmem>>) attributes {dimension_semantics = [#tpu.dimension_semantics<arbitrary>, #tpu.dimension_semantics<arbitrary>], iteration_bounds = array<i64: 4, 1>, scalar_prefetch = 0 : i64, scratch_operands = 0 : i64, tpu.core_type = #tpu.core_type<tc>, window_params = [{transform_indices = @transform_0, window_bounds = array<i64: 1, 32, 256>}, {transform_indices = @transform_1, window_bounds = array<i64: 1, 256, 32>}, {transform_indices = @transform_2, window_bounds = array<i64: 1, 32, 32>}, {pipeline_mode = #tpu.pipeline_mode<synchronous>, transform_indices = @transform_3, window_bounds = array<i64: 1, 32>}, {pipeline_mode = #tpu.pipeline_mode<synchronous>, transform_indices = @transform_4, window_bounds = array<i64: 1, 32>}]} {
    %c0_i32 = arith.constant 0 : i32
    %0 = arith.cmpi eq, %arg0, %c0_i32 : i32
    %c0_i32_0 = arith.constant 0 : i32
    %1 = arith.cmpi eq, %arg1, %c0_i32_0 : i32
    %2 = arith.andi %0, %1 : i1
    %3 = arith.extui %2 : i1 to i32
    %c0_i32_1 = arith.constant 0 : i32
    %4 = arith.cmpi ne, %3, %c0_i32_1 : i32
    scf.if %4 {
      %cst_20 = arith.constant 0.000000e+00 : f32
      %24 = vector.broadcast %cst_20 : f32 to vector<1x32xf32>
      %c0_21 = arith.constant 0 : index
      %c0_22 = arith.constant 0 : index
      %25 = vector.load %arg5[%c0_21, %c0_22] : memref<1x32xf32, #tpu.memory_space<vmem>>, vector<1x32xf32>
      tpu.vector_store %arg5[%c0_21, %c0_22], %24 {strides = array<i32>} : memref<1x32xf32, #tpu.memory_space<vmem>>, vector<1x32xf32>,
      %cst_23 = arith.constant 0.000000e+00 : f32
      %26 = vector.broadcast %cst_23 : f32 to vector<1x32xf32>
      %c0_24 = arith.constant 0 : index
      %c0_25 = arith.constant 0 : index
      %27 = vector.load %arg6[%c0_24, %c0_25] : memref<1x32xf32, #tpu.memory_space<vmem>>, vector<1x32xf32>
      tpu.vector_store %arg6[%c0_24, %c0_25], %26 {strides = array<i32>} : memref<1x32xf32, #tpu.memory_space<vmem>>, vector<1x32xf32>,
    } else {
    }
    %c0 = arith.constant 0 : index
    %c0_2 = arith.constant 0 : index
    %c0_3 = arith.constant 0 : index
    %5 = vector.load %arg2[%c0, %c0_2, %c0_3] : memref<1x32x256xbf16, #tpu.memory_space<vmem>>, vector<1x32x256xbf16>
    %6 = vector.shape_cast %5 : vector<1x32x256xbf16> to vector<32x256xbf16>
    %c0_4 = arith.constant 0 : index
    %c0_5 = arith.constant 0 : index
    %c0_6 = arith.constant 0 : index
    %7 = vector.load %arg3[%c0_4, %c0_5, %c0_6] : memref<1x256x32xbf16, #tpu.memory_space<vmem>>, vector<1x256x32xbf16>
    %8 = vector.shape_cast %7 : vector<1x256x32xbf16> to vector<256x32xbf16>
    %cst = arith.constant dense<0.000000e+00> : vector<32x32xf32>
    %9 = tpu.matmul %6, %8, %cst {dimension_numbers = #tpu.dot_dimension_numbers<[1], [0], [0], [1], [0, 0, 1, 1], [], []>} : vector<32x256xbf16>, vector<256x32xbf16>, vector<32x32xf32> -> vector<32x32xf32>
    %c0_7 = arith.constant 0 : index
    %c0_8 = arith.constant 0 : index
    %c0_9 = arith.constant 0 : index
    %10 = vector.load %arg4[%c0_7, %c0_8, %c0_9] : memref<1x32x32xf32, #tpu.memory_space<vmem>>, vector<1x32x32xf32>
    %11 = vector.shape_cast %10 : vector<1x32x32xf32> to vector<32x32xf32>
    %12 = vector.shape_cast %9 : vector<32x32xf32> to vector<1x32x32xf32>
    tpu.vector_store %arg4[%c0_7, %c0_8, %c0_9], %12 {strides = array<i32>} : memref<1x32x32xf32, #tpu.memory_space<vmem>>, vector<1x32x32xf32>,
    %c0_10 = arith.constant 0 : index
    %c0_11 = arith.constant 0 : index
    %13 = vector.load %arg5[%c0_10, %c0_11] : memref<1x32xf32, #tpu.memory_space<vmem>>, vector<1x32xf32>
    %cst_12 = arith.constant dense<0.000000e+00> : vector<32xf32>
    %14 = vector.multi_reduction <add>, %9, %cst_12 [0] : vector<32x32xf32> to vector<32xf32>
    %15 = vector.shape_cast %14 : vector<32xf32> to vector<1x32xf32>
    %16 = arith.addf %13, %15 : vector<1x32xf32>
    %c0_13 = arith.constant 0 : index
    %c0_14 = arith.constant 0 : index
    %17 = vector.load %arg5[%c0_13, %c0_14] : memref<1x32xf32, #tpu.memory_space<vmem>>, vector<1x32xf32>
    tpu.vector_store %arg5[%c0_13, %c0_14], %16 {strides = array<i32>} : memref<1x32xf32, #tpu.memory_space<vmem>>, vector<1x32xf32>,
    %c0_15 = arith.constant 0 : index
    %c0_16 = arith.constant 0 : index
    %18 = vector.load %arg6[%c0_15, %c0_16] : memref<1x32xf32, #tpu.memory_space<vmem>>, vector<1x32xf32>
    %19 = arith.mulf %9, %9 : vector<32x32xf32>
    %cst_17 = arith.constant dense<0.000000e+00> : vector<32xf32>
    %20 = vector.multi_reduction <add>, %19, %cst_17 [0] : vector<32x32xf32> to vector<32xf32>
    %21 = vector.shape_cast %20 : vector<32xf32> to vector<1x32xf32>
    %22 = arith.addf %18, %21 : vector<1x32xf32>
    %c0_18 = arith.constant 0 : index
    %c0_19 = arith.constant 0 : index
    %23 = vector.load %arg6[%c0_18, %c0_19] : memref<1x32xf32, #tpu.memory_space<vmem>>, vector<1x32xf32>
    tpu.vector_store %arg6[%c0_18, %c0_19], %22 {strides = array<i32>} : memref<1x32xf32, #tpu.memory_space<vmem>>, vector<1x32xf32>,
    return
  }
  func.func @transform_0(%arg0: i32, %arg1: i32) -> (i32, i32, i32) {
    %c0_i32 = arith.constant 0 : i32
    %c0_i32_0 = arith.constant 0 : i32
    return %arg0, %arg1, %c0_i32 : i32, i32, i32
  }
  func.func @transform_1(%arg0: i32, %arg1: i32) -> (i32, i32, i32) {
    %c0_i32 = arith.constant 0 : i32
    %c0_i32_0 = arith.constant 0 : i32
    %c0_i32_1 = arith.constant 0 : i32
    return %arg0, %c0_i32, %c0_i32_0 : i32, i32, i32
  }
  func.func @transform_2(%arg0: i32, %arg1: i32) -> (i32, i32, i32) {
    %c0_i32 = arith.constant 0 : i32
    %c0_i32_0 = arith.constant 0 : i32
    return %arg0, %arg1, %c0_i32 : i32, i32, i32
  }
  func.func @transform_3(%arg0: i32, %arg1: i32) -> (i32, i32) {
    %c0_i32 = arith.constant 0 : i32
    %c0_i32_0 = arith.constant 0 : i32
    %c0_i32_1 = arith.constant 0 : i32
    return %c0_i32, %c0_i32_0 : i32, i32
  }
  func.func @transform_4(%arg0: i32, %arg1: i32) -> (i32, i32) {
    %c0_i32 = arith.constant 0 : i32
    %c0_i32_0 = arith.constant 0 : i32
    %c0_i32_1 = arith.constant 0 : i32
    return %c0_i32, %c0_i32_0 : i32, i32
  }
}

module attributes {stable_mosaic.version = 11 : i64} {
  func.func @_gemm_stats_kernel(%arg0: i32, %arg1: i32, %arg2: memref<1x128x128xbf16, #tpu.memory_space<vmem>>, %arg3: memref<1x128x16xbf16, #tpu.memory_space<vmem>>, %arg4: memref<1x128x16xf32, #tpu.memory_space<vmem>>, %arg5: memref<1x16xf32, #tpu.memory_space<vmem>>, %arg6: memref<1x16xf32, #tpu.memory_space<vmem>>) attributes {dimension_semantics = [#tpu.dimension_semantics<arbitrary>, #tpu.dimension_semantics<arbitrary>], iteration_bounds = array<i64: 4, 1>, scalar_prefetch = 0 : i64, scratch_operands = 0 : i64, tpu.core_type = #tpu.core_type<tc>, window_params = [{transform_indices = @transform_0, window_bounds = array<i64: 1, 128, 128>}, {transform_indices = @transform_1, window_bounds = array<i64: 1, 128, 16>}, {transform_indices = @transform_2, window_bounds = array<i64: 1, 128, 16>}, {pipeline_mode = #tpu.pipeline_mode<synchronous>, transform_indices = @transform_3, window_bounds = array<i64: 1, 16>}, {pipeline_mode = #tpu.pipeline_mode<synchronous>, transform_indices = @transform_4, window_bounds = array<i64: 1, 16>}]} {
    %c0_i32 = arith.constant 0 : i32
    %0 = arith.cmpi eq, %arg0, %c0_i32 : i32
    %c0_i32_0 = arith.constant 0 : i32
    %1 = arith.cmpi eq, %arg1, %c0_i32_0 : i32
    %2 = arith.andi %0, %1 : i1
    %3 = arith.extui %2 : i1 to i32
    %c0_i32_1 = arith.constant 0 : i32
    %4 = arith.cmpi ne, %3, %c0_i32_1 : i32
    scf.if %4 {
      %cst_20 = arith.constant 0.000000e+00 : f32
      %24 = vector.broadcast %cst_20 : f32 to vector<1x16xf32>
      %c0_21 = arith.constant 0 : index
      %c0_22 = arith.constant 0 : index
      %25 = vector.load %arg5[%c0_21, %c0_22] : memref<1x16xf32, #tpu.memory_space<vmem>>, vector<1x16xf32>
      tpu.vector_store %arg5[%c0_21, %c0_22], %24 {strides = array<i32>} : memref<1x16xf32, #tpu.memory_space<vmem>>, vector<1x16xf32>,
      %cst_23 = arith.constant 0.000000e+00 : f32
      %26 = vector.broadcast %cst_23 : f32 to vector<1x16xf32>
      %c0_24 = arith.constant 0 : index
      %c0_25 = arith.constant 0 : index
      %27 = vector.load %arg6[%c0_24, %c0_25] : memref<1x16xf32, #tpu.memory_space<vmem>>, vector<1x16xf32>
      tpu.vector_store %arg6[%c0_24, %c0_25], %26 {strides = array<i32>} : memref<1x16xf32, #tpu.memory_space<vmem>>, vector<1x16xf32>,
    } else {
    }
    %c0 = arith.constant 0 : index
    %c0_2 = arith.constant 0 : index
    %c0_3 = arith.constant 0 : index
    %5 = vector.load %arg2[%c0, %c0_2, %c0_3] : memref<1x128x128xbf16, #tpu.memory_space<vmem>>, vector<1x128x128xbf16>
    %6 = vector.shape_cast %5 : vector<1x128x128xbf16> to vector<128x128xbf16>
    %c0_4 = arith.constant 0 : index
    %c0_5 = arith.constant 0 : index
    %c0_6 = arith.constant 0 : index
    %7 = vector.load %arg3[%c0_4, %c0_5, %c0_6] : memref<1x128x16xbf16, #tpu.memory_space<vmem>>, vector<1x128x16xbf16>
    %8 = vector.shape_cast %7 : vector<1x128x16xbf16> to vector<128x16xbf16>
    %cst = arith.constant dense<0.000000e+00> : vector<128x16xf32>
    %9 = tpu.matmul %6, %8, %cst {dimension_numbers = #tpu.dot_dimension_numbers<[1], [0], [0], [1], [0, 0, 1, 1], [], []>} : vector<128x128xbf16>, vector<128x16xbf16>, vector<128x16xf32> -> vector<128x16xf32>
    %c0_7 = arith.constant 0 : index
    %c0_8 = arith.constant 0 : index
    %c0_9 = arith.constant 0 : index
    %10 = vector.load %arg4[%c0_7, %c0_8, %c0_9] : memref<1x128x16xf32, #tpu.memory_space<vmem>>, vector<1x128x16xf32>
    %11 = vector.shape_cast %10 : vector<1x128x16xf32> to vector<128x16xf32>
    %12 = vector.shape_cast %9 : vector<128x16xf32> to vector<1x128x16xf32>
    tpu.vector_store %arg4[%c0_7, %c0_8, %c0_9], %12 {strides = array<i32>} : memref<1x128x16xf32, #tpu.memory_space<vmem>>, vector<1x128x16xf32>,
    %c0_10 = arith.constant 0 : index
    %c0_11 = arith.constant 0 : index
    %13 = vector.load %arg5[%c0_10, %c0_11] : memref<1x16xf32, #tpu.memory_space<vmem>>, vector<1x16xf32>
    %cst_12 = arith.constant dense<0.000000e+00> : vector<16xf32>
    %14 = vector.multi_reduction <add>, %9, %cst_12 [0] : vector<128x16xf32> to vector<16xf32>
    %15 = vector.shape_cast %14 : vector<16xf32> to vector<1x16xf32>
    %16 = arith.addf %13, %15 : vector<1x16xf32>
    %c0_13 = arith.constant 0 : index
    %c0_14 = arith.constant 0 : index
    %17 = vector.load %arg5[%c0_13, %c0_14] : memref<1x16xf32, #tpu.memory_space<vmem>>, vector<1x16xf32>
    tpu.vector_store %arg5[%c0_13, %c0_14], %16 {strides = array<i32>} : memref<1x16xf32, #tpu.memory_space<vmem>>, vector<1x16xf32>,
    %c0_15 = arith.constant 0 : index
    %c0_16 = arith.constant 0 : index
    %18 = vector.load %arg6[%c0_15, %c0_16] : memref<1x16xf32, #tpu.memory_space<vmem>>, vector<1x16xf32>
    %19 = arith.mulf %9, %9 : vector<128x16xf32>
    %cst_17 = arith.constant dense<0.000000e+00> : vector<16xf32>
    %20 = vector.multi_reduction <add>, %19, %cst_17 [0] : vector<128x16xf32> to vector<16xf32>
    %21 = vector.shape_cast %20 : vector<16xf32> to vector<1x16xf32>
    %22 = arith.addf %18, %21 : vector<1x16xf32>
    %c0_18 = arith.constant 0 : index
    %c0_19 = arith.constant 0 : index
    %23 = vector.load %arg6[%c0_18, %c0_19] : memref<1x16xf32, #tpu.memory_space<vmem>>, vector<1x16xf32>
    tpu.vector_store %arg6[%c0_18, %c0_19], %22 {strides = array<i32>} : memref<1x16xf32, #tpu.memory_space<vmem>>, vector<1x16xf32>,
    return
  }
  func.func @transform_0(%arg0: i32, %arg1: i32) -> (i32, i32, i32) {
    %c0_i32 = arith.constant 0 : i32
    %c0_i32_0 = arith.constant 0 : i32
    return %arg0, %arg1, %c0_i32 : i32, i32, i32
  }
  func.func @transform_1(%arg0: i32, %arg1: i32) -> (i32, i32, i32) {
    %c0_i32 = arith.constant 0 : i32
    %c0_i32_0 = arith.constant 0 : i32
    %c0_i32_1 = arith.constant 0 : i32
    return %arg0, %c0_i32, %c0_i32_0 : i32, i32, i32
  }
  func.func @transform_2(%arg0: i32, %arg1: i32) -> (i32, i32, i32) {
    %c0_i32 = arith.constant 0 : i32
    %c0_i32_0 = arith.constant 0 : i32
    return %arg0, %arg1, %c0_i32 : i32, i32, i32
  }
  func.func @transform_3(%arg0: i32, %arg1: i32) -> (i32, i32) {
    %c0_i32 = arith.constant 0 : i32
    %c0_i32_0 = arith.constant 0 : i32
    %c0_i32_1 = arith.constant 0 : i32
    return %c0_i32, %c0_i32_0 : i32, i32
  }
  func.func @transform_4(%arg0: i32, %arg1: i32) -> (i32, i32) {
    %c0_i32 = arith.constant 0 : i32
    %c0_i32_0 = arith.constant 0 : i32
    %c0_i32_1 = arith.constant 0 : i32
    return %c0_i32, %c0_i32_0 : i32, i32
  }
}

module attributes {stable_mosaic.version = 11 : i64} {
  func.func @_scale_shift_relu_kernel(%arg0: i32, %arg1: i32, %arg2: memref<1x128x16xf32, #tpu.memory_space<vmem>>, %arg3: memref<1x16xf32, #tpu.memory_space<vmem>>, %arg4: memref<1x16xf32, #tpu.memory_space<vmem>>, %arg5: memref<1x128x16xf32, #tpu.memory_space<vmem>>) attributes {dimension_semantics = [#tpu.dimension_semantics<parallel>, #tpu.dimension_semantics<parallel>], iteration_bounds = array<i64: 4, 1>, scalar_prefetch = 0 : i64, scratch_operands = 0 : i64, tpu.core_type = #tpu.core_type<tc>, window_params = [{transform_indices = @transform_0, window_bounds = array<i64: 1, 128, 16>}, {pipeline_mode = #tpu.pipeline_mode<synchronous>, transform_indices = @transform_1, window_bounds = array<i64: 1, 16>}, {pipeline_mode = #tpu.pipeline_mode<synchronous>, transform_indices = @transform_2, window_bounds = array<i64: 1, 16>}, {transform_indices = @transform_3, window_bounds = array<i64: 1, 128, 16>}]} {
    %c0 = arith.constant 0 : index
    %c0_0 = arith.constant 0 : index
    %c0_1 = arith.constant 0 : index
    %0 = vector.load %arg2[%c0, %c0_0, %c0_1] : memref<1x128x16xf32, #tpu.memory_space<vmem>>, vector<1x128x16xf32>
    %1 = vector.shape_cast %0 : vector<1x128x16xf32> to vector<128x16xf32>
    %c0_2 = arith.constant 0 : index
    %c0_3 = arith.constant 0 : index
    %2 = vector.load %arg3[%c0_2, %c0_3] : memref<1x16xf32, #tpu.memory_space<vmem>>, vector<1x16xf32>
    %3 = vector.broadcast %2 : vector<1x16xf32> to vector<128x16xf32>
    %4 = arith.mulf %1, %3 : vector<128x16xf32>
    %c0_4 = arith.constant 0 : index
    %c0_5 = arith.constant 0 : index
    %5 = vector.load %arg4[%c0_4, %c0_5] : memref<1x16xf32, #tpu.memory_space<vmem>>, vector<1x16xf32>
    %6 = vector.broadcast %5 : vector<1x16xf32> to vector<128x16xf32>
    %7 = arith.addf %4, %6 : vector<128x16xf32>
    %cst = arith.constant 0.000000e+00 : f32
    %8 = vector.broadcast %cst : f32 to vector<128x16xf32>
    %9 = arith.maximumf %7, %8 : vector<128x16xf32>
    %c0_6 = arith.constant 0 : index
    %c0_7 = arith.constant 0 : index
    %c0_8 = arith.constant 0 : index
    %10 = vector.load %arg5[%c0_6, %c0_7, %c0_8] : memref<1x128x16xf32, #tpu.memory_space<vmem>>, vector<1x128x16xf32>
    %11 = vector.shape_cast %10 : vector<1x128x16xf32> to vector<128x16xf32>
    %12 = vector.shape_cast %9 : vector<128x16xf32> to vector<1x128x16xf32>
    tpu.vector_store %arg5[%c0_6, %c0_7, %c0_8], %12 {strides = array<i32>} : memref<1x128x16xf32, #tpu.memory_space<vmem>>, vector<1x128x16xf32>,
    return
  }
  func.func @transform_0(%arg0: i32, %arg1: i32) -> (i32, i32, i32) {
    %c0_i32 = arith.constant 0 : i32
    %c0_i32_0 = arith.constant 0 : i32
    return %arg0, %arg1, %c0_i32 : i32, i32, i32
  }
  func.func @transform_1(%arg0: i32, %arg1: i32) -> (i32, i32) {
    %c0_i32 = arith.constant 0 : i32
    %c0_i32_0 = arith.constant 0 : i32
    %c0_i32_1 = arith.constant 0 : i32
    return %c0_i32, %c0_i32_0 : i32, i32
  }
  func.func @transform_2(%arg0: i32, %arg1: i32) -> (i32, i32) {
    %c0_i32 = arith.constant 0 : i32
    %c0_i32_0 = arith.constant 0 : i32
    %c0_i32_1 = arith.constant 0 : i32
    return %c0_i32, %c0_i32_0 : i32, i32
  }
  func.func @transform_3(%arg0: i32, %arg1: i32) -> (i32, i32, i32) {
    %c0_i32 = arith.constant 0 : i32
    %c0_i32_0 = arith.constant 0 : i32
    return %arg0, %arg1, %c0_i32 : i32, i32, i32
  }
}

module attributes {stable_mosaic.version = 11 : i64} {
  func.func @_scale_shift_relu_kernel(%arg0: i32, %arg1: i32, %arg2: memref<1x512x8xf32, #tpu.memory_space<vmem>>, %arg3: memref<1x8xf32, #tpu.memory_space<vmem>>, %arg4: memref<1x8xf32, #tpu.memory_space<vmem>>, %arg5: memref<1x512x8xf32, #tpu.memory_space<vmem>>) attributes {dimension_semantics = [#tpu.dimension_semantics<parallel>, #tpu.dimension_semantics<parallel>], iteration_bounds = array<i64: 4, 1>, scalar_prefetch = 0 : i64, scratch_operands = 0 : i64, tpu.core_type = #tpu.core_type<tc>, window_params = [{transform_indices = @transform_0, window_bounds = array<i64: 1, 512, 8>}, {pipeline_mode = #tpu.pipeline_mode<synchronous>, transform_indices = @transform_1, window_bounds = array<i64: 1, 8>}, {pipeline_mode = #tpu.pipeline_mode<synchronous>, transform_indices = @transform_2, window_bounds = array<i64: 1, 8>}, {transform_indices = @transform_3, window_bounds = array<i64: 1, 512, 8>}]} {
    %c0 = arith.constant 0 : index
    %c0_0 = arith.constant 0 : index
    %c0_1 = arith.constant 0 : index
    %0 = vector.load %arg2[%c0, %c0_0, %c0_1] : memref<1x512x8xf32, #tpu.memory_space<vmem>>, vector<1x512x8xf32>
    %1 = vector.shape_cast %0 : vector<1x512x8xf32> to vector<512x8xf32>
    %c0_2 = arith.constant 0 : index
    %c0_3 = arith.constant 0 : index
    %2 = vector.load %arg3[%c0_2, %c0_3] : memref<1x8xf32, #tpu.memory_space<vmem>>, vector<1x8xf32>
    %3 = vector.broadcast %2 : vector<1x8xf32> to vector<512x8xf32>
    %4 = arith.mulf %1, %3 : vector<512x8xf32>
    %c0_4 = arith.constant 0 : index
    %c0_5 = arith.constant 0 : index
    %5 = vector.load %arg4[%c0_4, %c0_5] : memref<1x8xf32, #tpu.memory_space<vmem>>, vector<1x8xf32>
    %6 = vector.broadcast %5 : vector<1x8xf32> to vector<512x8xf32>
    %7 = arith.addf %4, %6 : vector<512x8xf32>
    %cst = arith.constant 0.000000e+00 : f32
    %8 = vector.broadcast %cst : f32 to vector<512x8xf32>
    %9 = arith.maximumf %7, %8 : vector<512x8xf32>
    %c0_6 = arith.constant 0 : index
    %c0_7 = arith.constant 0 : index
    %c0_8 = arith.constant 0 : index
    %10 = vector.load %arg5[%c0_6, %c0_7, %c0_8] : memref<1x512x8xf32, #tpu.memory_space<vmem>>, vector<1x512x8xf32>
    %11 = vector.shape_cast %10 : vector<1x512x8xf32> to vector<512x8xf32>
    %12 = vector.shape_cast %9 : vector<512x8xf32> to vector<1x512x8xf32>
    tpu.vector_store %arg5[%c0_6, %c0_7, %c0_8], %12 {strides = array<i32>} : memref<1x512x8xf32, #tpu.memory_space<vmem>>, vector<1x512x8xf32>,
    return
  }
  func.func @transform_0(%arg0: i32, %arg1: i32) -> (i32, i32, i32) {
    %c0_i32 = arith.constant 0 : i32
    %c0_i32_0 = arith.constant 0 : i32
    return %arg0, %arg1, %c0_i32 : i32, i32, i32
  }
  func.func @transform_1(%arg0: i32, %arg1: i32) -> (i32, i32) {
    %c0_i32 = arith.constant 0 : i32
    %c0_i32_0 = arith.constant 0 : i32
    %c0_i32_1 = arith.constant 0 : i32
    return %c0_i32, %c0_i32_0 : i32, i32
  }
  func.func @transform_2(%arg0: i32, %arg1: i32) -> (i32, i32) {
    %c0_i32 = arith.constant 0 : i32
    %c0_i32_0 = arith.constant 0 : i32
    %c0_i32_1 = arith.constant 0 : i32
    return %c0_i32, %c0_i32_0 : i32, i32
  }
  func.func @transform_3(%arg0: i32, %arg1: i32) -> (i32, i32, i32) {
    %c0_i32 = arith.constant 0 : i32
    %c0_i32_0 = arith.constant 0 : i32
    return %arg0, %arg1, %c0_i32 : i32, i32, i32
  }
}

module attributes {stable_mosaic.version = 11 : i64} {
  func.func @_gemm_stats_kernel(%arg0: i32, %arg1: i32, %arg2: memref<1x512x64xbf16, #tpu.memory_space<vmem>>, %arg3: memref<1x64x8xbf16, #tpu.memory_space<vmem>>, %arg4: memref<1x512x8xf32, #tpu.memory_space<vmem>>, %arg5: memref<1x8xf32, #tpu.memory_space<vmem>>, %arg6: memref<1x8xf32, #tpu.memory_space<vmem>>) attributes {dimension_semantics = [#tpu.dimension_semantics<arbitrary>, #tpu.dimension_semantics<arbitrary>], iteration_bounds = array<i64: 4, 1>, scalar_prefetch = 0 : i64, scratch_operands = 0 : i64, tpu.core_type = #tpu.core_type<tc>, window_params = [{transform_indices = @transform_0, window_bounds = array<i64: 1, 512, 64>}, {transform_indices = @transform_1, window_bounds = array<i64: 1, 64, 8>}, {transform_indices = @transform_2, window_bounds = array<i64: 1, 512, 8>}, {pipeline_mode = #tpu.pipeline_mode<synchronous>, transform_indices = @transform_3, window_bounds = array<i64: 1, 8>}, {pipeline_mode = #tpu.pipeline_mode<synchronous>, transform_indices = @transform_4, window_bounds = array<i64: 1, 8>}]} {
    %c0_i32 = arith.constant 0 : i32
    %0 = arith.cmpi eq, %arg0, %c0_i32 : i32
    %c0_i32_0 = arith.constant 0 : i32
    %1 = arith.cmpi eq, %arg1, %c0_i32_0 : i32
    %2 = arith.andi %0, %1 : i1
    %3 = arith.extui %2 : i1 to i32
    %c0_i32_1 = arith.constant 0 : i32
    %4 = arith.cmpi ne, %3, %c0_i32_1 : i32
    scf.if %4 {
      %cst_20 = arith.constant 0.000000e+00 : f32
      %24 = vector.broadcast %cst_20 : f32 to vector<1x8xf32>
      %c0_21 = arith.constant 0 : index
      %c0_22 = arith.constant 0 : index
      %25 = vector.load %arg5[%c0_21, %c0_22] : memref<1x8xf32, #tpu.memory_space<vmem>>, vector<1x8xf32>
      tpu.vector_store %arg5[%c0_21, %c0_22], %24 {strides = array<i32>} : memref<1x8xf32, #tpu.memory_space<vmem>>, vector<1x8xf32>,
      %cst_23 = arith.constant 0.000000e+00 : f32
      %26 = vector.broadcast %cst_23 : f32 to vector<1x8xf32>
      %c0_24 = arith.constant 0 : index
      %c0_25 = arith.constant 0 : index
      %27 = vector.load %arg6[%c0_24, %c0_25] : memref<1x8xf32, #tpu.memory_space<vmem>>, vector<1x8xf32>
      tpu.vector_store %arg6[%c0_24, %c0_25], %26 {strides = array<i32>} : memref<1x8xf32, #tpu.memory_space<vmem>>, vector<1x8xf32>,
    } else {
    }
    %c0 = arith.constant 0 : index
    %c0_2 = arith.constant 0 : index
    %c0_3 = arith.constant 0 : index
    %5 = vector.load %arg2[%c0, %c0_2, %c0_3] : memref<1x512x64xbf16, #tpu.memory_space<vmem>>, vector<1x512x64xbf16>
    %6 = vector.shape_cast %5 : vector<1x512x64xbf16> to vector<512x64xbf16>
    %c0_4 = arith.constant 0 : index
    %c0_5 = arith.constant 0 : index
    %c0_6 = arith.constant 0 : index
    %7 = vector.load %arg3[%c0_4, %c0_5, %c0_6] : memref<1x64x8xbf16, #tpu.memory_space<vmem>>, vector<1x64x8xbf16>
    %8 = vector.shape_cast %7 : vector<1x64x8xbf16> to vector<64x8xbf16>
    %cst = arith.constant dense<0.000000e+00> : vector<512x8xf32>
    %9 = tpu.matmul %6, %8, %cst {dimension_numbers = #tpu.dot_dimension_numbers<[1], [0], [0], [1], [0, 0, 1, 1], [], []>} : vector<512x64xbf16>, vector<64x8xbf16>, vector<512x8xf32> -> vector<512x8xf32>
    %c0_7 = arith.constant 0 : index
    %c0_8 = arith.constant 0 : index
    %c0_9 = arith.constant 0 : index
    %10 = vector.load %arg4[%c0_7, %c0_8, %c0_9] : memref<1x512x8xf32, #tpu.memory_space<vmem>>, vector<1x512x8xf32>
    %11 = vector.shape_cast %10 : vector<1x512x8xf32> to vector<512x8xf32>
    %12 = vector.shape_cast %9 : vector<512x8xf32> to vector<1x512x8xf32>
    tpu.vector_store %arg4[%c0_7, %c0_8, %c0_9], %12 {strides = array<i32>} : memref<1x512x8xf32, #tpu.memory_space<vmem>>, vector<1x512x8xf32>,
    %c0_10 = arith.constant 0 : index
    %c0_11 = arith.constant 0 : index
    %13 = vector.load %arg5[%c0_10, %c0_11] : memref<1x8xf32, #tpu.memory_space<vmem>>, vector<1x8xf32>
    %cst_12 = arith.constant dense<0.000000e+00> : vector<8xf32>
    %14 = vector.multi_reduction <add>, %9, %cst_12 [0] : vector<512x8xf32> to vector<8xf32>
    %15 = vector.shape_cast %14 : vector<8xf32> to vector<1x8xf32>
    %16 = arith.addf %13, %15 : vector<1x8xf32>
    %c0_13 = arith.constant 0 : index
    %c0_14 = arith.constant 0 : index
    %17 = vector.load %arg5[%c0_13, %c0_14] : memref<1x8xf32, #tpu.memory_space<vmem>>, vector<1x8xf32>
    tpu.vector_store %arg5[%c0_13, %c0_14], %16 {strides = array<i32>} : memref<1x8xf32, #tpu.memory_space<vmem>>, vector<1x8xf32>,
    %c0_15 = arith.constant 0 : index
    %c0_16 = arith.constant 0 : index
    %18 = vector.load %arg6[%c0_15, %c0_16] : memref<1x8xf32, #tpu.memory_space<vmem>>, vector<1x8xf32>
    %19 = arith.mulf %9, %9 : vector<512x8xf32>
    %cst_17 = arith.constant dense<0.000000e+00> : vector<8xf32>
    %20 = vector.multi_reduction <add>, %19, %cst_17 [0] : vector<512x8xf32> to vector<8xf32>
    %21 = vector.shape_cast %20 : vector<8xf32> to vector<1x8xf32>
    %22 = arith.addf %18, %21 : vector<1x8xf32>
    %c0_18 = arith.constant 0 : index
    %c0_19 = arith.constant 0 : index
    %23 = vector.load %arg6[%c0_18, %c0_19] : memref<1x8xf32, #tpu.memory_space<vmem>>, vector<1x8xf32>
    tpu.vector_store %arg6[%c0_18, %c0_19], %22 {strides = array<i32>} : memref<1x8xf32, #tpu.memory_space<vmem>>, vector<1x8xf32>,
    return
  }
  func.func @transform_0(%arg0: i32, %arg1: i32) -> (i32, i32, i32) {
    %c0_i32 = arith.constant 0 : i32
    %c0_i32_0 = arith.constant 0 : i32
    return %arg0, %arg1, %c0_i32 : i32, i32, i32
  }
  func.func @transform_1(%arg0: i32, %arg1: i32) -> (i32, i32, i32) {
    %c0_i32 = arith.constant 0 : i32
    %c0_i32_0 = arith.constant 0 : i32
    %c0_i32_1 = arith.constant 0 : i32
    return %arg0, %c0_i32, %c0_i32_0 : i32, i32, i32
  }
  func.func @transform_2(%arg0: i32, %arg1: i32) -> (i32, i32, i32) {
    %c0_i32 = arith.constant 0 : i32
    %c0_i32_0 = arith.constant 0 : i32
    return %arg0, %arg1, %c0_i32 : i32, i32, i32
  }
  func.func @transform_3(%arg0: i32, %arg1: i32) -> (i32, i32) {
    %c0_i32 = arith.constant 0 : i32
    %c0_i32_0 = arith.constant 0 : i32
    %c0_i32_1 = arith.constant 0 : i32
    return %c0_i32, %c0_i32_0 : i32, i32
  }
  func.func @transform_4(%arg0: i32, %arg1: i32) -> (i32, i32) {
    %c0_i32 = arith.constant 0 : i32
    %c0_i32_0 = arith.constant 0 : i32
    %c0_i32_1 = arith.constant 0 : i32
    return %c0_i32, %c0_i32_0 : i32, i32
  }
}

module attributes {stable_mosaic.version = 11 : i64} {
  func.func @_gemm_act_kernel(%arg0: i32, %arg1: i32, %arg2: memref<1x512x32xbf16, #tpu.memory_space<vmem>>, %arg3: memref<1x32x3xbf16, #tpu.memory_space<vmem>>, %arg4: memref<1x512x3xf32, #tpu.memory_space<vmem>>) attributes {dimension_semantics = [#tpu.dimension_semantics<parallel>, #tpu.dimension_semantics<parallel>], iteration_bounds = array<i64: 4, 4>, scalar_prefetch = 0 : i64, scratch_operands = 0 : i64, tpu.core_type = #tpu.core_type<tc>, window_params = [{transform_indices = @transform_0, window_bounds = array<i64: 1, 512, 32>}, {transform_indices = @transform_1, window_bounds = array<i64: 1, 32, 3>}, {transform_indices = @transform_2, window_bounds = array<i64: 1, 512, 3>}]} {
    %c0 = arith.constant 0 : index
    %c0_0 = arith.constant 0 : index
    %c0_1 = arith.constant 0 : index
    %0 = vector.load %arg2[%c0, %c0_0, %c0_1] : memref<1x512x32xbf16, #tpu.memory_space<vmem>>, vector<1x512x32xbf16>
    %1 = vector.shape_cast %0 : vector<1x512x32xbf16> to vector<512x32xbf16>
    %c0_2 = arith.constant 0 : index
    %c0_3 = arith.constant 0 : index
    %c0_4 = arith.constant 0 : index
    %2 = vector.load %arg3[%c0_2, %c0_3, %c0_4] : memref<1x32x3xbf16, #tpu.memory_space<vmem>>, vector<1x32x3xbf16>
    %3 = vector.shape_cast %2 : vector<1x32x3xbf16> to vector<32x3xbf16>
    %cst = arith.constant dense<0.000000e+00> : vector<512x3xf32>
    %4 = tpu.matmul %1, %3, %cst {dimension_numbers = #tpu.dot_dimension_numbers<[1], [0], [0], [1], [0, 0, 1, 1], [], []>} : vector<512x32xbf16>, vector<32x3xbf16>, vector<512x3xf32> -> vector<512x3xf32>
    %5 = math.tanh %4 : vector<512x3xf32>
    %c0_5 = arith.constant 0 : index
    %c0_6 = arith.constant 0 : index
    %c0_7 = arith.constant 0 : index
    %6 = vector.load %arg4[%c0_5, %c0_6, %c0_7] : memref<1x512x3xf32, #tpu.memory_space<vmem>>, vector<1x512x3xf32>
    %7 = vector.shape_cast %6 : vector<1x512x3xf32> to vector<512x3xf32>
    %8 = vector.shape_cast %5 : vector<512x3xf32> to vector<1x512x3xf32>
    tpu.vector_store %arg4[%c0_5, %c0_6, %c0_7], %8 {strides = array<i32>} : memref<1x512x3xf32, #tpu.memory_space<vmem>>, vector<1x512x3xf32>,
    return
  }
  func.func @transform_0(%arg0: i32, %arg1: i32) -> (i32, i32, i32) {
    %c0_i32 = arith.constant 0 : i32
    %c0_i32_0 = arith.constant 0 : i32
    return %arg0, %arg1, %c0_i32 : i32, i32, i32
  }
  func.func @transform_1(%arg0: i32, %arg1: i32) -> (i32, i32, i32) {
    %c0_i32 = arith.constant 0 : i32
    %c0_i32_0 = arith.constant 0 : i32
    %c0_i32_1 = arith.constant 0 : i32
    return %arg0, %c0_i32, %c0_i32_0 : i32, i32, i32
  }
  func.func @transform_2(%arg0: i32, %arg1: i32) -> (i32, i32, i32) {
    %c0_i32 = arith.constant 0 : i32
    %c0_i32_0 = arith.constant 0 : i32
    return %arg0, %arg1, %c0_i32 : i32, i32, i32
  }
}

</mosaic_0001>

<bundles_post_ra>
// kernel: generator_forward.9
= control target key start
LH: loop header
LB: loop body
LE: loop exit
PB: predicated region body
PF: predicated region fallthrough
CT: control target
= control target key end

     0   :  { %s463_s15 = smov 0   ;;  %s465_s16 = smov 0   ;;  %s517_s0 = inlined_call_operand.vmem [shape: bf16[1,2,8], index: 0, kind: input, shape index: {}]   ;;  %s518_s1 = inlined_call_operand.vmem [shape: bf16[16,8,64], index: 1, kind: input, shape index: {}]   ;;  %s519_s2 = inlined_call_operand.vmem [shape: f32[16,2,64], index: 2, kind: output, shape index: {0}]   ;;  %s520_s3 = inlined_call_operand.vmem [shape: f32[1,64], index: 3, kind: output, shape index: {1}]   ;;  %s521_s4 = inlined_call_operand.vmem [shape: f32[1,64], index: 4, kind: output, shape index: {2}]  }
   0x1   :  { %s467_s17 = smov 0  }
   0x2 LB: > { %s27_s18 = sadd.s32 1, %s431_s16  ;;  %p380_p0 = scmp.ge.s32.totalorder %s435_s17, 1  ;;  %s435_s17 = sphi %s467_s17, %s15_s17   ;;  %s431_s16 = sphi %s465_s16, %s523_s16   ;;  %s427_s15 = sphi %s463_s15, %s522_s15  }
   0x3   : > { %p29_p1 = scmp.ge.s32.totalorder %s27_s18, 16  ;;  %p178_p2 = scmp.lt.s32.totalorder %s435_s17, 17 }
   0x5   : > { %s525_s18 = smov (%p29_p1, %s27_s18), 0  ;;  %p179_p3 = pnand %p380_p0, %p178_p2 }
   0x6   : > { %p211_p4 = scmp.lt.s32.totalorder (!%p179_p3), %s427_s15, 15  ;;  %p223_p5 = scmp.eq.s32.totalorder (!%p179_p3), %s427_s15, 0 }
   0x7   : > { %182 = sbr.rel (%p179_p3) target bundleno = 166 (0xa6), region = 28 }
   0xc   : > { %s527_s15 = smov (!%p211_p4, %s427_s15), 15  ;;  %228 = sbr.rel (!%p223_p5) target bundleno = 17 (0x11), region = 32  ;;  %vm229_vm0 = vcmask (%p223_p5), 516096   ;;  %v437_v0 = vmov (%p223_p5), 0.0  }
   0xd   : > { %s381_s19 = sshll.u32 %s527_s15, 2  ;;  %s382_s20 = sshll.u32 %s527_s15, 1  ;;  %230 = vst.msk [vmem:[%s520_s3] sm:$0x1] (%p223_p5), %vm229_vm0, %v437_v0 }
   0xe   : > { %s214_s23 = scalar_lea.vmem %s518_s1, %s381_s19  ;;  %s221_s26 = scalar_lea.vmem %s519_s2, %s382_s20  ;;  %231 = vst.msk [vmem:[%s521_s4] sm:$0x1] (%p223_p5), %vm229_vm0, %v437_v0 }
  0x11 PF: > { %v233_v1 = vld [vmem:[%s214_s23] sm:$0xf]  ;;  %vm238_vm1 = vcmask 1043456   ;;  %vm234_vm2 = vcmask 64512   ;;  %vm255_vm3 = vcmask 517120   ;;  %vm266_vm4 = vcmask 516096  }
  0x12   : > { %v240_v2 = vsel %vm238_vm1, %v233_v1, 0  ;;  %v232_v3 = vld [vmem:[%s517_s0] sm:$0x1] }
  0x13   : > { %249 = vmatpush.bf16.msra.mxu0 %v240_v2 }
  0x14   : > { %v257_v18 = vld [vmem:[%s520_s3] sm:$0x1] }
  0x15   : > { %v268_v21 = vld [vmem:[%s521_s4] sm:$0x1] }
  0x16   : > { %384 = vmatmul.msk.bf16.vlgmr.msra.gmra.mxu0 %vm234_vm2, %v232_v3 }
  0x93   : > { %v251_v4 = vpop.f32.mrf.mxu0 }
  0x94   : > { %256 = vst.msk [vmem:[%s221_s26] sm:$0x3] %vm255_vm3, %v251_v4  ;;  %v258_v5 = vsel %vm255_vm3, %v251_v4, 0.0  ;;  %v269_v6 = vmul.f32 %v251_v4, %v251_v4 }
  0x95   : > { %v259_v7 = vrot.slane %v258_v5, 4 }
  0x96   : > { %v270_v8 = vsel %vm255_vm3, %v269_v6, 0.0 }
  0x97   : > { %v260_v9 = vadd.f32 %v259_v7, %v258_v5  ;;  %v271_v10 = vrot.slane %v270_v8, 4 }
  0x99   : > { %v261_v11 = vrot.slane %v260_v9, 2  ;;  %v272_v12 = vadd.f32 %v271_v10, %v270_v8 }
  0x9b   : > { %v262_v13 = vadd.f32 %v261_v11, %v260_v9  ;;  %v273_v14 = vrot.slane %v272_v12, 2  ;;  %v253_v15 = vpop.f32.mrf.mxu0 }
  0x9d   : > { %v263_v16 = vrot.slane %v262_v13, 1  ;;  %v274_v17 = vadd.f32 %v273_v14, %v272_v12 }
  0x9f   : > { %v264_v19 = vadd.f32 %v263_v16, %v262_v13  ;;  %v275_v20 = vrot.slane %v274_v17, 1 }
  0xa1   : > { %v265_v22 = vadd.f32 %v264_v19, %v257_v18  ;;  %v276_v23 = vadd.f32 %v275_v20, %v274_v17 }
  0xa3   : > { %267 = vst.msk [vmem:[%s520_s3] sm:$0x1] %vm266_vm4, %v265_v22  ;;  %v277_v24 = vadd.f32 %v276_v23, %v268_v21 }
  0xa5   : > { %278 = vst.msk [vmem:[%s521_s4] sm:$0x1] %vm266_vm4, %v277_v24 }
  0xa6 PF: > { %s15_s17 = sadd.s32 1, %s435_s17   ;;  %s522_s15 = smov %s431_s16 }
  0xa7   : > { %p12_p6 = scmp.ge.s32.totalorder %s15_s17, 18   ;;  %s523_s16 = smov %s525_s18 }
  0xa9   :  { %14 = sbr.rel (!%p12_p6) target bundleno = 2 (0x2), region = 81 }

// kernel: generator_forward.10
= control target key start
LH: loop header
LB: loop body
LE: loop exit
PB: predicated region body
PF: predicated region fallthrough
CT: control target
= control target key end

     0   :  { %s364_s12 = smov 0   ;;  %s366_s13 = smov 0   ;;  %s391_s0 = inlined_call_operand.vmem [shape: f32[16,2,64], index: 0, kind: input, shape index: {}]   ;;  %s392_s1 = inlined_call_operand.vmem [shape: f32[1,64], index: 1, kind: input, shape index: {}]   ;;  %s393_s2 = inlined_call_operand.vmem [shape: f32[1,64], index: 2, kind: input, shape index: {}]   ;;  %s394_s3 = inlined_call_operand.vmem [shape: f32[16,2,64], index: 3, kind: output, shape index: {}]  }
   0x1   :  { %s368_s14 = smov 0  }
   0x2 LB: > { %s25_s15 = sadd.s32 1, %s338_s13  ;;  %p289_p0 = scmp.ge.s32.totalorder %s342_s14, 1  ;;  %s342_s14 = sphi %s368_s14, %s13_s14   ;;  %s338_s13 = sphi %s366_s13, %s396_s13   ;;  %s334_s12 = sphi %s364_s12, %s395_s12  }
   0x3   : > { %p27_p1 = scmp.ge.s32.totalorder %s25_s15, 16  ;;  %p155_p2 = scmp.lt.s32.totalorder %s342_s14, 17 }
   0x5   : > { %s398_s15 = smov (%p27_p1, %s25_s15), 0  ;;  %p156_p3 = pnand %p289_p0, %p155_p2 }
   0x6   : > { %p183_p4 = scmp.lt.s32.totalorder (!%p156_p3), %s334_s12, 15 }
   0x7   : > { %159 = sbr.rel (%p156_p3) target bundleno = 23 (0x17), region = 32 }
   0xc   : > { %s400_s12 = smov (!%p183_p4, %s334_s12), 15  ;;  %v318_v0 = vld [vmem:[%s392_s1] ss:$0 sm:$0xff]  ;;  %vm209_vm0 = vcmask 517120  }
   0xd   : > { %s290_s18 = sshll.u32 %s400_s12, 1  ;;  %v319_v1 = vld [vmem:[%s393_s2] ss:$0 sm:$0xff] }
   0xe   : > { %s189_s21 = scalar_lea.vmem %s391_s0, %s290_s18  ;;  %s196_s26 = scalar_lea.vmem %s394_s3, %s290_s18 }
   0xf   : > { %v197_v2 = vld [vmem:[%s189_s21] sm:$0x3] }
  0x10   : > { %v202_v3 = vmul.f32 %v318_v0, %v197_v2 }
  0x12   : > { %v207_v4 = vadd.f32 %v319_v1, %v202_v3 }
  0x14   : > { %v208_v5 = vmax.f32 %v207_v4, 0.0 }
  0x16   : > { %210 = vst.msk [vmem:[%s196_s26] sm:$0x3] %vm209_vm0, %v208_v5 }
  0x17 PF: > { %s13_s14 = sadd.s32 1, %s342_s14   ;;  %s395_s12 = smov %s338_s13 }
  0x18   : > { %p10_p5 = scmp.ge.s32.totalorder %s13_s14, 18   ;;  %s396_s13 = smov %s398_s15 }
  0x1a   :  { %12 = sbr.rel (!%p10_p5) target bundleno = 2 (0x2), region = 62 }

// kernel: generator_forward.12
= control target key start
LH: loop header
LB: loop body
LE: loop exit
PB: predicated region body
PF: predicated region fallthrough
CT: control target
= control target key end

     0   :  { %s409_s12 = smov 0   ;;  %s411_s13 = smov 0   ;;  %s448_s0 = inlined_call_operand.vmem [shape: f32[4,32,32], index: 0, kind: input, shape index: {}]   ;;  %s449_s1 = inlined_call_operand.vmem [shape: f32[1,32], index: 1, kind: input, shape index: {}]   ;;  %s450_s2 = inlined_call_operand.vmem [shape: f32[1,32], index: 2, kind: input, shape index: {}]   ;;  %s451_s3 = inlined_call_operand.vmem [shape: f32[4,32,32], index: 3, kind: output, shape index: {}]  }
   0x1   :  { %s413_s14 = smov 0  }
   0x2 LB: > { %s25_s15 = sadd.s32 1, %s383_s13  ;;  %p330_p0 = scmp.ge.s32.totalorder %s387_s14, 1  ;;  %s387_s14 = sphi %s413_s14, %s13_s14   ;;  %s383_s13 = sphi %s411_s13, %s453_s13   ;;  %s379_s12 = sphi %s409_s12, %s452_s12  }
   0x3   : > { %p27_p1 = scmp.ge.s32.totalorder %s25_s15, 4  ;;  %p158_p2 = scmp.lt.s32.totalorder %s387_s14, 5 }
   0x5   : > { %s455_s15 = smov (%p27_p1, %s25_s15), 0  ;;  %p159_p3 = pnand %p330_p0, %p158_p2 }
   0x6   : > { %p191_p4 = scmp.lt.s32.totalorder (!%p159_p3), %s379_s12, 3 }
   0x7   : > { %162 = sbr.rel (%p159_p3) target bundleno = 26 (0x1a), region = 32 }
   0xc   : > { %s457_s12 = smov (!%p191_p4, %s379_s12), 3  ;;  %v363_v0 = vld [vmem:[%s449_s1] ss:$0 sm:$0xff]  ;;  %vm234_vm0 = vcmask 261120  }
   0xd   : > { %s337_s18 = sshll.u32 %s457_s12, 5  ;;  %v364_v1 = vld [vmem:[%s450_s2] ss:$0 sm:$0xff] }
   0xe   : > { %s198_s21 = scalar_lea.vmem %s448_s0, %s337_s18  ;;  %s208_s26 = scalar_lea.vmem %s451_s3, %s337_s18 }
   0xf   : > { %v210_v2 = vld [vmem:[%s198_s21] sm:$0xff]  ;;  %v211_v3 = vld [vmem:[%s198_s21 + $0x8] sm:$0xff]  ;;  %v212_v4 = vld [vmem:[%s198_s21 + $0x10] sm:$0xff] }
  0x10   : > { %v218_v5 = vmul.f32 %v363_v0, %v210_v2  ;;  %v219_v6 = vmul.f32 %v363_v0, %v211_v3  ;;  %v220_v7 = vmul.f32 %v363_v0, %v212_v4  ;;  %v213_v8 = vld [vmem:[%s198_s21 + $0x18] sm:$0xff] }
  0x11   : > { %v221_v9 = vmul.f32 %v363_v0, %v213_v8 }
  0x12   : > { %v226_v10 = vadd.f32 %v364_v1, %v218_v5  ;;  %v227_v11 = vadd.f32 %v364_v1, %v219_v6  ;;  %v228_v12 = vadd.f32 %v364_v1, %v220_v7 }
  0x13   : > { %v229_v13 = vadd.f32 %v364_v1, %v221_v9 }
  0x14   : > { %v230_v14 = vmax.f32 %v226_v10, 0.0  ;;  %v231_v15 = vmax.f32 %v227_v11, 0.0  ;;  %v232_v16 = vmax.f32 %v228_v12, 0.0 }
  0x15   : > { %v233_v17 = vmax.f32 %v229_v13, 0.0 }
  0x16   : > { %235 = vst.msk [vmem:[%s208_s26] sm:$0xff] %vm234_vm0, %v230_v14 }
  0x17   : > { %236 = vst.msk [vmem:[%s208_s26 + $0x8] sm:$0xff] %vm234_vm0, %v231_v15 }
  0x18   : > { %237 = vst.msk [vmem:[%s208_s26 + $0x10] sm:$0xff] %vm234_vm0, %v232_v16 }
  0x19   : > { %238 = vst.msk [vmem:[%s208_s26 + $0x18] sm:$0xff] %vm234_vm0, %v233_v17 }
  0x1a PF: > { %s13_s14 = sadd.s32 1, %s387_s14   ;;  %s452_s12 = smov %s383_s13 }
  0x1b   : > { %p10_p5 = scmp.ge.s32.totalorder %s13_s14, 6   ;;  %s453_s13 = smov %s455_s15 }
  0x1d   :  { %12 = sbr.rel (!%p10_p5) target bundleno = 2 (0x2), region = 62 }

// kernel: generator_forward.11
= control target key start
LH: loop header
LB: loop body
LE: loop exit
PB: predicated region body
PF: predicated region fallthrough
CT: control target
= control target key end

     0   :  { %s819_s15 = smov 0   ;;  %s821_s16 = smov 0   ;;  %s919_s0 = inlined_call_operand.vmem [shape: bf16[4,32,256], index: 0, kind: input, shape index: {}]   ;;  %s920_s1 = inlined_call_operand.vmem [shape: bf16[4,256,32], index: 1, kind: input, shape index: {}]   ;;  %s921_s2 = inlined_call_operand.vmem [shape: f32[4,32,32], index: 2, kind: output, shape index: {0}]   ;;  %s922_s3 = inlined_call_operand.vmem [shape: f32[1,32], index: 3, kind: output, shape index: {1}]   ;;  %s923_s4 = inlined_call_operand.vmem [shape: f32[1,32], index: 4, kind: output, shape index: {2}]  }
   0x1   :  { %s823_s17 = smov 0  }
   0x2 LB: > { %s27_s18 = sadd.s32 1, %s787_s16  ;;  %p614_p0 = scmp.ge.s32.totalorder %s791_s17, 1  ;;  %s791_s17 = sphi %s823_s17, %s15_s17   ;;  %s787_s16 = sphi %s821_s16, %s925_s16   ;;  %s783_s15 = sphi %s819_s15, %s924_s15  }
   0x3   : > { %p29_p1 = scmp.ge.s32.totalorder %s27_s18, 4  ;;  %p189_p2 = scmp.lt.s32.totalorder %s791_s17, 5 }
   0x5   : > { %s927_s18 = smov (%p29_p1, %s27_s18), 0  ;;  %p190_p3 = pnand %p614_p0, %p189_p2 }
   0x6   : > { %p230_p4 = scmp.lt.s32.totalorder (!%p190_p3), %s783_s15, 3  ;;  %p255_p5 = scmp.eq.s32.totalorder (!%p190_p3), %s783_s15, 0 }
   0x7   : > { %193 = sbr.rel (%p190_p3) target bundleno = 212 (0xd4), region = 28 }
   0xc   : > { %s929_s15 = smov (!%p230_p4, %s783_s15), 3  ;;  %260 = sbr.rel (!%p255_p5) target bundleno = 17 (0x11), region = 32  ;;  %vm261_vm0 = vcmask (%p255_p5), 253952   ;;  %v793_v0 = vmov (%p255_p5), 0.0  }
   0xd   : > { %s704_s19 = sshll.u32 %s929_s15, 5  ;;  %s705_s20 = sshll.u32 %s929_s15, 7  ;;  %262 = vst.msk [vmem:[%s922_s3] sm:$0x1] (%p255_p5), %vm261_vm0, %v793_v0 }
   0xe   : > { %s840_s23 = scalar_lea.vmem %s919_s0, %s704_s19  ;;  %s845_s26 = scalar_lea.vmem %s920_s1, %s705_s20  ;;  %263 = vst.msk [vmem:[%s923_s4] sm:$0x1] (%p255_p5), %vm261_vm0, %v793_v0 }
   0xf   : > { %s850_s29 = scalar_lea.vmem %s921_s2, %s704_s19 }
  0x11 PF: > { %v719_v1 = vld [vmem:[%s845_s26 + $0x38] sm:$0xff]  ;;  %v718_v3 = vld [vmem:[%s845_s26 + $0x30] sm:$0xff]  ;;  %v717_v5 = vld [vmem:[%s845_s26 + $0x28] sm:$0xff]  ;;  %vm454_vm1 = vcmask 261120   ;;  %vm474_vm2 = vcmask 253952  }
  0x12   : > { %v727_v2 = vld [vmem:[%s845_s26 + $0x78] sm:$0xff]  ;;  %416 = vmatpush.bf16.msra.mxu0 %v719_v1  ;;  %728 = vmatpush.bf16.msra.mxu2 %v719_v1  ;;  %v726_v4 = vld [vmem:[%s845_s26 + $0x70] sm:$0xff]  ;;  %v725_v6 = vld [vmem:[%s845_s26 + $0x68] sm:$0xff] }
  0x13   : > { %435 = vmatpush.bf16.msra.mxu1 %v727_v2  ;;  %736 = vmatpush.bf16.msra.mxu3 %v727_v2  ;;  %v716_v7 = vld [vmem:[%s845_s26 + $0x20] sm:$0xff]  ;;  %v715_v9 = vld [vmem:[%s845_s26 + $0x18] sm:$0xff]  ;;  %v714_v11 = vld [vmem:[%s845_s26 + $0x10] sm:$0xff] }
  0x14   : > { %v724_v8 = vld [vmem:[%s845_s26 + $0x60] sm:$0xff]  ;;  %v723_v10 = vld [vmem:[%s845_s26 + $0x58] sm:$0xff]  ;;  %v722_v12 = vld [vmem:[%s845_s26 + $0x50] sm:$0xff] }
  0x15   : > { %v713_v13 = vld [vmem:[%s845_s26 + $0x8] sm:$0xff]  ;;  %v712_v15 = vld [vmem:[%s845_s26] sm:$0xff]  ;;  %v632_v19 = vld [vmem:[%s840_s23 + $0x10] sm:$0xf] }
  0x16   : > { %417 = vmatpush.bf16.msra.mxu0 %v718_v3  ;;  %729 = vmatpush.bf16.msra.mxu2 %v718_v3  ;;  %v721_v14 = vld [vmem:[%s845_s26 + $0x48] sm:$0xff]  ;;  %v720_v16 = vld [vmem:[%s845_s26 + $0x40] sm:$0xff]  ;;  %v711_v20 = vld [vmem:[%s840_s23 + $0x14] sm:$0xf0] }
  0x17   : > { %436 = vmatpush.bf16.msra.mxu1 %v726_v4  ;;  %737 = vmatpush.bf16.msra.mxu3 %v726_v4  ;;  %v624_v17 = vld [vmem:[%s840_s23] sm:$0xf]  ;;  %v709_v18 = vld [vmem:[%s840_s23 + $0x4] sm:$0xf0]  ;;  %v708_v21 = vld [vmem:[%s840_s23 + $0x4] sm:$0xf]  ;;  %v633_v26 = vor.u32 %v711_v20, %v632_v19 }
  0x18   : > { %v626_v22 = vld [vmem:[%s840_s23 + $0x8] sm:$0xf0]  ;;  %v710_v23 = vld [vmem:[%s840_s23 + $0x14] sm:$0xf]  ;;  %v634_v24 = vld [vmem:[%s840_s23 + $0x18] sm:$0xf0]  ;;  %v625_v25 = vor.u32 %v709_v18, %v624_v17 }
  0x19   : > { %v629_v27 = vor.u32 %v708_v21, %v626_v22  ;;  %v637_v28 = vor.u32 %v710_v23, %v634_v24  ;;  %v459_v4 = vld [vmem:[%s922_s3] sm:$0x1] }
  0x1a   : > { %418 = vmatpush.bf16.msra.mxu0 %v717_v5  ;;  %730 = vmatpush.bf16.msra.mxu2 %v717_v5 }
  0x1b   : > { %437 = vmatpush.bf16.msra.mxu1 %v725_v6  ;;  %738 = vmatpush.bf16.msra.mxu3 %v725_v6 }
  0x1e   : > { %419 = vmatpush.bf16.msra.mxu0 %v716_v7  ;;  %731 = vmatpush.bf16.msra.mxu2 %v716_v7  ;;  %v476_v7 = vld [vmem:[%s923_s4] sm:$0x1] }
  0x1f   : > { %438 = vmatpush.bf16.msra.mxu1 %v724_v8  ;;  %739 = vmatpush.bf16.msra.mxu3 %v724_v8 }
  0x22   : > { %420 = vmatpush.bf16.msra.mxu0 %v715_v9  ;;  %732 = vmatpush.bf16.msra.mxu2 %v715_v9 }
  0x23   : > { %439 = vmatpush.bf16.msra.mxu1 %v723_v10  ;;  %740 = vmatpush.bf16.msra.mxu3 %v723_v10 }
  0x26   : > { %421 = vmatpush.bf16.msra.mxu0 %v714_v11  ;;  %733 = vmatpush.bf16.msra.mxu2 %v714_v11 }
  0x27   : > { %440 = vmatpush.bf16.msra.mxu1 %v722_v12  ;;  %741 = vmatpush.bf16.msra.mxu3 %v722_v12 }
  0x2a   : > { %422 = vmatpush.bf16.msra.mxu0 %v713_v13  ;;  %734 = vmatpush.bf16.msra.mxu2 %v713_v13 }
  0x2b   : > { %441 = vmatpush.bf16.msra.mxu1 %v721_v14  ;;  %742 = vmatpush.bf16.msra.mxu3 %v721_v14 }
  0x2e   : > { %423 = vmatpush.bf16.msra.mxu0 %v712_v15  ;;  %735 = vmatpush.bf16.msra.mxu2 %v712_v15 }
  0x2f   : > { %442 = vmatpush.bf16.msra.mxu1 %v720_v16  ;;  %743 = vmatpush.bf16.msra.mxu3 %v720_v16 }
  0x31   : > { %424 = vmatmul.bf16.vlgmr.msra.gmra.mxu0 %v625_v25  ;;  %429 = vmatmul.bf16.vlgmr.msra.gmra.mxu2 %v633_v26 }
  0x32   : > { %443 = vmatmul.bf16.vlgmr.msra.gmra.mxu1 %v629_v27  ;;  %448 = vmatmul.bf16.vlgmr.msra.gmra.mxu3 %v637_v28 }
  0xae   : > { %v425_v29 = vpop.f32.mrf.mxu0 }
  0xaf   : > { %v444_v30 = vpop.f32.mrf.mxu1 }
  0xb0   : > { %v445_v31 = vadd.f32 %v444_v30, %v425_v29 }
  0xb2   : > { %455 = vst.msk [vmem:[%s850_s29] sm:$0xff] %vm454_vm1, %v445_v31  ;;  %v477_v37 = vmul.f32 %v445_v31, %v445_v31  ;;  %v460_v39 = vsel %vm454_vm1, %v445_v31, 0.0 }
  0xb4   : > { %v430_v32 = vpop.f32.mrf.mxu2  ;;  %v481_v43 = vsel %vm454_vm1, %v477_v37, 0.0 }
  0xb5   : > { %v449_v33 = vpop.f32.mrf.mxu3 }
  0xb6   : > { %v450_v34 = vadd.f32 %v449_v33, %v430_v32  ;;  %v427_v35 = vpop.f32.mrf.mxu0 }
  0xb7   : > { %v446_v36 = vpop.f32.mrf.mxu1 }
  0xb8   : > { %457 = vst.msk [vmem:[%s850_s29 + $0x10] sm:$0xff] %vm454_vm1, %v450_v34  ;;  %v447_v38 = vadd.f32 %v446_v36, %v427_v35  ;;  %v479_v44 = vmul.f32 %v450_v34, %v450_v34  ;;  %v463_v49 = vsel %vm454_vm1, %v450_v34, 0.0 }
  0xba   : > { %456 = vst.msk [vmem:[%s850_s29 + $0x8] sm:$0xff] %vm454_vm1, %v447_v38  ;;  %v461_v40 = vsel %vm454_vm1, %v447_v38, 0.0  ;;  %v478_v41 = vmul.f32 %v447_v38, %v447_v38  ;;  %v484_v52 = vsel %vm454_vm1, %v479_v44, 0.0 }
  0xbb   : > { %v462_v42 = vadd.f32 %v461_v40, %v460_v39 }
  0xbc   : > { %v482_v45 = vsel %vm454_vm1, %v478_v41, 0.0  ;;  %v432_v46 = vpop.f32.mrf.mxu2 }
  0xbd   : > { %v483_v47 = vadd.f32 %v482_v45, %v481_v43  ;;  %v451_v48 = vpop.f32.mrf.mxu3  ;;  %v464_v51 = vadd.f32 %v463_v49, %v462_v42 }
  0xbe   : > { %v452_v50 = vadd.f32 %v451_v48, %v432_v46 }
  0xbf   : > { %v485_v56 = vadd.f32 %v484_v52, %v483_v47 }
  0xc0   : > { %458 = vst.msk [vmem:[%s850_s29 + $0x18] sm:$0xff] %vm454_vm1, %v452_v50  ;;  %v465_v53 = vsel %vm454_vm1, %v452_v50, 0.0  ;;  %v480_v54 = vmul.f32 %v452_v50, %v452_v50 }
  0xc1   : > { %v466_v55 = vadd.f32 %v465_v53, %v464_v51 }
  0xc2   : > { %v486_v57 = vsel %vm454_vm1, %v480_v54, 0.0 }
  0xc3   : > { %v467_v58 = vrot.slane %v466_v55, 4  ;;  %v487_v59 = vadd.f32 %v486_v57, %v485_v56 }
  0xc5   : > { %v468_v60 = vadd.f32 %v467_v58, %v466_v55  ;;  %v488_v61 = vrot.slane %v487_v59, 4 }
  0xc7   : > { %v469_v62 = vrot.slane %v468_v60, 2  ;;  %v489_v63 = vadd.f32 %v488_v61, %v487_v59 }
  0xc9   : > { %v470_v0 = vadd.f32 %v469_v62, %v468_v60  ;;  %v490_v1 = vrot.slane %v489_v63, 2 }
  0xcb   : > { %v471_v2 = vrot.slane %v470_v0, 1  ;;  %v491_v3 = vadd.f32 %v490_v1, %v489_v63 }
  0xcd   : > { %v472_v5 = vadd.f32 %v471_v2, %v470_v0  ;;  %v492_v6 = vrot.slane %v491_v3, 1 }
  0xcf   : > { %v473_v8 = vadd.f32 %v472_v5, %v459_v4  ;;  %v493_v9 = vadd.f32 %v492_v6, %v491_v3 }
  0xd1   : > { %475 = vst.msk [vmem:[%s922_s3] sm:$0x1] %vm474_vm2, %v473_v8  ;;  %v494_v10 = vadd.f32 %v493_v9, %v476_v7 }
  0xd3   : > { %495 = vst.msk [vmem:[%s923_s4] sm:$0x1] %vm474_vm2, %v494_v10 }
  0xd4 PF: > { %s15_s17 = sadd.s32 1, %s791_s17   ;;  %s924_s15 = smov %s787_s16 }
  0xd5   : > { %p12_p6 = scmp.ge.s32.totalorder %s15_s17, 6   ;;  %s925_s16 = smov %s927_s18 }
  0xd7   :  { %14 = sbr.rel (!%p12_p6) target bundleno = 2 (0x2), region = 81 }

// kernel: generator_forward.13
= control target key start
LH: loop header
LB: loop body
LE: loop exit
PB: predicated region body
PF: predicated region fallthrough
CT: control target
= control target key end

     0   :  { %s860_s15 = smov 0   ;;  %s862_s16 = smov 0   ;;  %s1030_s0 = inlined_call_operand.vmem [shape: bf16[4,128,128], index: 0, kind: input, shape index: {}]   ;;  %s1031_s1 = inlined_call_operand.vmem [shape: bf16[4,128,16], index: 1, kind: input, shape index: {}]   ;;  %s1032_s2 = inlined_call_operand.vmem [shape: f32[4,128,16], index: 2, kind: output, shape index: {0}]   ;;  %s1033_s3 = inlined_call_operand.vmem [shape: f32[1,16], index: 3, kind: output, shape index: {1}]   ;;  %s1034_s4 = inlined_call_operand.vmem [shape: f32[1,16], index: 4, kind: output, shape index: {2}]  }
   0x1   :  { %s864_s17 = smov 0  }
   0x2 LB: > { %s27_s18 = sadd.s32 1, %s828_s16  ;;  %p667_p0 = scmp.ge.s32.totalorder %s832_s17, 1  ;;  %s832_s17 = sphi %s864_s17, %s15_s17   ;;  %s828_s16 = sphi %s862_s16, %s1036_s16   ;;  %s824_s15 = sphi %s860_s15, %s1035_s15  }
   0x3   : > { %p29_p1 = scmp.ge.s32.totalorder %s27_s18, 4  ;;  %p188_p2 = scmp.lt.s32.totalorder %s832_s17, 5 }
   0x5   : > { %s1038_s18 = smov (%p29_p1, %s27_s18), 0  ;;  %p189_p3 = pnand %p667_p0, %p188_p2 }
   0x6   : > { %p228_p4 = scmp.lt.s32.totalorder (!%p189_p3), %s824_s15, 3  ;;  %p252_p5 = scmp.eq.s32.totalorder (!%p189_p3), %s824_s15, 0 }
   0x7   : > { %192 = sbr.rel (%p189_p3) target bundleno = 243 (0xf3), region = 28 }
   0xc   : > { %s1040_s15 = smov (!%p228_p4, %s824_s15), 3  ;;  %257 = sbr.rel (!%p252_p5) target bundleno = 17 (0x11), region = 32  ;;  %vm258_vm0 = vcmask (%p252_p5), 122880   ;;  %v834_v0 = vmov (%p252_p5), 0.0  }
   0xd   : > { %s741_s19 = sshll.u32 %s1040_s15, 6  ;;  %s743_s20 = sshll.u32 %s1040_s15, 7  ;;  %259 = vst.msk [vmem:[%s1033_s3] sm:$0x1] (%p252_p5), %vm258_vm0, %v834_v0 }
   0xe   : > { %s881_s23 = scalar_lea.vmem %s1030_s0, %s741_s19  ;;  %s886_s26 = scalar_lea.vmem %s1031_s1, %s741_s19  ;;  %260 = vst.msk [vmem:[%s1034_s4] sm:$0x1] (%p252_p5), %vm258_vm0, %v834_v0 }
   0xf   : > { %s891_s29 = scalar_lea.vmem %s1032_s2, %s743_s20 }
  0x11 PF: > { %v760_v1 = vld [vmem:[%s886_s26 + $0x38] sm:$0xff]  ;;  %v759_v2 = vld [vmem:[%s886_s26 + $0x30] sm:$0xff]  ;;  %v758_v3 = vld [vmem:[%s886_s26 + $0x28] sm:$0xff]  ;;  %vm438_vm1 = vcmask 130048   ;;  %vm494_vm2 = vcmask 122880  }
  0x12   : > { %389 = vmatpush.bf16.msra.mxu0 %v760_v1  ;;  %761 = vmatpush.bf16.msra.mxu1 %v760_v1  ;;  %v757_v4 = vld [vmem:[%s886_s26 + $0x20] sm:$0xff]  ;;  %v756_v5 = vld [vmem:[%s886_s26 + $0x18] sm:$0xff]  ;;  %v755_v6 = vld [vmem:[%s886_s26 + $0x10] sm:$0xff] }
  0x13   : > { %762 = vmatpush.bf16.msra.mxu2 %v760_v1  ;;  %763 = vmatpush.bf16.msra.mxu3 %v760_v1  ;;  %v754_v7 = vld [vmem:[%s886_s26 + $0x8] sm:$0xff]  ;;  %v753_v8 = vld [vmem:[%s886_s26] sm:$0xff]  ;;  %v747_v10 = vld [vmem:[%s881_s23 + $0x10] sm:$0xff] }
  0x14   : > { %v745_v9 = vld [vmem:[%s881_s23] sm:$0xff]  ;;  %v751_v12 = vld [vmem:[%s881_s23 + $0x30] sm:$0xff]  ;;  %v746_v13 = vld [vmem:[%s881_s23 + $0x8] sm:$0xff] }
  0x15   : > { %v749_v11 = vld [vmem:[%s881_s23 + $0x20] sm:$0xff]  ;;  %v748_v14 = vld [vmem:[%s881_s23 + $0x18] sm:$0xff]  ;;  %v750_v15 = vld [vmem:[%s881_s23 + $0x28] sm:$0xff] }
  0x16   : > { %390 = vmatpush.bf16.msra.mxu0 %v759_v2  ;;  %764 = vmatpush.bf16.msra.mxu1 %v759_v2  ;;  %v752_v16 = vld [vmem:[%s881_s23 + $0x38] sm:$0xff] }
  0x17   : > { %765 = vmatpush.bf16.msra.mxu2 %v759_v2  ;;  %766 = vmatpush.bf16.msra.mxu3 %v759_v2 }
  0x1a   : > { %391 = vmatpush.bf16.msra.mxu0 %v758_v3  ;;  %767 = vmatpush.bf16.msra.mxu1 %v758_v3 }
  0x1b   : > { %768 = vmatpush.bf16.msra.mxu2 %v758_v3  ;;  %769 = vmatpush.bf16.msra.mxu3 %v758_v3 }
  0x1e   : > { %392 = vmatpush.bf16.msra.mxu0 %v757_v4  ;;  %770 = vmatpush.bf16.msra.mxu1 %v757_v4 }
  0x1f   : > { %771 = vmatpush.bf16.msra.mxu2 %v757_v4  ;;  %772 = vmatpush.bf16.msra.mxu3 %v757_v4 }
  0x22   : > { %393 = vmatpush.bf16.msra.mxu0 %v756_v5  ;;  %773 = vmatpush.bf16.msra.mxu1 %v756_v5 }
  0x23   : > { %774 = vmatpush.bf16.msra.mxu2 %v756_v5  ;;  %775 = vmatpush.bf16.msra.mxu3 %v756_v5 }
  0x26   : > { %394 = vmatpush.bf16.msra.mxu0 %v755_v6  ;;  %776 = vmatpush.bf16.msra.mxu1 %v755_v6 }
  0x27   : > { %777 = vmatpush.bf16.msra.mxu2 %v755_v6  ;;  %778 = vmatpush.bf16.msra.mxu3 %v755_v6 }
  0x2a   : > { %395 = vmatpush.bf16.msra.mxu0 %v754_v7  ;;  %779 = vmatpush.bf16.msra.mxu1 %v754_v7 }
  0x2b   : > { %780 = vmatpush.bf16.msra.mxu2 %v754_v7  ;;  %781 = vmatpush.bf16.msra.mxu3 %v754_v7 }
  0x2e   : > { %396 = vmatpush.bf16.msra.mxu0 %v753_v8  ;;  %782 = vmatpush.bf16.msra.mxu1 %v753_v8 }
  0x2f   : > { %783 = vmatpush.bf16.msra.mxu2 %v753_v8  ;;  %784 = vmatpush.bf16.msra.mxu3 %v753_v8 }
  0x31   : > { %397 = vmatmul.bf16.vlgmr.msra.gmra.mxu0 %v745_v9  ;;  %407 = vmatmul.bf16.vlgmr.msra.gmra.mxu1 %v747_v10 }
  0x32   : > { %417 = vmatmul.bf16.vlgmr.msra.gmra.mxu2 %v749_v11  ;;  %427 = vmatmul.bf16.vlgmr.msra.gmra.mxu3 %v751_v12 }
  0x41   : > { %402 = vmatmul.bf16.gmra.mxu0 %v746_v13  ;;  %412 = vmatmul.bf16.gmra.mxu1 %v748_v14 }
  0x42   : > { %422 = vmatmul.bf16.gmra.mxu2 %v750_v15  ;;  %432 = vmatmul.bf16.gmra.mxu3 %v752_v16 }
  0xae   : > { %v398_v17 = vpop.f32.mrf.mxu0  ;;  %v408_v18 = vpop.f32.mrf.mxu1 }
  0xaf   : > { %439 = vst.msk [vmem:[%s891_s29] sm:$0xff] %vm438_vm1, %v398_v17  ;;  %v497_v28 = vmul.f32 %v398_v17, %v398_v17  ;;  %v456_v31 = vsel %vm438_vm1, %v398_v17, 0.0  ;;  %v501_v43 = vmul.f32 %v408_v18, %v408_v18  ;;  %v463_v48 = vsel %vm438_vm1, %v408_v18, 0.0 }
  0xb0   : > { %443 = vst.msk [vmem:[%s891_s29 + $0x20] sm:$0xff] %vm438_vm1, %v408_v18 }
  0xb1   : > { %v513_v35 = vsel %vm438_vm1, %v497_v28, 0.0  ;;  %v520_v53 = vsel %vm438_vm1, %v501_v43, 0.0 }
  0xb5   : > { %v919_v19 = vpop.f32.mrf.mxu2  ;;  %v921_v20 = vpop.f32.mrf.mxu3 }
  0xb6   : > { %v400_v21 = vpop.f32.mrf.mxu0  ;;  %v410_v22 = vpop.f32.mrf.mxu1  ;;  %447 = vst.msk [vmem:[%s891_s29 + $0x40] sm:$0xff] %vm438_vm1, %v919_v19  ;;  %v505_v1 = vmul.f32 %v919_v19, %v919_v19  ;;  %v471_v6 = vsel %vm438_vm1, %v919_v19, 0.0 }
  0xb7   : > { %440 = vst.msk [vmem:[%s891_s29 + $0x8] sm:$0xff] %vm438_vm1, %v400_v21  ;;  %v498_v27 = vmul.f32 %v400_v21, %v400_v21  ;;  %v457_v29 = vsel %vm438_vm1, %v400_v21, 0.0  ;;  %v502_v49 = vmul.f32 %v410_v22, %v410_v22  ;;  %v465_v54 = vsel %vm438_vm1, %v410_v22, 0.0 }
  0xb8   : > { %444 = vst.msk [vmem:[%s891_s29 + $0x28] sm:$0xff] %vm438_vm1, %v410_v22  ;;  %v458_v34 = vadd.f32 %v457_v29, %v456_v31  ;;  %v528_v11 = vsel %vm438_vm1, %v505_v1, 0.0  ;;  %v509_v22 = vmul.f32 %v921_v20, %v921_v20 }
  0xb9   : > { %451 = vst.msk [vmem:[%s891_s29 + $0x60] sm:$0xff] %vm438_vm1, %v921_v20  ;;  %v514_v32 = vsel %vm438_vm1, %v498_v27, 0.0  ;;  %v522_v58 = vsel %vm438_vm1, %v502_v49, 0.0 }
  0xba   : > { %v515_v39 = vadd.f32 %v514_v32, %v513_v35 }
  0xbd   : > { %v933_v23 = vpop.f32.mrf.mxu2  ;;  %v935_v24 = vpop.f32.mrf.mxu3 }
  0xbe   : > { %v403_v25 = vpop.f32.mrf.mxu0  ;;  %v413_v26 = vpop.f32.mrf.mxu1  ;;  %448 = vst.msk [vmem:[%s891_s29 + $0x48] sm:$0xff] %vm438_vm1, %v933_v23  ;;  %v506_v7 = vmul.f32 %v933_v23, %v933_v23  ;;  %v473_v12 = vsel %vm438_vm1, %v933_v23, 0.0  ;;  %v479_v23 = vsel %vm438_vm1, %v921_v20, 0.0  ;;  %v510_v29 = vmul.f32 %v935_v24, %v935_v24 }
  0xbf   : > { %441 = vst.msk [vmem:[%s891_s29 + $0x10] sm:$0xff] %vm438_vm1, %v403_v25  ;;  %v499_v30 = vmul.f32 %v403_v25, %v403_v25  ;;  %v459_v33 = vsel %vm438_vm1, %v403_v25, 0.0  ;;  %v503_v55 = vmul.f32 %v413_v26, %v413_v26  ;;  %v467_v59 = vsel %vm438_vm1, %v413_v26, 0.0 }
  0xc0   : > { %445 = vst.msk [vmem:[%s891_s29 + $0x30] sm:$0xff] %vm438_vm1, %v413_v26  ;;  %v460_v40 = vadd.f32 %v459_v33, %v458_v34  ;;  %v530_v16 = vsel %vm438_vm1, %v506_v7, 0.0  ;;  %v536_v33 = vsel %vm438_vm1, %v509_v22, 0.0  ;;  %v481_v34 = vsel %vm438_vm1, %v935_v24, 0.0 }
  0xc1   : > { %452 = vst.msk [vmem:[%s891_s29 + $0x68] sm:$0xff] %vm438_vm1, %v935_v24  ;;  %v516_v36 = vsel %vm438_vm1, %v499_v30, 0.0  ;;  %v524_v2 = vsel %vm438_vm1, %v503_v55, 0.0 }
  0xc2   : > { %v517_v46 = vadd.f32 %v516_v36, %v515_v39  ;;  %v538_v39 = vsel %vm438_vm1, %v510_v29, 0.0 }
  0xc5   : > { %v423_v37 = vpop.f32.mrf.mxu2  ;;  %v953_v38 = vpop.f32.mrf.mxu3 }
  0xc6   : > { %v405_v41 = vpop.f32.mrf.mxu0  ;;  %v415_v42 = vpop.f32.mrf.mxu1  ;;  %449 = vst.msk [vmem:[%s891_s29 + $0x50] sm:$0xff] %vm438_vm1, %v423_v37  ;;  %v507_v13 = vmul.f32 %v423_v37, %v423_v37  ;;  %v475_v17 = vsel %vm438_vm1, %v423_v37, 0.0  ;;  %v511_v35 = vmul.f32 %v953_v38, %v953_v38  ;;  %v483_v20 = vsel %vm438_vm1, %v953_v38, 0.0 }
  0xc7   : > { %442 = vst.msk [vmem:[%s891_s29 + $0x18] sm:$0xff] %vm438_vm1, %v405_v41  ;;  %v461_v44 = vsel %vm438_vm1, %v405_v41, 0.0  ;;  %v500_v45 = vmul.f32 %v405_v41, %v405_v41  ;;  %v504_v60 = vmul.f32 %v415_v42, %v415_v42  ;;  %v469_v3 = vsel %vm438_vm1, %v415_v42, 0.0 }
  0xc8   : > { %v462_v47 = vadd.f32 %v461_v44, %v460_v40  ;;  %446 = vst.msk [vmem:[%s891_s29 + $0x38] sm:$0xff] %vm438_vm1, %v415_v42  ;;  %v532_v25 = vsel %vm438_vm1, %v507_v13, 0.0  ;;  %v540_v43 = vsel %vm438_vm1, %v511_v35, 0.0 }
  0xc9   : > { %v518_v50 = vsel %vm438_vm1, %v500_v45, 0.0  ;;  %453 = vst.msk [vmem:[%s891_s29 + $0x70] sm:$0xff] %vm438_vm1, %v953_v38  ;;  %v526_v8 = vsel %vm438_vm1, %v504_v60, 0.0 }
  0xca   : > { %v464_v51 = vadd.f32 %v463_v48, %v462_v47  ;;  %v519_v52 = vadd.f32 %v518_v50, %v517_v46 }
  0xcc   : > { %v521_v56 = vadd.f32 %v520_v53, %v519_v52  ;;  %v466_v57 = vadd.f32 %v465_v54, %v464_v51 }
  0xcd   : > { %v425_v61 = vpop.f32.mrf.mxu2  ;;  %v435_v62 = vpop.f32.mrf.mxu3 }
  0xce   : > { %v468_v63 = vadd.f32 %v467_v59, %v466_v57  ;;  %v523_v0 = vadd.f32 %v522_v58, %v521_v56  ;;  %450 = vst.msk [vmem:[%s891_s29 + $0x58] sm:$0xff] %vm438_vm1, %v425_v61  ;;  %v508_v18 = vmul.f32 %v425_v61, %v425_v61  ;;  %v477_v26 = vsel %vm438_vm1, %v425_v61, 0.0  ;;  %v455_v56 = vld [vmem:[%s1033_s3] sm:$0x1] }
  0xcf   : > { %454 = vst.msk [vmem:[%s891_s29 + $0x78] sm:$0xff] %vm438_vm1, %v435_v62  ;;  %v512_v40 = vmul.f32 %v435_v62, %v435_v62  ;;  %v485_v44 = vsel %vm438_vm1, %v435_v62, 0.0  ;;  %v496_v59 = vld [vmem:[%s1034_s4] sm:$0x1] }
  0xd0   : > { %v470_v4 = vadd.f32 %v469_v3, %v468_v63  ;;  %v525_v5 = vadd.f32 %v524_v2, %v523_v0  ;;  %v534_v30 = vsel %vm438_vm1, %v508_v18, 0.0 }
  0xd1   : > { %v542_v24 = vsel %vm438_vm1, %v512_v40, 0.0 }
  0xd2   : > { %v472_v9 = vadd.f32 %v471_v6, %v470_v4  ;;  %v527_v10 = vadd.f32 %v526_v8, %v525_v5 }
  0xd4   : > { %v529_v14 = vadd.f32 %v528_v11, %v527_v10  ;;  %v474_v15 = vadd.f32 %v473_v12, %v472_v9 }
  0xd6   : > { %v476_v19 = vadd.f32 %v475_v17, %v474_v15  ;;  %v531_v21 = vadd.f32 %v530_v16, %v529_v14 }
  0xd8   : > { %v533_v27 = vadd.f32 %v532_v25, %v531_v21  ;;  %v478_v28 = vadd.f32 %v477_v26, %v476_v19 }
  0xda   : > { %v480_v31 = vadd.f32 %v479_v23, %v478_v28  ;;  %v535_v32 = vadd.f32 %v534_v30, %v533_v27 }
  0xdc   : > { %v537_v36 = vadd.f32 %v536_v33, %v535_v32  ;;  %v482_v37 = vadd.f32 %v481_v34, %v480_v31 }
  0xde   : > { %v484_v41 = vadd.f32 %v483_v20, %v482_v37  ;;  %v539_v42 = vadd.f32 %v538_v39, %v537_v36 }
  0xe0   : > { %v541_v45 = vadd.f32 %v540_v43, %v539_v42  ;;  %v486_v46 = vadd.f32 %v485_v44, %v484_v41 }
  0xe2   : > { %v487_v47 = vrot.slane %v486_v46, 4  ;;  %v543_v48 = vadd.f32 %v542_v24, %v541_v45 }
  0xe4   : > { %v488_v49 = vadd.f32 %v487_v47, %v486_v46  ;;  %v544_v50 = vrot.slane %v543_v48, 4 }
  0xe6   : > { %v489_v51 = vrot.slane %v488_v49, 2  ;;  %v545_v52 = vadd.f32 %v544_v50, %v543_v48 }
  0xe8   : > { %v490_v53 = vadd.f32 %v489_v51, %v488_v49  ;;  %v546_v54 = vrot.slane %v545_v52, 2 }
  0xea   : > { %v491_v38 = vrot.slane %v490_v53, 1  ;;  %v547_v55 = vadd.f32 %v546_v54, %v545_v52 }
  0xec   : > { %v492_v57 = vadd.f32 %v491_v38, %v490_v53  ;;  %v548_v58 = vrot.slane %v547_v55, 1 }
  0xee   : > { %v493_v60 = vadd.f32 %v492_v57, %v455_v56  ;;  %v549_v61 = vadd.f32 %v548_v58, %v547_v55 }
  0xf0   : > { %495 = vst.msk [vmem:[%s1033_s3] sm:$0x1] %vm494_vm2, %v493_v60  ;;  %v550_v62 = vadd.f32 %v549_v61, %v496_v59 }
  0xf2   : > { %551 = vst.msk [vmem:[%s1034_s4] sm:$0x1] %vm494_vm2, %v550_v62 }
  0xf3 PF: > { %s15_s17 = sadd.s32 1, %s832_s17   ;;  %s1035_s15 = smov %s828_s16 }
  0xf4   : > { %p12_p6 = scmp.ge.s32.totalorder %s15_s17, 6   ;;  %s1036_s16 = smov %s1038_s18 }
  0xf6   :  { %14 = sbr.rel (!%p12_p6) target bundleno = 2 (0x2), region = 81 }

// kernel: generator_forward.14
= control target key start
LH: loop header
LB: loop body
LE: loop exit
PB: predicated region body
PF: predicated region fallthrough
CT: control target
= control target key end

     0   :  { %s469_s12 = smov 0   ;;  %s471_s13 = smov 0   ;;  %s578_s0 = inlined_call_operand.vmem [shape: f32[4,128,16], index: 0, kind: input, shape index: {}]   ;;  %s579_s1 = inlined_call_operand.vmem [shape: f32[1,16], index: 1, kind: input, shape index: {}]   ;;  %s580_s2 = inlined_call_operand.vmem [shape: f32[1,16], index: 2, kind: input, shape index: {}]   ;;  %s581_s3 = inlined_call_operand.vmem [shape: f32[4,128,16], index: 3, kind: output, shape index: {}]  }
   0x1   :  { %s473_s14 = smov 0  }
   0x2 LB: > { %s25_s15 = sadd.s32 1, %s443_s13  ;;  %p390_p0 = scmp.ge.s32.totalorder %s447_s14, 1  ;;  %s447_s14 = sphi %s473_s14, %s13_s14   ;;  %s443_s13 = sphi %s471_s13, %s583_s13   ;;  %s439_s12 = sphi %s469_s12, %s582_s12  }
   0x3   : > { %p27_p1 = scmp.ge.s32.totalorder %s25_s15, 4  ;;  %p158_p2 = scmp.lt.s32.totalorder %s447_s14, 5 }
   0x5   : > { %s585_s15 = smov (%p27_p1, %s25_s15), 0  ;;  %p159_p3 = pnand %p390_p0, %p158_p2 }
   0x6   : > { %p191_p4 = scmp.lt.s32.totalorder (!%p159_p3), %s439_s12, 3 }
   0x7   : > { %162 = sbr.rel (%p159_p3) target bundleno = 38 (0x26), region = 32 }
   0xc   : > { %s587_s12 = smov (!%p191_p4, %s439_s12), 3  ;;  %v423_v0 = vld [vmem:[%s579_s1] ss:$0 sm:$0xff]  ;;  %vm282_vm0 = vcmask 130048  }
   0xd   : > { %s397_s18 = sshll.u32 %s587_s12, 7  ;;  %v498_v1 = vld [vmem:[%s580_s2] ss:$0 sm:$0xff] }
   0xe   : > { %s493_s21 = scalar_lea.vmem %s578_s0, %s397_s18  ;;  %s514_s26 = scalar_lea.vmem %s581_s3, %s397_s18 }
   0xf   : > { %v210_v2 = vld [vmem:[%s493_s21] sm:$0xff]  ;;  %v211_v3 = vld [vmem:[%s493_s21 + $0x8] sm:$0xff]  ;;  %v212_v4 = vld [vmem:[%s493_s21 + $0x10] sm:$0xff] }
  0x10   : > { %v230_v5 = vmul.f32 %v423_v0, %v210_v2  ;;  %v231_v6 = vmul.f32 %v423_v0, %v211_v3  ;;  %v232_v7 = vmul.f32 %v423_v0, %v212_v4  ;;  %v213_v8 = vld [vmem:[%s493_s21 + $0x18] sm:$0xff]  ;;  %v214_v9 = vld [vmem:[%s493_s21 + $0x20] sm:$0xff]  ;;  %v215_v10 = vld [vmem:[%s493_s21 + $0x28] sm:$0xff] }
  0x11   : > { %v233_v11 = vmul.f32 %v423_v0, %v213_v8  ;;  %v234_v12 = vmul.f32 %v423_v0, %v214_v9  ;;  %v235_v13 = vmul.f32 %v423_v0, %v215_v10  ;;  %v216_v14 = vld [vmem:[%s493_s21 + $0x30] sm:$0xff]  ;;  %v217_v15 = vld [vmem:[%s493_s21 + $0x38] sm:$0xff]  ;;  %v218_v24 = vld [vmem:[%s493_s21 + $0x40] sm:$0xff] }
  0x12   : > { %v250_v16 = vadd.f32 %v498_v1, %v230_v5  ;;  %v251_v17 = vadd.f32 %v498_v1, %v231_v6  ;;  %v252_v18 = vadd.f32 %v498_v1, %v232_v7  ;;  %v236_v19 = vmul.f32 %v423_v0, %v216_v14  ;;  %v219_v25 = vld [vmem:[%s493_s21 + $0x48] sm:$0xff]  ;;  %v220_v26 = vld [vmem:[%s493_s21 + $0x50] sm:$0xff]  ;;  %v221_v31 = vld [vmem:[%s493_s21 + $0x58] sm:$0xff] }
  0x13   : > { %v253_v20 = vadd.f32 %v498_v1, %v233_v11  ;;  %v254_v21 = vadd.f32 %v498_v1, %v234_v12  ;;  %v255_v22 = vadd.f32 %v498_v1, %v235_v13  ;;  %v237_v23 = vmul.f32 %v423_v0, %v217_v15  ;;  %v222_v32 = vld [vmem:[%s493_s21 + $0x60] sm:$0xff]  ;;  %v223_v33 = vld [vmem:[%s493_s21 + $0x68] sm:$0xff]  ;;  %v224_v37 = vld [vmem:[%s493_s21 + $0x70] sm:$0xff] }
  0x14   : > { %v266_v27 = vmax.f32 %v250_v16, 0.0  ;;  %v267_v28 = vmax.f32 %v251_v17, 0.0  ;;  %v268_v29 = vmax.f32 %v252_v18, 0.0  ;;  %v256_v30 = vadd.f32 %v498_v1, %v236_v19  ;;  %v225_v42 = vld [vmem:[%s493_s21 + $0x78] sm:$0xff] }
  0x15   : > { %v269_v34 = vmax.f32 %v253_v20, 0.0  ;;  %v270_v35 = vmax.f32 %v254_v21, 0.0  ;;  %v257_v36 = vadd.f32 %v498_v1, %v237_v23  ;;  %v271_v38 = vmax.f32 %v255_v22, 0.0 }
  0x16   : > { %283 = vst.msk [vmem:[%s514_s26] sm:$0xff] %vm282_vm0, %v266_v27  ;;  %v238_v39 = vmul.f32 %v423_v0, %v218_v24  ;;  %v239_v40 = vmul.f32 %v423_v0, %v219_v25  ;;  %v240_v41 = vmul.f32 %v423_v0, %v220_v26  ;;  %v272_v43 = vmax.f32 %v256_v30, 0.0 }
  0x17   : > { %284 = vst.msk [vmem:[%s514_s26 + $0x8] sm:$0xff] %vm282_vm0, %v267_v28  ;;  %v241_v44 = vmul.f32 %v423_v0, %v221_v31  ;;  %v242_v45 = vmul.f32 %v423_v0, %v222_v32  ;;  %v243_v46 = vmul.f32 %v423_v0, %v223_v33  ;;  %v244_v50 = vmul.f32 %v423_v0, %v224_v37 }
  0x18   : > { %285 = vst.msk [vmem:[%s514_s26 + $0x10] sm:$0xff] %vm282_vm0, %v268_v29  ;;  %v258_v47 = vadd.f32 %v498_v1, %v238_v39  ;;  %v259_v48 = vadd.f32 %v498_v1, %v239_v40  ;;  %v260_v49 = vadd.f32 %v498_v1, %v240_v41  ;;  %v273_v51 = vmax.f32 %v257_v36, 0.0 }
  0x19   : > { %286 = vst.msk [vmem:[%s514_s26 + $0x18] sm:$0xff] %vm282_vm0, %v269_v34  ;;  %v261_v52 = vadd.f32 %v498_v1, %v241_v44  ;;  %v245_v53 = vmul.f32 %v423_v0, %v225_v42  ;;  %v262_v55 = vadd.f32 %v498_v1, %v242_v45  ;;  %v263_v57 = vadd.f32 %v498_v1, %v243_v46 }
  0x1a   : > { %287 = vst.msk [vmem:[%s514_s26 + $0x20] sm:$0xff] %vm282_vm0, %v270_v35  ;;  %v274_v54 = vmax.f32 %v258_v47, 0.0  ;;  %v275_v56 = vmax.f32 %v259_v48, 0.0  ;;  %v276_v58 = vmax.f32 %v260_v49, 0.0  ;;  %v264_v59 = vadd.f32 %v498_v1, %v244_v50 }
  0x1b   : > { %288 = vst.msk [vmem:[%s514_s26 + $0x28] sm:$0xff] %vm282_vm0, %v271_v38  ;;  %v277_v60 = vmax.f32 %v261_v52, 0.0  ;;  %v265_v61 = vadd.f32 %v498_v1, %v245_v53  ;;  %v278_v62 = vmax.f32 %v262_v55, 0.0  ;;  %v279_v63 = vmax.f32 %v263_v57, 0.0 }
  0x1c   : > { %289 = vst.msk [vmem:[%s514_s26 + $0x30] sm:$0xff] %vm282_vm0, %v272_v43  ;;  %v280_v0 = vmax.f32 %v264_v59, 0.0 }
  0x1d   : > { %290 = vst.msk [vmem:[%s514_s26 + $0x38] sm:$0xff] %vm282_vm0, %v273_v51  ;;  %v281_v2 = vmax.f32 %v265_v61, 0.0 }
  0x1e   : > { %291 = vst.msk [vmem:[%s514_s26 + $0x40] sm:$0xff] %vm282_vm0, %v274_v54 }
  0x1f   : > { %292 = vst.msk [vmem:[%s514_s26 + $0x48] sm:$0xff] %vm282_vm0, %v275_v56 }
  0x20   : > { %293 = vst.msk [vmem:[%s514_s26 + $0x50] sm:$0xff] %vm282_vm0, %v276_v58 }
  0x21   : > { %294 = vst.msk [vmem:[%s514_s26 + $0x58] sm:$0xff] %vm282_vm0, %v277_v60 }
  0x22   : > { %295 = vst.msk [vmem:[%s514_s26 + $0x60] sm:$0xff] %vm282_vm0, %v278_v62 }
  0x23   : > { %296 = vst.msk [vmem:[%s514_s26 + $0x68] sm:$0xff] %vm282_vm0, %v279_v63 }
  0x24   : > { %297 = vst.msk [vmem:[%s514_s26 + $0x70] sm:$0xff] %vm282_vm0, %v280_v0 }
  0x25   : > { %298 = vst.msk [vmem:[%s514_s26 + $0x78] sm:$0xff] %vm282_vm0, %v281_v2 }
  0x26 PF: > { %s13_s14 = sadd.s32 1, %s447_s14   ;;  %s582_s12 = smov %s443_s13 }
  0x27   : > { %p10_p5 = scmp.ge.s32.totalorder %s13_s14, 6   ;;  %s583_s13 = smov %s585_s15 }
  0x29   :  { %12 = sbr.rel (!%p10_p5) target bundleno = 2 (0x2), region = 62 }

// kernel: generator_forward.16
= control target key start
LH: loop header
LB: loop body
LE: loop exit
PB: predicated region body
PF: predicated region fallthrough
CT: control target
= control target key end

     0   :  { %s709_s12 = smov 0   ;;  %s711_s13 = smov 0   ;;  %s1079_s0 = inlined_call_operand.vmem [shape: f32[4,512,8], index: 0, kind: input, shape index: {}]   ;;  %s1080_s1 = inlined_call_operand.vmem [shape: f32[1,8], index: 1, kind: input, shape index: {}]   ;;  %s1081_s2 = inlined_call_operand.vmem [shape: f32[1,8], index: 2, kind: input, shape index: {}]   ;;  %s1082_s3 = inlined_call_operand.vmem [shape: f32[4,512,8], index: 3, kind: output, shape index: {}]  }
   0x1   :  { %s713_s14 = smov 0  }
   0x2 LB: > { %s25_s15 = sadd.s32 1, %s683_s13  ;;  %p630_p0 = scmp.ge.s32.totalorder %s687_s14, 1  ;;  %s687_s14 = sphi %s713_s14, %s13_s14   ;;  %s683_s13 = sphi %s711_s13, %s1084_s13   ;;  %s679_s12 = sphi %s709_s12, %s1083_s12  }
   0x3   : > { %p27_p1 = scmp.ge.s32.totalorder %s25_s15, 4  ;;  %p158_p2 = scmp.lt.s32.totalorder %s687_s14, 5 }
   0x5   : > { %s1086_s15 = smov (%p27_p1, %s25_s15), 0  ;;  %p159_p3 = pnand %p630_p0, %p158_p2 }
   0x6   : > { %p191_p4 = scmp.lt.s32.totalorder (!%p159_p3), %s679_s12, 3 }
   0x7   : > { %162 = sbr.rel (%p159_p3) target bundleno = 86 (0x56), region = 32 }
   0xc   : > { %s1088_s12 = smov (!%p191_p4, %s679_s12), 3  ;;  %v730_v0 = vld [vmem:[%s1080_s1] ss:$0 sm:$0xff]  ;;  %vm474_vm0 = vcmask 64512  }
   0xd   : > { %s637_s18 = sshll.u32 %s1088_s12, 9  ;;  %v740_v1 = vld [vmem:[%s1081_s2] ss:$0 sm:$0xff] }
   0xe   : > { %s735_s21 = scalar_lea.vmem %s1079_s0, %s637_s18  ;;  %s763_s26 = scalar_lea.vmem %s1082_s3, %s637_s18 }
   0xf   : > { %v210_v2 = vld [vmem:[%s735_s21] sm:$0xff]  ;;  %v211_v3 = vld [vmem:[%s735_s21 + $0x8] sm:$0xff]  ;;  %v212_v4 = vld [vmem:[%s735_s21 + $0x10] sm:$0xff] }
  0x10   : > { %v278_v5 = vmul.f32 %v730_v0, %v210_v2  ;;  %v279_v6 = vmul.f32 %v730_v0, %v211_v3  ;;  %v280_v7 = vmul.f32 %v730_v0, %v212_v4  ;;  %v213_v8 = vld [vmem:[%s735_s21 + $0x18] sm:$0xff]  ;;  %v214_v9 = vld [vmem:[%s735_s21 + $0x20] sm:$0xff]  ;;  %v215_v10 = vld [vmem:[%s735_s21 + $0x28] sm:$0xff] }
  0x11   : > { %v281_v11 = vmul.f32 %v730_v0, %v213_v8  ;;  %v282_v12 = vmul.f32 %v730_v0, %v214_v9  ;;  %v283_v13 = vmul.f32 %v730_v0, %v215_v10  ;;  %v216_v14 = vld [vmem:[%s735_s21 + $0x30] sm:$0xff]  ;;  %v217_v15 = vld [vmem:[%s735_s21 + $0x38] sm:$0xff]  ;;  %v218_v24 = vld [vmem:[%s735_s21 + $0x40] sm:$0xff] }
  0x12   : > { %v346_v16 = vadd.f32 %v740_v1, %v278_v5  ;;  %v347_v17 = vadd.f32 %v740_v1, %v279_v6  ;;  %v348_v18 = vadd.f32 %v740_v1, %v280_v7  ;;  %v284_v19 = vmul.f32 %v730_v0, %v216_v14  ;;  %v219_v25 = vld [vmem:[%s735_s21 + $0x48] sm:$0xff]  ;;  %v220_v26 = vld [vmem:[%s735_s21 + $0x50] sm:$0xff]  ;;  %v221_v31 = vld [vmem:[%s735_s21 + $0x58] sm:$0xff] }
  0x13   : > { %v349_v20 = vadd.f32 %v740_v1, %v281_v11  ;;  %v350_v21 = vadd.f32 %v740_v1, %v282_v12  ;;  %v351_v22 = vadd.f32 %v740_v1, %v283_v13  ;;  %v285_v23 = vmul.f32 %v730_v0, %v217_v15  ;;  %v222_v32 = vld [vmem:[%s735_s21 + $0x60] sm:$0xff]  ;;  %v223_v33 = vld [vmem:[%s735_s21 + $0x68] sm:$0xff]  ;;  %v224_v37 = vld [vmem:[%s735_s21 + $0x70] sm:$0xff] }
  0x14   : > { %v410_v27 = vmax.f32 %v346_v16, 0.0  ;;  %v411_v28 = vmax.f32 %v347_v17, 0.0  ;;  %v412_v29 = vmax.f32 %v348_v18, 0.0  ;;  %v352_v30 = vadd.f32 %v740_v1, %v284_v19  ;;  %v225_v42 = vld [vmem:[%s735_s21 + $0x78] sm:$0xff]  ;;  %v226_v54 = vld [vmem:[%s735_s21 + $0x80] sm:$0xff]  ;;  %v227_v55 = vld [vmem:[%s735_s21 + $0x88] sm:$0xff] }
  0x15   : > { %v413_v34 = vmax.f32 %v349_v20, 0.0  ;;  %v414_v35 = vmax.f32 %v350_v21, 0.0  ;;  %v353_v36 = vadd.f32 %v740_v1, %v285_v23  ;;  %v415_v38 = vmax.f32 %v351_v22, 0.0  ;;  %v228_v56 = vld [vmem:[%s735_s21 + $0x90] sm:$0xff]  ;;  %v229_v59 = vld [vmem:[%s735_s21 + $0x98] sm:$0xff]  ;;  %v230_v63 = vld [vmem:[%s735_s21 + $0xa0] sm:$0xff] }
  0x16   : > { %475 = vst.msk [vmem:[%s763_s26] sm:$0xff] %vm474_vm0, %v410_v27  ;;  %v286_v39 = vmul.f32 %v730_v0, %v218_v24  ;;  %v287_v40 = vmul.f32 %v730_v0, %v219_v25  ;;  %v288_v41 = vmul.f32 %v730_v0, %v220_v26  ;;  %v416_v43 = vmax.f32 %v352_v30, 0.0  ;;  %v231_v6 = vld [vmem:[%s735_s21 + $0xa8] sm:$0xff]  ;;  %v232_v10 = vld [vmem:[%s735_s21 + $0xb0] sm:$0xff]  ;;  %v233_v14 = vld [vmem:[%s735_s21 + $0xb8] sm:$0xff] }
  0x17   : > { %476 = vst.msk [vmem:[%s763_s26 + $0x8] sm:$0xff] %vm474_vm0, %v411_v28  ;;  %v289_v44 = vmul.f32 %v730_v0, %v221_v31  ;;  %v290_v45 = vmul.f32 %v730_v0, %v222_v32  ;;  %v291_v46 = vmul.f32 %v730_v0, %v223_v33  ;;  %v292_v50 = vmul.f32 %v730_v0, %v224_v37  ;;  %v234_v18 = vld [vmem:[%s735_s21 + $0xc0] sm:$0xff]  ;;  %v235_v22 = vld [vmem:[%s735_s21 + $0xc8] sm:$0xff]  ;;  %v236_v26 = vld [vmem:[%s735_s21 + $0xd0] sm:$0xff] }
  0x18   : > { %477 = vst.msk [vmem:[%s763_s26 + $0x10] sm:$0xff] %vm474_vm0, %v412_v29  ;;  %v354_v47 = vadd.f32 %v740_v1, %v286_v39  ;;  %v355_v48 = vadd.f32 %v740_v1, %v287_v40  ;;  %v356_v49 = vadd.f32 %v740_v1, %v288_v41  ;;  %v417_v51 = vmax.f32 %v353_v36, 0.0  ;;  %v237_v30 = vld [vmem:[%s735_s21 + $0xd8] sm:$0xff] }
  0x19   : > { %478 = vst.msk [vmem:[%s763_s26 + $0x18] sm:$0xff] %vm474_vm0, %v413_v34  ;;  %v357_v52 = vadd.f32 %v740_v1, %v289_v44  ;;  %v293_v53 = vmul.f32 %v730_v0, %v225_v42  ;;  %v358_v58 = vadd.f32 %v740_v1, %v290_v45  ;;  %v359_v62 = vadd.f32 %v740_v1, %v291_v46  ;;  %v238_v34 = vld [vmem:[%s735_s21 + $0xe0] sm:$0xff]  ;;  %v240_v42 = vld [vmem:[%s735_s21 + $0xf0] sm:$0xff]  ;;  %v241_v46 = vld [vmem:[%s735_s21 + $0xf8] sm:$0xff] }
  0x1a   : > { %479 = vst.msk [vmem:[%s763_s26 + $0x20] sm:$0xff] %vm474_vm0, %v414_v35  ;;  %v418_v57 = vmax.f32 %v354_v47, 0.0  ;;  %v419_v60 = vmax.f32 %v355_v48, 0.0  ;;  %v420_v61 = vmax.f32 %v356_v49, 0.0  ;;  %v360_v2 = vadd.f32 %v740_v1, %v292_v50  ;;  %v242_v50 = vld [vmem:[%s735_s21 + $0x100] sm:$0xff] }
  0x1b   : > { %480 = vst.msk [vmem:[%s763_s26 + $0x28] sm:$0xff] %vm474_vm0, %v415_v38  ;;  %v294_v3 = vmul.f32 %v730_v0, %v226_v54  ;;  %v295_v4 = vmul.f32 %v730_v0, %v227_v55  ;;  %v296_v5 = vmul.f32 %v730_v0, %v228_v56  ;;  %v421_v7 = vmax.f32 %v357_v52, 0.0  ;;  %v239_v38 = vld [vmem:[%s735_s21 + $0xe8] sm:$0xff] }
  0x1c   : > { %481 = vst.msk [vmem:[%s763_s26 + $0x30] sm:$0xff] %vm474_vm0, %v416_v43  ;;  %v361_v8 = vadd.f32 %v740_v1, %v293_v53  ;;  %v297_v9 = vmul.f32 %v730_v0, %v229_v59  ;;  %v422_v11 = vmax.f32 %v358_v58, 0.0  ;;  %v298_v13 = vmul.f32 %v730_v0, %v230_v63  ;;  %v243_v54 = vld [vmem:[%s735_s21 + $0x108] sm:$0xff]  ;;  %v244_v58 = vld [vmem:[%s735_s21 + $0x110] sm:$0xff] }
  0x1d   : > { %482 = vst.msk [vmem:[%s763_s26 + $0x38] sm:$0xff] %vm474_vm0, %v417_v51  ;;  %v362_v12 = vadd.f32 %v740_v1, %v294_v3  ;;  %v423_v15 = vmax.f32 %v359_v62, 0.0  ;;  %v363_v16 = vadd.f32 %v740_v1, %v295_v4  ;;  %v299_v17 = vmul.f32 %v730_v0, %v231_v6  ;;  %v245_v62 = vld [vmem:[%s735_s21 + $0x118] sm:$0xff]  ;;  %v246_v4 = vld [vmem:[%s735_s21 + $0x120] sm:$0xff] }
  0x1e   : > { %483 = vst.msk [vmem:[%s763_s26 + $0x40] sm:$0xff] %vm474_vm0, %v418_v57  ;;  %v424_v19 = vmax.f32 %v360_v2, 0.0  ;;  %v364_v20 = vadd.f32 %v740_v1, %v296_v5  ;;  %v300_v21 = vmul.f32 %v730_v0, %v232_v10  ;;  %v425_v23 = vmax.f32 %v361_v8, 0.0  ;;  %v247_v8 = vld [vmem:[%s735_s21 + $0x128] sm:$0xff] }
  0x1f   : > { %484 = vst.msk [vmem:[%s763_s26 + $0x48] sm:$0xff] %vm474_vm0, %v419_v60  ;;  %v365_v24 = vadd.f32 %v740_v1, %v297_v9  ;;  %v301_v25 = vmul.f32 %v730_v0, %v233_v14  ;;  %v426_v27 = vmax.f32 %v362_v12, 0.0  ;;  %v366_v28 = vadd.f32 %v740_v1, %v298_v13  ;;  %v248_v12 = vld [vmem:[%s735_s21 + $0x130] sm:$0xff] }
  0x20   : > { %485 = vst.msk [vmem:[%s763_s26 + $0x50] sm:$0xff] %vm474_vm0, %v420_v61  ;;  %v302_v29 = vmul.f32 %v730_v0, %v234_v18  ;;  %v427_v31 = vmax.f32 %v363_v16, 0.0  ;;  %v367_v32 = vadd.f32 %v740_v1, %v299_v17  ;;  %v303_v33 = vmul.f32 %v730_v0, %v235_v22  ;;  %v249_v16 = vld [vmem:[%s735_s21 + $0x138] sm:$0xff] }
  0x21   : > { %486 = vst.msk [vmem:[%s763_s26 + $0x58] sm:$0xff] %vm474_vm0, %v421_v7  ;;  %v428_v35 = vmax.f32 %v364_v20, 0.0  ;;  %v368_v36 = vadd.f32 %v740_v1, %v300_v21  ;;  %v304_v37 = vmul.f32 %v730_v0, %v236_v26  ;;  %v429_v39 = vmax.f32 %v365_v24, 0.0  ;;  %v250_v20 = vld [vmem:[%s735_s21 + $0x140] sm:$0xff]  ;;  %v251_v24 = vld [vmem:[%s735_s21 + $0x148] sm:$0xff] }
  0x22   : > { %487 = vst.msk [vmem:[%s763_s26 + $0x60] sm:$0xff] %vm474_vm0, %v422_v11  ;;  %v369_v40 = vadd.f32 %v740_v1, %v301_v25  ;;  %v305_v41 = vmul.f32 %v730_v0, %v237_v30  ;;  %v430_v43 = vmax.f32 %v366_v28, 0.0  ;;  %v370_v44 = vadd.f32 %v740_v1, %v302_v29  ;;  %v252_v28 = vld [vmem:[%s735_s21 + $0x150] sm:$0xff] }
  0x23   : > { %488 = vst.msk [vmem:[%s763_s26 + $0x68] sm:$0xff] %vm474_vm0, %v423_v15  ;;  %v306_v45 = vmul.f32 %v730_v0, %v238_v34  ;;  %v431_v47 = vmax.f32 %v367_v32, 0.0  ;;  %v371_v48 = vadd.f32 %v740_v1, %v303_v33  ;;  %v307_v49 = vmul.f32 %v730_v0, %v239_v38  ;;  %v253_v32 = vld [vmem:[%s735_s21 + $0x158] sm:$0xff] }
  0x24   : > { %489 = vst.msk [vmem:[%s763_s26 + $0x70] sm:$0xff] %vm474_vm0, %v424_v19  ;;  %v432_v51 = vmax.f32 %v368_v36, 0.0  ;;  %v372_v52 = vadd.f32 %v740_v1, %v304_v37  ;;  %v308_v53 = vmul.f32 %v730_v0, %v240_v42  ;;  %v433_v55 = vmax.f32 %v369_v40, 0.0  ;;  %v254_v36 = vld [vmem:[%s735_s21 + $0x160] sm:$0xff]  ;;  %v255_v40 = vld [vmem:[%s735_s21 + $0x168] sm:$0xff] }
  0x25   : > { %490 = vst.msk [vmem:[%s763_s26 + $0x78] sm:$0xff] %vm474_vm0, %v425_v23  ;;  %v373_v56 = vadd.f32 %v740_v1, %v305_v41  ;;  %v309_v57 = vmul.f32 %v730_v0, %v241_v46  ;;  %v434_v59 = vmax.f32 %v370_v44, 0.0  ;;  %v374_v60 = vadd.f32 %v740_v1, %v306_v45  ;;  %v256_v44 = vld [vmem:[%s735_s21 + $0x170] sm:$0xff] }
  0x26   : > { %491 = vst.msk [vmem:[%s763_s26 + $0x80] sm:$0xff] %vm474_vm0, %v426_v27  ;;  %v310_v61 = vmul.f32 %v730_v0, %v242_v50  ;;  %v435_v63 = vmax.f32 %v371_v48, 0.0  ;;  %v375_v2 = vadd.f32 %v740_v1, %v307_v49  ;;  %v311_v3 = vmul.f32 %v730_v0, %v243_v54  ;;  %v257_v48 = vld [vmem:[%s735_s21 + $0x178] sm:$0xff] }
  0x27   : > { %492 = vst.msk [vmem:[%s763_s26 + $0x88] sm:$0xff] %vm474_vm0, %v427_v31  ;;  %v436_v5 = vmax.f32 %v372_v52, 0.0  ;;  %v376_v6 = vadd.f32 %v740_v1, %v308_v53  ;;  %v312_v7 = vmul.f32 %v730_v0, %v244_v58  ;;  %v437_v9 = vmax.f32 %v373_v56, 0.0  ;;  %v258_v52 = vld [vmem:[%s735_s21 + $0x180] sm:$0xff]  ;;  %v259_v56 = vld [vmem:[%s735_s21 + $0x188] sm:$0xff] }
  0x28   : > { %493 = vst.msk [vmem:[%s763_s26 + $0x90] sm:$0xff] %vm474_vm0, %v428_v35  ;;  %v377_v10 = vadd.f32 %v740_v1, %v309_v57  ;;  %v313_v11 = vmul.f32 %v730_v0, %v245_v62  ;;  %v438_v13 = vmax.f32 %v374_v60, 0.0  ;;  %v378_v14 = vadd.f32 %v740_v1, %v310_v61  ;;  %v260_v60 = vld [vmem:[%s735_s21 + $0x190] sm:$0xff] }
  0x29   : > { %494 = vst.msk [vmem:[%s763_s26 + $0x98] sm:$0xff] %vm474_vm0, %v429_v39  ;;  %v314_v15 = vmul.f32 %v730_v0, %v246_v4  ;;  %v439_v17 = vmax.f32 %v375_v2, 0.0  ;;  %v379_v18 = vadd.f32 %v740_v1, %v311_v3  ;;  %v315_v19 = vmul.f32 %v730_v0, %v247_v8  ;;  %v261_v2 = vld [vmem:[%s735_s21 + $0x198] sm:$0xff] }
  0x2a   : > { %495 = vst.msk [vmem:[%s763_s26 + $0xa0] sm:$0xff] %vm474_vm0, %v430_v43  ;;  %v440_v21 = vmax.f32 %v376_v6, 0.0  ;;  %v380_v22 = vadd.f32 %v740_v1, %v312_v7  ;;  %v316_v23 = vmul.f32 %v730_v0, %v248_v12  ;;  %v441_v25 = vmax.f32 %v377_v10, 0.0  ;;  %v273_v3 = vld [vmem:[%s735_s21 + $0x1f8] sm:$0xff]  ;;  %v262_v7 = vld [vmem:[%s735_s21 + $0x1a0] sm:$0xff] }
  0x2b   : > { %496 = vst.msk [vmem:[%s763_s26 + $0xa8] sm:$0xff] %vm474_vm0, %v431_v47  ;;  %v381_v26 = vadd.f32 %v740_v1, %v313_v11  ;;  %v317_v27 = vmul.f32 %v730_v0, %v249_v16  ;;  %v442_v29 = vmax.f32 %v378_v14, 0.0  ;;  %v382_v30 = vadd.f32 %v740_v1, %v314_v15  ;;  %v263_v11 = vld [vmem:[%s735_s21 + $0x1a8] sm:$0xff]  ;;  %v264_v15 = vld [vmem:[%s735_s21 + $0x1b0] sm:$0xff] }
  0x2c   : > { %497 = vst.msk [vmem:[%s763_s26 + $0xb0] sm:$0xff] %vm474_vm0, %v432_v51  ;;  %v318_v31 = vmul.f32 %v730_v0, %v250_v20  ;;  %v443_v33 = vmax.f32 %v379_v18, 0.0  ;;  %v383_v34 = vadd.f32 %v740_v1, %v315_v19  ;;  %v319_v35 = vmul.f32 %v730_v0, %v251_v24  ;;  %v265_v20 = vld [vmem:[%s735_s21 + $0x1b8] sm:$0xff]  ;;  %v266_v24 = vld [vmem:[%s735_s21 + $0x1c0] sm:$0xff] }
  0x2d   : > { %498 = vst.msk [vmem:[%s763_s26 + $0xb8] sm:$0xff] %vm474_vm0, %v433_v55  ;;  %v444_v37 = vmax.f32 %v380_v22, 0.0  ;;  %v384_v38 = vadd.f32 %v740_v1, %v316_v23  ;;  %v320_v39 = vmul.f32 %v730_v0, %v252_v28  ;;  %v445_v41 = vmax.f32 %v381_v26, 0.0 }
  0x2e   : > { %499 = vst.msk [vmem:[%s763_s26 + $0xc0] sm:$0xff] %vm474_vm0, %v434_v59  ;;  %v385_v42 = vadd.f32 %v740_v1, %v317_v27  ;;  %v321_v43 = vmul.f32 %v730_v0, %v253_v32  ;;  %v446_v45 = vmax.f32 %v382_v30, 0.0  ;;  %v386_v46 = vadd.f32 %v740_v1, %v318_v31 }
  0x2f   : > { %500 = vst.msk [vmem:[%s763_s26 + $0xc8] sm:$0xff] %vm474_vm0, %v435_v63  ;;  %v322_v47 = vmul.f32 %v730_v0, %v254_v36  ;;  %v447_v49 = vmax.f32 %v383_v34, 0.0  ;;  %v387_v50 = vadd.f32 %v740_v1, %v319_v35  ;;  %v323_v51 = vmul.f32 %v730_v0, %v255_v40 }
  0x30   : > { %501 = vst.msk [vmem:[%s763_s26 + $0xd0] sm:$0xff] %vm474_vm0, %v436_v5  ;;  %v448_v53 = vmax.f32 %v384_v38, 0.0  ;;  %v388_v54 = vadd.f32 %v740_v1, %v320_v39  ;;  %v324_v55 = vmul.f32 %v730_v0, %v256_v44  ;;  %v449_v57 = vmax.f32 %v385_v42, 0.0 }
  0x31   : > { %502 = vst.msk [vmem:[%s763_s26 + $0xd8] sm:$0xff] %vm474_vm0, %v437_v9  ;;  %v389_v58 = vadd.f32 %v740_v1, %v321_v43  ;;  %v325_v59 = vmul.f32 %v730_v0, %v257_v48  ;;  %v450_v61 = vmax.f32 %v386_v46, 0.0  ;;  %v390_v62 = vadd.f32 %v740_v1, %v322_v47 }
  0x32   : > { %503 = vst.msk [vmem:[%s763_s26 + $0xe0] sm:$0xff] %vm474_vm0, %v438_v13  ;;  %v326_v63 = vmul.f32 %v730_v0, %v258_v52  ;;  %v451_v4 = vmax.f32 %v387_v50, 0.0  ;;  %v391_v5 = vadd.f32 %v740_v1, %v323_v51  ;;  %v327_v6 = vmul.f32 %v730_v0, %v259_v56 }
  0x33   : > { %504 = vst.msk [vmem:[%s763_s26 + $0xe8] sm:$0xff] %vm474_vm0, %v439_v17  ;;  %v452_v8 = vmax.f32 %v388_v54, 0.0  ;;  %v392_v9 = vadd.f32 %v740_v1, %v324_v55  ;;  %v328_v10 = vmul.f32 %v730_v0, %v260_v60  ;;  %v453_v12 = vmax.f32 %v389_v58, 0.0 }
  0x34   : > { %505 = vst.msk [vmem:[%s763_s26 + $0xf0] sm:$0xff] %vm474_vm0, %v440_v21  ;;  %v393_v13 = vadd.f32 %v740_v1, %v325_v59  ;;  %v329_v14 = vmul.f32 %v730_v0, %v261_v2  ;;  %v341_v16 = vmul.f32 %v730_v0, %v273_v3  ;;  %v454_v17 = vmax.f32 %v390_v62, 0.0 }
  0x35   : > { %506 = vst.msk [vmem:[%s763_s26 + $0xf8] sm:$0xff] %vm474_vm0, %v441_v25  ;;  %v394_v18 = vadd.f32 %v740_v1, %v326_v63  ;;  %v330_v19 = vmul.f32 %v730_v0, %v262_v7  ;;  %v455_v21 = vmax.f32 %v391_v5, 0.0  ;;  %v395_v22 = vadd.f32 %v740_v1, %v327_v6 }
  0x36   : > { %507 = vst.msk [vmem:[%s763_s26 + $0x100] sm:$0xff] %vm474_vm0, %v442_v29  ;;  %v331_v23 = vmul.f32 %v730_v0, %v263_v11  ;;  %v995_v25 = vadd.f32 %v740_v1, %v341_v16  ;;  %v456_v26 = vmax.f32 %v392_v9, 0.0  ;;  %v396_v27 = vadd.f32 %v740_v1, %v328_v10  ;;  %v267_v29 = vld [vmem:[%s735_s21 + $0x1c8] sm:$0xff] }
  0x37   : > { %508 = vst.msk [vmem:[%s763_s26 + $0x108] sm:$0xff] %vm474_vm0, %v443_v33  ;;  %v332_v28 = vmul.f32 %v730_v0, %v264_v15  ;;  %v457_v30 = vmax.f32 %v393_v13, 0.0  ;;  %v397_v31 = vadd.f32 %v740_v1, %v329_v14  ;;  %v333_v32 = vmul.f32 %v730_v0, %v265_v20  ;;  %v268_v33 = vld [vmem:[%s735_s21 + $0x1d0] sm:$0xff] }
  0x38   : > { %509 = vst.msk [vmem:[%s763_s26 + $0x110] sm:$0xff] %vm474_vm0, %v444_v37  ;;  %v458_v34 = vmax.f32 %v394_v18, 0.0  ;;  %v398_v35 = vadd.f32 %v740_v1, %v330_v19  ;;  %v334_v36 = vmul.f32 %v730_v0, %v266_v24  ;;  %v269_v37 = vld [vmem:[%s735_s21 + $0x1d8] sm:$0xff]  ;;  %v459_v38 = vmax.f32 %v395_v22, 0.0 }
  0x39   : > { %510 = vst.msk [vmem:[%s763_s26 + $0x118] sm:$0xff] %vm474_vm0, %v445_v41  ;;  %v399_v39 = vadd.f32 %v740_v1, %v331_v23  ;;  %v335_v40 = vmul.f32 %v730_v0, %v267_v29  ;;  %v270_v41 = vld [vmem:[%s735_s21 + $0x1e0] sm:$0xff]  ;;  %v460_v42 = vmax.f32 %v396_v27, 0.0  ;;  %v400_v43 = vadd.f32 %v740_v1, %v332_v28 }
  0x3a   : > { %511 = vst.msk [vmem:[%s763_s26 + $0x120] sm:$0xff] %vm474_vm0, %v446_v45  ;;  %v336_v44 = vmul.f32 %v730_v0, %v268_v33  ;;  %v271_v45 = vld [vmem:[%s735_s21 + $0x1e8] sm:$0xff]  ;;  %v461_v46 = vmax.f32 %v397_v31, 0.0  ;;  %v401_v47 = vadd.f32 %v740_v1, %v333_v32  ;;  %v337_v48 = vmul.f32 %v730_v0, %v269_v37 }
  0x3b   : > { %512 = vst.msk [vmem:[%s763_s26 + $0x128] sm:$0xff] %vm474_vm0, %v447_v49  ;;  %v272_v49 = vld [vmem:[%s735_s21 + $0x1f0] sm:$0xff]  ;;  %v462_v50 = vmax.f32 %v398_v35, 0.0  ;;  %v402_v51 = vadd.f32 %v740_v1, %v334_v36  ;;  %v338_v52 = vmul.f32 %v730_v0, %v270_v41  ;;  %v403_v54 = vadd.f32 %v740_v1, %v335_v40 }
  0x3c   : > { %513 = vst.msk [vmem:[%s763_s26 + $0x130] sm:$0xff] %vm474_vm0, %v448_v53  ;;  %v463_v53 = vmax.f32 %v399_v39, 0.0  ;;  %v339_v55 = vmul.f32 %v730_v0, %v271_v45  ;;  %v464_v56 = vmax.f32 %v400_v43, 0.0  ;;  %v340_v58 = vmul.f32 %v730_v0, %v272_v49 }
  0x3d   : > { %514 = vst.msk [vmem:[%s763_s26 + $0x138] sm:$0xff] %vm474_vm0, %v449_v57  ;;  %v404_v57 = vadd.f32 %v740_v1, %v336_v44  ;;  %v465_v59 = vmax.f32 %v401_v47, 0.0  ;;  %v405_v60 = vadd.f32 %v740_v1, %v337_v48  ;;  %v406_v62 = vadd.f32 %v740_v1, %v338_v52 }
  0x3e   : > { %515 = vst.msk [vmem:[%s763_s26 + $0x140] sm:$0xff] %vm474_vm0, %v450_v61  ;;  %v466_v61 = vmax.f32 %v402_v51, 0.0  ;;  %v467_v63 = vmax.f32 %v403_v54, 0.0  ;;  %v407_v0 = vadd.f32 %v740_v1, %v339_v55  ;;  %v408_v3 = vadd.f32 %v740_v1, %v340_v58 }
  0x3f   : > { %516 = vst.msk [vmem:[%s763_s26 + $0x148] sm:$0xff] %vm474_vm0, %v451_v4  ;;  %v468_v2 = vmax.f32 %v404_v57, 0.0  ;;  %v469_v4 = vmax.f32 %v405_v60, 0.0  ;;  %v470_v5 = vmax.f32 %v406_v62, 0.0 }
  0x40   : > { %517 = vst.msk [vmem:[%s763_s26 + $0x150] sm:$0xff] %vm474_vm0, %v452_v8  ;;  %v471_v6 = vmax.f32 %v407_v0, 0.0  ;;  %v472_v7 = vmax.f32 %v408_v3, 0.0  ;;  %v473_v8 = vmax.f32 %v995_v25, 0.0 }
  0x41   : > { %518 = vst.msk [vmem:[%s763_s26 + $0x158] sm:$0xff] %vm474_vm0, %v453_v12 }
  0x42   : > { %519 = vst.msk [vmem:[%s763_s26 + $0x160] sm:$0xff] %vm474_vm0, %v454_v17 }
  0x43   : > { %520 = vst.msk [vmem:[%s763_s26 + $0x168] sm:$0xff] %vm474_vm0, %v455_v21 }
  0x44   : > { %521 = vst.msk [vmem:[%s763_s26 + $0x170] sm:$0xff] %vm474_vm0, %v456_v26 }
  0x45   : > { %522 = vst.msk [vmem:[%s763_s26 + $0x178] sm:$0xff] %vm474_vm0, %v457_v30 }
  0x46   : > { %523 = vst.msk [vmem:[%s763_s26 + $0x180] sm:$0xff] %vm474_vm0, %v458_v34 }
  0x47   : > { %524 = vst.msk [vmem:[%s763_s26 + $0x188] sm:$0xff] %vm474_vm0, %v459_v38 }
  0x48   : > { %525 = vst.msk [vmem:[%s763_s26 + $0x190] sm:$0xff] %vm474_vm0, %v460_v42 }
  0x49   : > { %526 = vst.msk [vmem:[%s763_s26 + $0x198] sm:$0xff] %vm474_vm0, %v461_v46 }
  0x4a   : > { %527 = vst.msk [vmem:[%s763_s26 + $0x1a0] sm:$0xff] %vm474_vm0, %v462_v50 }
  0x4b   : > { %528 = vst.msk [vmem:[%s763_s26 + $0x1a8] sm:$0xff] %vm474_vm0, %v463_v53 }
  0x4c   : > { %529 = vst.msk [vmem:[%s763_s26 + $0x1b0] sm:$0xff] %vm474_vm0, %v464_v56 }
  0x4d   : > { %530 = vst.msk [vmem:[%s763_s26 + $0x1b8] sm:$0xff] %vm474_vm0, %v465_v59 }
  0x4e   : > { %531 = vst.msk [vmem:[%s763_s26 + $0x1c0] sm:$0xff] %vm474_vm0, %v466_v61 }
  0x4f   : > { %532 = vst.msk [vmem:[%s763_s26 + $0x1c8] sm:$0xff] %vm474_vm0, %v467_v63 }
  0x50   : > { %533 = vst.msk [vmem:[%s763_s26 + $0x1d0] sm:$0xff] %vm474_vm0, %v468_v2 }
  0x51   : > { %534 = vst.msk [vmem:[%s763_s26 + $0x1d8] sm:$0xff] %vm474_vm0, %v469_v4 }
  0x52   : > { %535 = vst.msk [vmem:[%s763_s26 + $0x1e0] sm:$0xff] %vm474_vm0, %v470_v5 }
  0x53   : > { %536 = vst.msk [vmem:[%s763_s26 + $0x1e8] sm:$0xff] %vm474_vm0, %v471_v6 }
  0x54   : > { %537 = vst.msk [vmem:[%s763_s26 + $0x1f0] sm:$0xff] %vm474_vm0, %v472_v7 }
  0x55   : > { %538 = vst.msk [vmem:[%s763_s26 + $0x1f8] sm:$0xff] %vm474_vm0, %v473_v8 }
  0x56 PF: > { %s13_s14 = sadd.s32 1, %s687_s14   ;;  %s1083_s12 = smov %s683_s13 }
  0x57   : > { %p10_p5 = scmp.ge.s32.totalorder %s13_s14, 6   ;;  %s1084_s13 = smov %s1086_s15 }
  0x59   :  { %12 = sbr.rel (!%p10_p5) target bundleno = 2 (0x2), region = 62 }

// kernel: generator_forward.15
= control target key start
LH: loop header
LB: loop body
LE: loop exit
PB: predicated region body
PF: predicated region fallthrough
CT: control target
= control target key end

     0   :  { %s1614_s15 = smov 0   ;;  %s1616_s16 = smov 0   ;;  %s2286_s0 = inlined_call_operand.vmem [shape: bf16[4,512,64], index: 0, kind: input, shape index: {}]   ;;  %s2287_s1 = inlined_call_operand.vmem [shape: bf16[4,64,8], index: 1, kind: input, shape index: {}]   ;;  %s2288_s2 = inlined_call_operand.vmem [shape: f32[4,512,8], index: 2, kind: output, shape index: {0}]   ;;  %s2289_s3 = inlined_call_operand.vmem [shape: f32[1,8], index: 3, kind: output, shape index: {1}]   ;;  %s2290_s4 = inlined_call_operand.vmem [shape: f32[1,8], index: 4, kind: output, shape index: {2}]  }
   0x1   :  { %s1618_s17 = smov 0  }
   0x2 LB: > { %s27_s18 = sadd.s32 1, %s1582_s16  ;;  %p1301_p0 = scmp.ge.s32.totalorder %s1586_s17, 1  ;;  %s1586_s17 = sphi %s1618_s17, %s15_s17   ;;  %s1582_s16 = sphi %s1616_s16, %s2292_s16   ;;  %s1578_s15 = sphi %s1614_s15, %s2291_s15  }
   0x3   : > { %p29_p1 = scmp.ge.s32.totalorder %s27_s18, 4  ;;  %p188_p2 = scmp.lt.s32.totalorder %s1586_s17, 5 }
   0x5   : > { %s2294_s18 = smov (%p29_p1, %s27_s18), 0  ;;  %p189_p3 = pnand %p1301_p0, %p188_p2 }
   0x6   : > { %p228_p4 = scmp.lt.s32.totalorder (!%p189_p3), %s1578_s15, 3  ;;  %p253_p5 = scmp.eq.s32.totalorder (!%p189_p3), %s1578_s15, 0 }
   0x7   : > { %192 = sbr.rel (%p189_p3) target bundleno = 395 (0x18b), region = 28 }
   0xc   : > { %s2296_s15 = smov (!%p228_p4, %s1578_s15), 3  ;;  %258 = sbr.rel (!%p253_p5) target bundleno = 17 (0x11), region = 32  ;;  %vm259_vm0 = vcmask (%p253_p5), 57344   ;;  %v1588_v0 = vmov (%p253_p5), 0.0  }
   0xd   : > { %s1487_s19 = sshll.u32 %s2296_s15, 8  ;;  %s1488_s20 = sshll.u32 %s2296_s15, 5  ;;  %260 = vst.msk [vmem:[%s2289_s3] sm:$0x1] (%p253_p5), %vm259_vm0, %v1588_v0 }
   0xe   : > { %s1635_s23 = scalar_lea.vmem %s2286_s0, %s1487_s19  ;;  %s241_s26 = scalar_lea.vmem %s2287_s1, %s1488_s20  ;;  %261 = vst.msk [vmem:[%s2290_s4] sm:$0x1] (%p253_p5), %vm259_vm0, %v1588_v0 }
   0xf   : > { %s1489_s27 = sshll.u32 %s2296_s15, 9 }
  0x10   : > { %s1643_s30 = scalar_lea.vmem %s2288_s2, %s1489_s27 }
  0x11 PF: > { %v1526_v1 = vld [vmem:[%s241_s26 + $0x18] sm:$0xff]  ;;  %v1525_v2 = vld [vmem:[%s241_s26 + $0x10] sm:$0xff]  ;;  %v1524_v3 = vld [vmem:[%s241_s26 + $0x8] sm:$0xff]  ;;  %vm518_vm1 = vcmask 523264   ;;  %vm784_vm2 = vcmask 64512   ;;  %vm984_vm3 = vcmask 57344  }
  0x12   : > { %619 = vmatpush.bf16.msra.mxu0 %v1526_v1  ;;  %1527 = vmatpush.bf16.msra.mxu1 %v1526_v1  ;;  %v1523_v4 = vld [vmem:[%s241_s26] sm:$0xff]  ;;  %v1492_v7 = vld [vmem:[%s1635_s23 + $0x8] sm:$0xff]  ;;  %v1493_v10 = vld [vmem:[%s1635_s23 + $0x10] sm:$0xff] }
  0x13   : > { %1528 = vmatpush.bf16.msra.mxu2 %v1526_v1  ;;  %1529 = vmatpush.bf16.msra.mxu3 %v1526_v1  ;;  %v1491_v5 = vld [vmem:[%s1635_s23] sm:$0xff]  ;;  %v1500_v8 = vld [vmem:[%s1635_s23 + $0x48] sm:$0xff]  ;;  %v1501_v11 = vld [vmem:[%s1635_s23 + $0x50] sm:$0xff] }
  0x14   : > { %v1499_v6 = vld [vmem:[%s1635_s23 + $0x40] sm:$0xff]  ;;  %v1508_v12 = vld [vmem:[%s1635_s23 + $0x88] sm:$0xff]  ;;  %v1494_v13 = vld [vmem:[%s1635_s23 + $0x18] sm:$0xff] }
  0x15   : > { %v1507_v9 = vld [vmem:[%s1635_s23 + $0x80] sm:$0xff]  ;;  %v1502_v14 = vld [vmem:[%s1635_s23 + $0x58] sm:$0xff]  ;;  %v1509_v15 = vld [vmem:[%s1635_s23 + $0x90] sm:$0xff] }
  0x16   : > { %620 = vmatpush.bf16.msra.mxu0 %v1525_v2  ;;  %1530 = vmatpush.bf16.msra.mxu1 %v1525_v2  ;;  %v1515_v16 = vld [vmem:[%s1635_s23 + $0xc0] sm:$0xff]  ;;  %v1510_v19 = vld [vmem:[%s1635_s23 + $0x98] sm:$0xff]  ;;  %v1516_v20 = vld [vmem:[%s1635_s23 + $0xc8] sm:$0xff] }
  0x17   : > { %1531 = vmatpush.bf16.msra.mxu2 %v1525_v2  ;;  %1532 = vmatpush.bf16.msra.mxu3 %v1525_v2  ;;  %v1495_v17 = vld [vmem:[%s1635_s23 + $0x20] sm:$0xff]  ;;  %v1496_v21 = vld [vmem:[%s1635_s23 + $0x28] sm:$0xff]  ;;  %v1517_v24 = vld [vmem:[%s1635_s23 + $0xd0] sm:$0xff] }
  0x18   : > { %v1503_v18 = vld [vmem:[%s1635_s23 + $0x60] sm:$0xff]  ;;  %v1504_v22 = vld [vmem:[%s1635_s23 + $0x68] sm:$0xff]  ;;  %v1497_v25 = vld [vmem:[%s1635_s23 + $0x30] sm:$0xff] }
  0x19   : > { %v1511_v23 = vld [vmem:[%s1635_s23 + $0xa0] sm:$0xff]  ;;  %v1505_v26 = vld [vmem:[%s1635_s23 + $0x70] sm:$0xff]  ;;  %v1512_v27 = vld [vmem:[%s1635_s23 + $0xa8] sm:$0xff] }
  0x1a   : > { %621 = vmatpush.bf16.msra.mxu0 %v1524_v3  ;;  %1533 = vmatpush.bf16.msra.mxu1 %v1524_v3  ;;  %v1518_v28 = vld [vmem:[%s1635_s23 + $0xd8] sm:$0xff]  ;;  %v1513_v31 = vld [vmem:[%s1635_s23 + $0xb0] sm:$0xff]  ;;  %v1519_v32 = vld [vmem:[%s1635_s23 + $0xe0] sm:$0xff] }
  0x1b   : > { %1534 = vmatpush.bf16.msra.mxu2 %v1524_v3  ;;  %1535 = vmatpush.bf16.msra.mxu3 %v1524_v3  ;;  %v1498_v29 = vld [vmem:[%s1635_s23 + $0x38] sm:$0xff]  ;;  %v1520_v36 = vld [vmem:[%s1635_s23 + $0xe8] sm:$0xff]  ;;  %v1521_v53 = vld [vmem:[%s1635_s23 + $0xf0] sm:$0xff] }
  0x1c   : > { %v1506_v30 = vld [vmem:[%s1635_s23 + $0x78] sm:$0xff] }
  0x1d   : > { %v1514_v35 = vld [vmem:[%s1635_s23 + $0xb8] sm:$0xff] }
  0x1e   : > { %622 = vmatpush.bf16.msra.mxu0 %v1523_v4  ;;  %1536 = vmatpush.bf16.msra.mxu1 %v1523_v4 }
  0x1f   : > { %1537 = vmatpush.bf16.msra.mxu2 %v1523_v4  ;;  %1538 = vmatpush.bf16.msra.mxu3 %v1523_v4 }
  0x21   : > { %1453 = vmatmul.msk.bf16.vlgmr.msra.gmra.mxu0 %vm518_vm1, %v1491_v5  ;;  %1461 = vmatmul.msk.bf16.vlgmr.msra.gmra.mxu1 %vm518_vm1, %v1499_v6  ;;  %v1522_v6 = vld [vmem:[%s1635_s23 + $0xf8] sm:$0xff] }
  0x22   : > { %1469 = vmatmul.msk.bf16.vlgmr.msra.gmra.mxu2 %vm518_vm1, %v1507_v9  ;;  %1477 = vmatmul.msk.bf16.vlgmr.msra.gmra.mxu3 %vm518_vm1, %v1515_v16 }
  0x31   : > { %1454 = vmatmul.msk.bf16.gmra.mxu0 %vm518_vm1, %v1492_v7  ;;  %1462 = vmatmul.msk.bf16.gmra.mxu1 %vm518_vm1, %v1500_v8 }
  0x32   : > { %1470 = vmatmul.msk.bf16.gmra.mxu2 %vm518_vm1, %v1508_v12  ;;  %1478 = vmatmul.msk.bf16.gmra.mxu3 %vm518_vm1, %v1516_v20 }
  0x41   : > { %1455 = vmatmul.msk.bf16.gmra.mxu0 %vm518_vm1, %v1493_v10  ;;  %1463 = vmatmul.msk.bf16.gmra.mxu1 %vm518_vm1, %v1501_v11 }
  0x42   : > { %1471 = vmatmul.msk.bf16.gmra.mxu2 %vm518_vm1, %v1509_v15  ;;  %1479 = vmatmul.msk.bf16.gmra.mxu3 %vm518_vm1, %v1517_v24 }
  0x51   : > { %1456 = vmatmul.msk.bf16.gmra.mxu0 %vm518_vm1, %v1494_v13  ;;  %1464 = vmatmul.msk.bf16.gmra.mxu1 %vm518_vm1, %v1502_v14 }
  0x52   : > { %1472 = vmatmul.msk.bf16.gmra.mxu2 %vm518_vm1, %v1510_v19  ;;  %1480 = vmatmul.msk.bf16.gmra.mxu3 %vm518_vm1, %v1518_v28 }
  0x61   : > { %1457 = vmatmul.msk.bf16.gmra.mxu0 %vm518_vm1, %v1495_v17  ;;  %1465 = vmatmul.msk.bf16.gmra.mxu1 %vm518_vm1, %v1503_v18 }
  0x62   : > { %1473 = vmatmul.msk.bf16.gmra.mxu2 %vm518_vm1, %v1511_v23  ;;  %1481 = vmatmul.msk.bf16.gmra.mxu3 %vm518_vm1, %v1519_v32 }
  0x71   : > { %1458 = vmatmul.msk.bf16.gmra.mxu0 %vm518_vm1, %v1496_v21  ;;  %1466 = vmatmul.msk.bf16.gmra.mxu1 %vm518_vm1, %v1504_v22 }
  0x72   : > { %1474 = vmatmul.msk.bf16.gmra.mxu2 %vm518_vm1, %v1512_v27  ;;  %1482 = vmatmul.msk.bf16.gmra.mxu3 %vm518_vm1, %v1520_v36 }
  0x81   : > { %1459 = vmatmul.msk.bf16.gmra.mxu0 %vm518_vm1, %v1497_v25  ;;  %1467 = vmatmul.msk.bf16.gmra.mxu1 %vm518_vm1, %v1505_v26 }
  0x82   : > { %1475 = vmatmul.msk.bf16.gmra.mxu2 %vm518_vm1, %v1513_v31  ;;  %1483 = vmatmul.msk.bf16.gmra.mxu3 %vm518_vm1, %v1521_v53 }
  0x91   : > { %1460 = vmatmul.msk.bf16.gmra.mxu0 %vm518_vm1, %v1498_v29  ;;  %1468 = vmatmul.msk.bf16.gmra.mxu1 %vm518_vm1, %v1506_v30 }
  0x92   : > { %1476 = vmatmul.msk.bf16.gmra.mxu2 %vm518_vm1, %v1514_v35  ;;  %1484 = vmatmul.msk.bf16.gmra.mxu3 %vm518_vm1, %v1522_v6 }
  0x9e   : > { %v624_v33 = vpop.f32.mrf.mxu0  ;;  %v1707_v34 = vpop.f32.mrf.mxu1 }
  0x9f   : > { %785 = vst.msk [vmem:[%s1643_s30] sm:$0xff] %vm784_vm2, %v624_v33  ;;  %v987_v37 = vmul.f32 %v624_v33, %v624_v33  ;;  %v850_v40 = vsel %vm784_vm2, %v624_v33, 0.0 }
  0xa0   : > { %801 = vst.msk [vmem:[%s1643_s30 + $0x80] sm:$0xff] %vm784_vm2, %v1707_v34 }
  0xa1   : > { %v1051_v44 = vsel %vm784_vm2, %v987_v37, 0.0 }
  0xa5   : > { %v1745_v59 = vpop.f32.mrf.mxu2  ;;  %v1804_v17 = vpop.f32.mrf.mxu3 }
  0xa6   : > { %v626_v38 = vpop.f32.mrf.mxu0  ;;  %v1718_v39 = vpop.f32.mrf.mxu1  ;;  %817 = vst.msk [vmem:[%s1643_s30 + $0x100] sm:$0xff] %vm784_vm2, %v1745_v59 }
  0xa7   : > { %786 = vst.msk [vmem:[%s1643_s30 + $0x8] sm:$0xff] %vm784_vm2, %v626_v38  ;;  %v851_v41 = vsel %vm784_vm2, %v626_v38, 0.0  ;;  %v988_v42 = vmul.f32 %v626_v38, %v626_v38 }
  0xa8   : > { %v852_v43 = vadd.f32 %v851_v41, %v850_v40  ;;  %802 = vst.msk [vmem:[%s1643_s30 + $0x88] sm:$0xff] %vm784_vm2, %v1718_v39 }
  0xa9   : > { %v1052_v45 = vsel %vm784_vm2, %v988_v42, 0.0  ;;  %833 = vst.msk [vmem:[%s1643_s30 + $0x180] sm:$0xff] %vm784_vm2, %v1804_v17 }
  0xaa   : > { %v1053_v46 = vadd.f32 %v1052_v45, %v1051_v44 }
  0xad   : > { %v1759_v3 = vpop.f32.mrf.mxu2  ;;  %v1821_v21 = vpop.f32.mrf.mxu3 }
  0xae   : > { %v629_v47 = vpop.f32.mrf.mxu0  ;;  %v1729_v48 = vpop.f32.mrf.mxu1  ;;  %818 = vst.msk [vmem:[%s1643_s30 + $0x108] sm:$0xff] %vm784_vm2, %v1759_v3 }
  0xaf   : > { %787 = vst.msk [vmem:[%s1643_s30 + $0x10] sm:$0xff] %vm784_vm2, %v629_v47  ;;  %v853_v49 = vsel %vm784_vm2, %v629_v47, 0.0  ;;  %v989_v50 = vmul.f32 %v629_v47, %v629_v47 }
  0xb0   : > { %v854_v51 = vadd.f32 %v853_v49, %v852_v43  ;;  %803 = vst.msk [vmem:[%s1643_s30 + $0x90] sm:$0xff] %vm784_vm2, %v1729_v48 }
  0xb1   : > { %v1054_v52 = vsel %vm784_vm2, %v989_v50, 0.0  ;;  %834 = vst.msk [vmem:[%s1643_s30 + $0x188] sm:$0xff] %vm784_vm2, %v1821_v21 }
  0xb2   : > { %v1055_v54 = vadd.f32 %v1054_v52, %v1053_v46 }
  0xb5   : > { %v1778_v10 = vpop.f32.mrf.mxu2  ;;  %v1838_v25 = vpop.f32.mrf.mxu3 }
  0xb6   : > { %v631_v55 = vpop.f32.mrf.mxu0  ;;  %v1740_v56 = vpop.f32.mrf.mxu1  ;;  %819 = vst.msk [vmem:[%s1643_s30 + $0x110] sm:$0xff] %vm784_vm2, %v1778_v10 }
  0xb7   : > { %788 = vst.msk [vmem:[%s1643_s30 + $0x18] sm:$0xff] %vm784_vm2, %v631_v55  ;;  %v855_v57 = vsel %vm784_vm2, %v631_v55, 0.0  ;;  %v990_v58 = vmul.f32 %v631_v55, %v631_v55 }
  0xb8   : > { %v856_v60 = vadd.f32 %v855_v57, %v854_v51  ;;  %804 = vst.msk [vmem:[%s1643_s30 + $0x98] sm:$0xff] %vm784_vm2, %v1740_v56 }
  0xb9   : > { %v1056_v61 = vsel %vm784_vm2, %v990_v58, 0.0  ;;  %835 = vst.msk [vmem:[%s1643_s30 + $0x190] sm:$0xff] %vm784_vm2, %v1838_v25 }
  0xba   : > { %v1057_v62 = vadd.f32 %v1056_v61, %v1055_v54 }
  0xbd   : > { %v1790_v13 = vpop.f32.mrf.mxu2  ;;  %v1855_v29 = vpop.f32.mrf.mxu3 }
  0xbe   : > { %v634_v63 = vpop.f32.mrf.mxu0  ;;  %v1754_v0 = vpop.f32.mrf.mxu1  ;;  %820 = vst.msk [vmem:[%s1643_s30 + $0x118] sm:$0xff] %vm784_vm2, %v1790_v13 }
  0xbf   : > { %789 = vst.msk [vmem:[%s1643_s30 + $0x20] sm:$0xff] %vm784_vm2, %v634_v63  ;;  %v857_v1 = vsel %vm784_vm2, %v634_v63, 0.0  ;;  %v991_v2 = vmul.f32 %v634_v63, %v634_v63 }
  0xc0   : > { %v1761_v4 = vadd.f32 %v857_v1, %v856_v60  ;;  %805 = vst.msk [vmem:[%s1643_s30 + $0xa0] sm:$0xff] %vm784_vm2, %v1754_v0 }
  0xc1   : > { %v1058_v5 = vsel %vm784_vm2, %v991_v2, 0.0  ;;  %836 = vst.msk [vmem:[%s1643_s30 + $0x198] sm:$0xff] %vm784_vm2, %v1855_v29 }
  0xc2   : > { %v1771_v7 = vadd.f32 %v1058_v5, %v1057_v62 }
  0xc5   : > { %v1802_v16 = vpop.f32.mrf.mxu2  ;;  %v1872_v33 = vpop.f32.mrf.mxu3 }
  0xc6   : > { %v636_v8 = vpop.f32.mrf.mxu0  ;;  %v1774_v9 = vpop.f32.mrf.mxu1  ;;  %821 = vst.msk [vmem:[%s1643_s30 + $0x120] sm:$0xff] %vm784_vm2, %v1802_v16 }
  0xc7   : > { %790 = vst.msk [vmem:[%s1643_s30 + $0x28] sm:$0xff] %vm784_vm2, %v636_v8  ;;  %v992_v37 = vmul.f32 %v636_v8, %v636_v8  ;;  %v859_v41 = vsel %vm784_vm2, %v636_v8, 0.0 }
  0xc8   : > { %806 = vst.msk [vmem:[%s1643_s30 + $0xa8] sm:$0xff] %vm784_vm2, %v1774_v9  ;;  %v860_v46 = vadd.f32 %v859_v41, %v1761_v4 }
  0xc9   : > { %837 = vst.msk [vmem:[%s1643_s30 + $0x1a0] sm:$0xff] %vm784_vm2, %v1872_v33  ;;  %v1060_v43 = vsel %vm784_vm2, %v992_v37, 0.0 }
  0xca   : > { %v1061_v51 = vadd.f32 %v1060_v43, %v1771_v7 }
  0xcd   : > { %v1819_v20 = vpop.f32.mrf.mxu2  ;;  %v1889_v40 = vpop.f32.mrf.mxu3 }
  0xce   : > { %v639_v11 = vpop.f32.mrf.mxu0  ;;  %v1786_v12 = vpop.f32.mrf.mxu1  ;;  %822 = vst.msk [vmem:[%s1643_s30 + $0x128] sm:$0xff] %vm784_vm2, %v1819_v20 }
  0xcf   : > { %791 = vst.msk [vmem:[%s1643_s30 + $0x30] sm:$0xff] %vm784_vm2, %v639_v11  ;;  %v993_v42 = vmul.f32 %v639_v11, %v639_v11  ;;  %v861_v44 = vsel %vm784_vm2, %v639_v11, 0.0 }
  0xd0   : > { %807 = vst.msk [vmem:[%s1643_s30 + $0xb0] sm:$0xff] %vm784_vm2, %v1786_v12  ;;  %v862_v52 = vadd.f32 %v861_v44, %v860_v46 }
  0xd1   : > { %838 = vst.msk [vmem:[%s1643_s30 + $0x1a8] sm:$0xff] %vm784_vm2, %v1889_v40  ;;  %v1062_v47 = vsel %vm784_vm2, %v993_v42, 0.0 }
  0xd2   : > { %v1063_v62 = vadd.f32 %v1062_v47, %v1061_v51 }
  0xd5   : > { %v1836_v24 = vpop.f32.mrf.mxu2  ;;  %v1915_v61 = vpop.f32.mrf.mxu3 }
  0xd6   : > { %v641_v14 = vpop.f32.mrf.mxu0  ;;  %v1798_v15 = vpop.f32.mrf.mxu1  ;;  %823 = vst.msk [vmem:[%s1643_s30 + $0x130] sm:$0xff] %vm784_vm2, %v1836_v24 }
  0xd7   : > { %792 = vst.msk [vmem:[%s1643_s30 + $0x38] sm:$0xff] %vm784_vm2, %v641_v14  ;;  %v994_v45 = vmul.f32 %v641_v14, %v641_v14  ;;  %v863_v49 = vsel %vm784_vm2, %v641_v14, 0.0 }
  0xd8   : > { %808 = vst.msk [vmem:[%s1643_s30 + $0xb8] sm:$0xff] %vm784_vm2, %v1798_v15  ;;  %v864_v63 = vadd.f32 %v863_v49, %v862_v52 }
  0xd9   : > { %v1064_v55 = vsel %vm784_vm2, %v994_v45, 0.0  ;;  %839 = vst.msk [vmem:[%s1643_s30 + $0x1b0] sm:$0xff] %vm784_vm2, %v1915_v61 }
  0xda   : > { %v1065_v5 = vadd.f32 %v1064_v55, %v1063_v62 }
  0xdd   : > { %v1853_v28 = vpop.f32.mrf.mxu2 }
  0xde   : > { %v644_v18 = vpop.f32.mrf.mxu0  ;;  %v1815_v19 = vpop.f32.mrf.mxu1  ;;  %824 = vst.msk [vmem:[%s1643_s30 + $0x138] sm:$0xff] %vm784_vm2, %v1853_v28 }
  0xdf   : > { %793 = vst.msk [vmem:[%s1643_s30 + $0x40] sm:$0xff] %vm784_vm2, %v644_v18  ;;  %v995_v50 = vmul.f32 %v644_v18, %v644_v18  ;;  %v865_v57 = vsel %vm784_vm2, %v644_v18, 0.0 }
  0xe0   : > { %809 = vst.msk [vmem:[%s1643_s30 + $0xc0] sm:$0xff] %vm784_vm2, %v1815_v19  ;;  %v866_v6 = vadd.f32 %v865_v57, %v864_v63 }
  0xe1   : > { %v1066_v1 = vsel %vm784_vm2, %v995_v50, 0.0  ;;  %v1940_v50 = vpop.f32.mrf.mxu3 }
  0xe2   : > { %v1067_v14 = vadd.f32 %v1066_v1, %v1065_v5  ;;  %840 = vst.msk [vmem:[%s1643_s30 + $0x1b8] sm:$0xff] %vm784_vm2, %v1940_v50 }
  0xe5   : > { %v1870_v32 = vpop.f32.mrf.mxu2 }
  0xe6   : > { %v646_v22 = vpop.f32.mrf.mxu0  ;;  %v1832_v23 = vpop.f32.mrf.mxu1  ;;  %825 = vst.msk [vmem:[%s1643_s30 + $0x140] sm:$0xff] %vm784_vm2, %v1870_v32 }
  0xe7   : > { %794 = vst.msk [vmem:[%s1643_s30 + $0x48] sm:$0xff] %vm784_vm2, %v646_v22  ;;  %v996_v58 = vmul.f32 %v646_v22, %v646_v22  ;;  %v867_v2 = vsel %vm784_vm2, %v646_v22, 0.0 }
  0xe8   : > { %810 = vst.msk [vmem:[%s1643_s30 + $0xc8] sm:$0xff] %vm784_vm2, %v1832_v23  ;;  %v868_v18 = vadd.f32 %v867_v2, %v866_v6 }
  0xe9   : > { %v1068_v7 = vsel %vm784_vm2, %v996_v58, 0.0 }
  0xea   : > { %v1069_v42 = vadd.f32 %v1068_v7, %v1067_v14 }
  0xed   : > { %v1887_v38 = vpop.f32.mrf.mxu2 }
  0xee   : > { %v649_v26 = vpop.f32.mrf.mxu0  ;;  %v1849_v27 = vpop.f32.mrf.mxu1  ;;  %826 = vst.msk [vmem:[%s1643_s30 + $0x148] sm:$0xff] %vm784_vm2, %v1887_v38 }
  0xef   : > { %795 = vst.msk [vmem:[%s1643_s30 + $0x50] sm:$0xff] %vm784_vm2, %v649_v26  ;;  %v997_v4 = vmul.f32 %v649_v26, %v649_v26  ;;  %v869_v8 = vsel %vm784_vm2, %v649_v26, 0.0 }
  0xf0   : > { %811 = vst.msk [vmem:[%s1643_s30 + $0xd0] sm:$0xff] %vm784_vm2, %v1849_v27  ;;  %v870_v43 = vadd.f32 %v869_v8, %v868_v18  ;;  %v1003_v8 = vmul.f32 %v1707_v34, %v1707_v34 }
  0xf1   : > { %v1070_v22 = vsel %vm784_vm2, %v997_v4, 0.0 }
  0xf5   : > { %v1913_v60 = vpop.f32.mrf.mxu2 }
  0xf6   : > { %v651_v30 = vpop.f32.mrf.mxu0  ;;  %v1866_v31 = vpop.f32.mrf.mxu1  ;;  %827 = vst.msk [vmem:[%s1643_s30 + $0x150] sm:$0xff] %vm784_vm2, %v1913_v60 }
  0xf7   : > { %796 = vst.msk [vmem:[%s1643_s30 + $0x58] sm:$0xff] %vm784_vm2, %v651_v30  ;;  %v998_v11 = vmul.f32 %v651_v30, %v651_v30  ;;  %v871_v37 = vsel %vm784_vm2, %v651_v30, 0.0  ;;  %v1071_v30 = vadd.f32 %v1070_v22, %v1069_v42  ;;  %v1965_v22 = vpop.f32.mrf.mxu3  ;;  %v881_v42 = vsel %vm784_vm2, %v1707_v34, 0.0 }
  0xf8   : > { %812 = vst.msk [vmem:[%s1643_s30 + $0xd8] sm:$0xff] %vm784_vm2, %v1866_v31  ;;  %v872_v51 = vadd.f32 %v871_v37, %v870_v43  ;;  %v1004_v43 = vmul.f32 %v1718_v39, %v1718_v39  ;;  %v1005_v34 = vmul.f32 %v1729_v48, %v1729_v48 }
  0xf9   : > { %v1072_v46 = vsel %vm784_vm2, %v998_v11, 0.0  ;;  %841 = vst.msk [vmem:[%s1643_s30 + $0x1c0] sm:$0xff] %vm784_vm2, %v1965_v22 }
  0xfd   : > { %v1938_v49 = vpop.f32.mrf.mxu2 }
  0xfe   : > { %v654_v35 = vpop.f32.mrf.mxu0  ;;  %v1883_v36 = vpop.f32.mrf.mxu1  ;;  %828 = vst.msk [vmem:[%s1643_s30 + $0x158] sm:$0xff] %vm784_vm2, %v1938_v49 }
  0xff   : > { %797 = vst.msk [vmem:[%s1643_s30 + $0x60] sm:$0xff] %vm784_vm2, %v654_v35  ;;  %v999_v41 = vmul.f32 %v654_v35, %v654_v35  ;;  %v873_v26 = vsel %vm784_vm2, %v654_v35, 0.0  ;;  %v1073_v35 = vadd.f32 %v1072_v46, %v1071_v30  ;;  %v883_v30 = vsel %vm784_vm2, %v1718_v39, 0.0 }
 0x100   : > { %813 = vst.msk [vmem:[%s1643_s30 + $0xe0] sm:$0xff] %vm784_vm2, %v1883_v36  ;;  %v874_v58 = vadd.f32 %v873_v26, %v872_v51  ;;  %v887_v39 = vsel %vm784_vm2, %v1740_v56, 0.0 }
 0x101   : > { %v1074_v52 = vsel %vm784_vm2, %v999_v41, 0.0 }
 0x102   : > { %v1075_v1 = vadd.f32 %v1074_v52, %v1073_v35  ;;  %v1006_v35 = vmul.f32 %v1740_v56, %v1740_v56  ;;  %v1008_v56 = vmul.f32 %v1774_v9, %v1774_v9 }
 0x105   : > { %v1963_v18 = vpop.f32.mrf.mxu2 }
 0x106   : > { %v656_v53 = vpop.f32.mrf.mxu0  ;;  %v1907_v54 = vpop.f32.mrf.mxu1  ;;  %829 = vst.msk [vmem:[%s1643_s30 + $0x160] sm:$0xff] %vm784_vm2, %v1963_v18 }
 0x107   : > { %798 = vst.msk [vmem:[%s1643_s30 + $0x68] sm:$0xff] %vm784_vm2, %v656_v53  ;;  %v1000_v47 = vmul.f32 %v656_v53, %v656_v53  ;;  %v875_v55 = vsel %vm784_vm2, %v656_v53, 0.0 }
 0x108   : > { %814 = vst.msk [vmem:[%s1643_s30 + $0xe8] sm:$0xff] %vm784_vm2, %v1907_v54  ;;  %v876_v2 = vadd.f32 %v875_v55, %v874_v58  ;;  %v1084_v55 = vsel %vm784_vm2, %v1004_v43, 0.0 }
 0x109   : > { %v1076_v62 = vsel %vm784_vm2, %v1000_v47, 0.0  ;;  %v1082_v47 = vsel %vm784_vm2, %v1003_v8, 0.0 }
 0x10a   : > { %v1077_v53 = vadd.f32 %v1076_v62, %v1075_v1  ;;  %v1007_v1 = vmul.f32 %v1754_v0, %v1754_v0 }
 0x10e   : > { %v659_v44 = vpop.f32.mrf.mxu0  ;;  %v1932_v45 = vpop.f32.mrf.mxu1 }
 0x10f   : > { %799 = vst.msk [vmem:[%s1643_s30 + $0x70] sm:$0xff] %vm784_vm2, %v659_v44  ;;  %v1001_v57 = vmul.f32 %v659_v44, %v659_v44  ;;  %v877_v63 = vsel %vm784_vm2, %v659_v44, 0.0 }
 0x110   : > { %815 = vst.msk [vmem:[%s1643_s30 + $0xf0] sm:$0xff] %vm784_vm2, %v1932_v45  ;;  %v878_v5 = vadd.f32 %v877_v63, %v876_v2  ;;  %v1086_v63 = vsel %vm784_vm2, %v1005_v34, 0.0  ;;  %v1996_v2 = vpop.f32.mrf.mxu2  ;;  %v1011_v34 = vmul.f32 %v1815_v19, %v1815_v19 }
 0x111   : > { %v1078_v4 = vsel %vm784_vm2, %v1001_v57, 0.0  ;;  %v885_v57 = vsel %vm784_vm2, %v1729_v48, 0.0  ;;  %830 = vst.msk [vmem:[%s1643_s30 + $0x168] sm:$0xff] %vm784_vm2, %v1996_v2  ;;  %v1088_v48 = vsel %vm784_vm2, %v1006_v35, 0.0  ;;  %v897_v35 = vsel %vm784_vm2, %v1815_v19, 0.0 }
 0x112   : > { %v1079_v37 = vadd.f32 %v1078_v4, %v1077_v53  ;;  %v1998_v4 = vpop.f32.mrf.mxu3 }
 0x113   : > { %842 = vst.msk [vmem:[%s1643_s30 + $0x1c8] sm:$0xff] %vm784_vm2, %v1998_v4 }
 0x116   : > { %v661_v6 = vpop.f32.mrf.mxu0  ;;  %v1956_v7 = vpop.f32.mrf.mxu1 }
 0x117   : > { %800 = vst.msk [vmem:[%s1643_s30 + $0x78] sm:$0xff] %vm784_vm2, %v661_v6  ;;  %v879_v11 = vsel %vm784_vm2, %v661_v6, 0.0  ;;  %v1002_v14 = vmul.f32 %v661_v6, %v661_v6  ;;  %v889_v6 = vsel %vm784_vm2, %v1754_v0, 0.0  ;;  %v1092_v0 = vsel %vm784_vm2, %v1008_v56, 0.0 }
 0x118   : > { %v880_v41 = vadd.f32 %v879_v11, %v878_v5  ;;  %816 = vst.msk [vmem:[%s1643_s30 + $0xf8] sm:$0xff] %vm784_vm2, %v1956_v7 }
 0x119   : > { %v1080_v44 = vsel %vm784_vm2, %v1002_v14, 0.0  ;;  %v1090_v14 = vsel %vm784_vm2, %v1007_v1, 0.0  ;;  %v1013_v1 = vmul.f32 %v1849_v27, %v1849_v27 }
 0x11a   : > { %v882_v46 = vadd.f32 %v881_v42, %v880_v41  ;;  %v1081_v26 = vadd.f32 %v1080_v44, %v1079_v37  ;;  %v891_v37 = vsel %vm784_vm2, %v1774_v9, 0.0  ;;  %v1009_v41 = vmul.f32 %v1786_v12, %v1786_v12 }
 0x11b   : > { %v893_v44 = vsel %vm784_vm2, %v1786_v12, 0.0  ;;  %v895_v9 = vsel %vm784_vm2, %v1798_v15, 0.0 }
 0x11c   : > { %v884_v51 = vadd.f32 %v883_v30, %v882_v46  ;;  %v1083_v52 = vadd.f32 %v1082_v47, %v1081_v26  ;;  %v1010_v46 = vmul.f32 %v1798_v15, %v1798_v15  ;;  %v1094_v30 = vsel %vm784_vm2, %v1009_v41, 0.0 }
 0x11d   : > { %v1012_v15 = vmul.f32 %v1832_v23, %v1832_v23 }
 0x11e   : > { %v886_v58 = vadd.f32 %v885_v57, %v884_v51  ;;  %v1085_v62 = vadd.f32 %v1084_v55, %v1083_v52  ;;  %v2026_v51 = vpop.f32.mrf.mxu2  ;;  %v2028_v52 = vpop.f32.mrf.mxu3  ;;  %v1096_v12 = vsel %vm784_vm2, %v1010_v46, 0.0 }
 0x11f   : > { %831 = vst.msk [vmem:[%s1643_s30 + $0x170] sm:$0xff] %vm784_vm2, %v2026_v51  ;;  %v1100_v19 = vsel %vm784_vm2, %v1012_v15, 0.0  ;;  %v1019_v15 = vmul.f32 %v1745_v59, %v1745_v59 }
 0x120   : > { %v888_v53 = vadd.f32 %v887_v39, %v886_v58  ;;  %v1087_v5 = vadd.f32 %v1086_v63, %v1085_v62  ;;  %843 = vst.msk [vmem:[%s1643_s30 + $0x1d0] sm:$0xff] %vm784_vm2, %v2028_v52  ;;  %v1098_v63 = vsel %vm784_vm2, %v1011_v34, 0.0  ;;  %v899_v39 = vsel %vm784_vm2, %v1832_v23, 0.0 }
 0x121   : > { %v903_v23 = vsel %vm784_vm2, %v1866_v31, 0.0 }
 0x122   : > { %v890_v8 = vadd.f32 %v889_v6, %v888_v53  ;;  %v1089_v11 = vadd.f32 %v1088_v48, %v1087_v5  ;;  %v901_v48 = vsel %vm784_vm2, %v1849_v27, 0.0  ;;  %v1014_v6 = vmul.f32 %v1866_v31, %v1866_v31 }
 0x123   : > { %v1016_v31 = vmul.f32 %v1907_v54, %v1907_v54 }
 0x124   : > { %v892_v42 = vadd.f32 %v891_v37, %v890_v8  ;;  %v1091_v43 = vadd.f32 %v1090_v14, %v1089_v11  ;;  %v1102_v11 = vsel %vm784_vm2, %v1013_v1, 0.0  ;;  %v1015_v14 = vmul.f32 %v1883_v36, %v1883_v36 }
 0x125   : > { %v1104_v27 = vsel %vm784_vm2, %v1014_v6, 0.0  ;;  %v1020_v1 = vmul.f32 %v1759_v3, %v1759_v3  ;;  %v1021_v6 = vmul.f32 %v1778_v10, %v1778_v10 }
 0x126   : > { %v1093_v26 = vadd.f32 %v1092_v0, %v1091_v43  ;;  %v894_v47 = vadd.f32 %v893_v44, %v892_v42  ;;  %v2056_v37 = vpop.f32.mrf.mxu2  ;;  %v2058_v41 = vpop.f32.mrf.mxu3  ;;  %v905_v0 = vsel %vm784_vm2, %v1883_v36, 0.0  ;;  %v1108_v36 = vsel %vm784_vm2, %v1016_v31, 0.0 }
 0x127   : > { %832 = vst.msk [vmem:[%s1643_s30 + $0x178] sm:$0xff] %vm784_vm2, %v2056_v37 }
 0x128   : > { %v896_v55 = vadd.f32 %v895_v9, %v894_v47  ;;  %v1095_v57 = vadd.f32 %v1094_v30, %v1093_v26  ;;  %844 = vst.msk [vmem:[%s1643_s30 + $0x1d8] sm:$0xff] %vm784_vm2, %v2058_v41  ;;  %v1106_v26 = vsel %vm784_vm2, %v1015_v14, 0.0  ;;  %v907_v47 = vsel %vm784_vm2, %v1907_v54, 0.0 }
 0x129   : > { %v1017_v30 = vmul.f32 %v1932_v45, %v1932_v45 }
 0x12a   : > { %v898_v58 = vadd.f32 %v897_v35, %v896_v55  ;;  %v1097_v62 = vadd.f32 %v1096_v12, %v1095_v57  ;;  %v909_v55 = vsel %vm784_vm2, %v1932_v45, 0.0  ;;  %v1018_v57 = vmul.f32 %v1956_v7, %v1956_v7 }
 0x12b   : > { %v1110_v54 = vsel %vm784_vm2, %v1017_v30, 0.0  ;;  %v913_v45 = vsel %vm784_vm2, %v1745_v59, 0.0  ;;  %v1116_v59 = vsel %vm784_vm2, %v1020_v1, 0.0  ;;  %v929_v1 = vsel %vm784_vm2, %v1870_v32, 0.0 }
 0x12c   : > { %v900_v53 = vadd.f32 %v899_v39, %v898_v58  ;;  %v1099_v5 = vadd.f32 %v1098_v63, %v1097_v62  ;;  %v911_v58 = vsel %vm784_vm2, %v1956_v7, 0.0  ;;  %v915_v7 = vsel %vm784_vm2, %v1759_v3, 0.0 }
 0x12d   : > { %v919_v3 = vsel %vm784_vm2, %v1790_v13, 0.0 }
 0x12e   : > { %v902_v56 = vadd.f32 %v901_v48, %v900_v53  ;;  %v1101_v8 = vadd.f32 %v1100_v19, %v1099_v5  ;;  %v2086_v62 = vpop.f32.mrf.mxu3  ;;  %v1112_v53 = vsel %vm784_vm2, %v1018_v57, 0.0  ;;  %v1114_v48 = vsel %vm784_vm2, %v1019_v15, 0.0 }
 0x12f   : > { %845 = vst.msk [vmem:[%s1643_s30 + $0x1e0] sm:$0xff] %vm784_vm2, %v2086_v62 }
 0x130   : > { %v904_v42 = vadd.f32 %v903_v23, %v902_v56  ;;  %v1103_v43 = vadd.f32 %v1102_v11, %v1101_v8  ;;  %v917_v11 = vsel %vm784_vm2, %v1778_v10, 0.0  ;;  %v1022_v23 = vmul.f32 %v1790_v13, %v1790_v13 }
 0x132   : > { %v906_v44 = vadd.f32 %v905_v0, %v904_v42  ;;  %v1105_v46 = vadd.f32 %v1104_v27, %v1103_v43  ;;  %v1118_v43 = vsel %vm784_vm2, %v1021_v6, 0.0  ;;  %v1023_v27 = vmul.f32 %v1802_v16, %v1802_v16 }
 0x133   : > { %v1120_v10 = vsel %vm784_vm2, %v1022_v23, 0.0 }
 0x134   : > { %v1107_v9 = vadd.f32 %v1106_v26, %v1105_v46  ;;  %v908_v34 = vadd.f32 %v907_v47, %v906_v44  ;;  %v921_v46 = vsel %vm784_vm2, %v1802_v16, 0.0  ;;  %v1024_v26 = vmul.f32 %v1819_v20, %v1819_v20 }
 0x135   : > { %v1122_v30 = vsel %vm784_vm2, %v1023_v27, 0.0  ;;  %v925_v16 = vsel %vm784_vm2, %v1836_v24, 0.0 }
 0x136   : > { %v1109_v12 = vadd.f32 %v1108_v36, %v1107_v9  ;;  %v910_v35 = vadd.f32 %v909_v55, %v908_v34  ;;  %v2111_v0 = vpop.f32.mrf.mxu3  ;;  %v923_v9 = vsel %vm784_vm2, %v1819_v20, 0.0  ;;  %v1025_v34 = vmul.f32 %v1836_v24, %v1836_v24 }
 0x137   : > { %846 = vst.msk [vmem:[%s1643_s30 + $0x1e8] sm:$0xff] %vm784_vm2, %v2111_v0  ;;  %v1124_v57 = vsel %vm784_vm2, %v1024_v26, 0.0  ;;  %v927_v20 = vsel %vm784_vm2, %v1853_v28, 0.0  ;;  %v939_v26 = vsel %vm784_vm2, %v1996_v2, 0.0 }
 0x138   : > { %v1111_v63 = vadd.f32 %v1110_v54, %v1109_v12  ;;  %v912_v39 = vadd.f32 %v911_v58, %v910_v35  ;;  %v1026_v12 = vmul.f32 %v1853_v28, %v1853_v28  ;;  %v1126_v54 = vsel %vm784_vm2, %v1025_v34, 0.0 }
 0x139   : > { %v1027_v58 = vmul.f32 %v1870_v32, %v1870_v32  ;;  %v933_v32 = vsel %vm784_vm2, %v1913_v60, 0.0  ;;  %v1034_v34 = vmul.f32 %v2056_v37, %v2056_v37 }
 0x13a   : > { %v914_v5 = vadd.f32 %v913_v45, %v912_v39  ;;  %v1113_v19 = vadd.f32 %v1112_v53, %v1111_v63  ;;  %v1128_v24 = vsel %vm784_vm2, %v1026_v12, 0.0  ;;  %v1028_v53 = vmul.f32 %v1887_v38, %v1887_v38 }
 0x13c   : > { %v916_v56 = vadd.f32 %v915_v7, %v914_v5  ;;  %v1115_v8 = vadd.f32 %v1114_v48, %v1113_v19  ;;  %v1130_v19 = vsel %vm784_vm2, %v1027_v58, 0.0  ;;  %v931_v48 = vsel %vm784_vm2, %v1887_v38, 0.0 }
 0x13d   : > { %v1029_v7 = vmul.f32 %v1913_v60, %v1913_v60  ;;  %v935_v38 = vsel %vm784_vm2, %v1938_v49, 0.0 }
 0x13e   : > { %v918_v14 = vadd.f32 %v917_v11, %v916_v56  ;;  %v1117_v42 = vadd.f32 %v1116_v59, %v1115_v8  ;;  %v2136_v63 = vpop.f32.mrf.mxu3  ;;  %v1132_v8 = vsel %vm784_vm2, %v1028_v53, 0.0  ;;  %v1030_v59 = vmul.f32 %v1938_v49, %v1938_v49 }
 0x13f   : > { %847 = vst.msk [vmem:[%s1643_s30 + $0x1f0] sm:$0xff] %vm784_vm2, %v2136_v63 }
 0x140   : > { %v920_v31 = vadd.f32 %v919_v3, %v918_v14  ;;  %v1119_v44 = vadd.f32 %v1118_v43, %v1117_v42  ;;  %v1134_v14 = vsel %vm784_vm2, %v1029_v7, 0.0  ;;  %v1031_v42 = vmul.f32 %v1963_v18, %v1963_v18 }
 0x141   : > { %v1136_v60 = vsel %vm784_vm2, %v1030_v59, 0.0  ;;  %v1039_v7 = vmul.f32 %v1872_v33, %v1872_v33 }
 0x142   : > { %v922_v47 = vadd.f32 %v921_v46, %v920_v31  ;;  %v1121_v13 = vadd.f32 %v1120_v10, %v1119_v44  ;;  %v937_v31 = vsel %vm784_vm2, %v1963_v18, 0.0  ;;  %v1032_v44 = vmul.f32 %v1996_v2, %v1996_v2 }
 0x143   : > { %v1138_v46 = vsel %vm784_vm2, %v1031_v42, 0.0  ;;  %v941_v18 = vsel %vm784_vm2, %v2026_v51, 0.0 }
 0x144   : > { %v924_v36 = vadd.f32 %v923_v9, %v922_v47  ;;  %v1123_v55 = vadd.f32 %v1122_v30, %v1121_v13  ;;  %v1033_v47 = vmul.f32 %v2026_v51, %v2026_v51  ;;  %v1140_v9 = vsel %vm784_vm2, %v1032_v44, 0.0 }
 0x145   : > { %v1036_v51 = vmul.f32 %v1821_v21, %v1821_v21 }
 0x146   : > { %v1125_v35 = vadd.f32 %v1124_v57, %v1123_v55  ;;  %v926_v15 = vadd.f32 %v925_v16, %v924_v36  ;;  %v2161_v43 = vpop.f32.mrf.mxu3  ;;  %v1035_v57 = vmul.f32 %v1804_v17, %v1804_v17  ;;  %v1142_v2 = vsel %vm784_vm2, %v1033_v47, 0.0 }
 0x147   : > { %848 = vst.msk [vmem:[%s1643_s30 + $0x1f8] sm:$0xff] %vm784_vm2, %v2161_v43  ;;  %v943_v16 = vsel %vm784_vm2, %v2056_v37, 0.0  ;;  %v1037_v37 = vmul.f32 %v1838_v25, %v1838_v25  ;;  %v1148_v53 = vsel %vm784_vm2, %v1036_v51, 0.0  ;;  %v1044_v47 = vmul.f32 %v1998_v4, %v1998_v4 }
 0x148   : > { %v928_v39 = vadd.f32 %v927_v20, %v926_v15  ;;  %v1127_v45 = vadd.f32 %v1126_v54, %v1125_v35  ;;  %v945_v15 = vsel %vm784_vm2, %v1804_v17, 0.0  ;;  %v1144_v54 = vsel %vm784_vm2, %v1034_v34, 0.0 }
 0x149   : > { %v949_v17 = vsel %vm784_vm2, %v1838_v25, 0.0  ;;  %v953_v25 = vsel %vm784_vm2, %v1872_v33, 0.0  ;;  %v957_v33 = vsel %vm784_vm2, %v1915_v61, 0.0 }
 0x14a   : > { %v930_v5 = vadd.f32 %v929_v1, %v928_v39  ;;  %v1129_v28 = vadd.f32 %v1128_v24, %v1127_v45  ;;  %v1146_v39 = vsel %vm784_vm2, %v1035_v57, 0.0  ;;  %v947_v45 = vsel %vm784_vm2, %v1821_v21, 0.0 }
 0x14b   : > { %v951_v21 = vsel %vm784_vm2, %v1855_v29, 0.0  ;;  %v1046_v57 = vmul.f32 %v2058_v41, %v2058_v41 }
 0x14c   : > { %v932_v6 = vadd.f32 %v931_v48, %v930_v5  ;;  %v1131_v56 = vadd.f32 %v1130_v19, %v1129_v28  ;;  %v1038_v5 = vmul.f32 %v1855_v29, %v1855_v29  ;;  %v1150_v48 = vsel %vm784_vm2, %v1037_v37, 0.0 }
 0x14d   : > { %v955_v29 = vsel %vm784_vm2, %v1889_v40, 0.0  ;;  %v1049_v37 = vmul.f32 %v2136_v63, %v2136_v63 }
 0x14e   : > { %v934_v11 = vadd.f32 %v933_v32, %v932_v6  ;;  %v1133_v23 = vadd.f32 %v1132_v8, %v1131_v56  ;;  %v1152_v8 = vsel %vm784_vm2, %v1038_v5, 0.0  ;;  %v1040_v32 = vmul.f32 %v1889_v40, %v1889_v40 }
 0x14f   : > { %v959_v40 = vsel %vm784_vm2, %v1940_v50, 0.0 }
 0x150   : > { %v936_v3 = vadd.f32 %v935_v38, %v934_v11  ;;  %v1135_v27 = vadd.f32 %v1134_v14, %v1133_v23  ;;  %v1154_v23 = vsel %vm784_vm2, %v1039_v7, 0.0  ;;  %v1041_v14 = vmul.f32 %v1915_v61, %v1915_v61 }
 0x151   : > { %v961_v61 = vsel %vm784_vm2, %v1965_v22, 0.0 }
 0x152   : > { %v1137_v10 = vadd.f32 %v1136_v60, %v1135_v27  ;;  %v938_v49 = vadd.f32 %v937_v31, %v936_v3  ;;  %v1156_v3 = vsel %vm784_vm2, %v1040_v32, 0.0  ;;  %v1042_v27 = vmul.f32 %v1940_v50, %v1940_v50 }
 0x153   : > { %v1158_v44 = vsel %vm784_vm2, %v1041_v14, 0.0  ;;  %v963_v50 = vsel %vm784_vm2, %v1998_v4, 0.0  ;;  %v967_v4 = vsel %vm784_vm2, %v2058_v41, 0.0  ;;  %v971_v41 = vsel %vm784_vm2, %v2111_v0, 0.0  ;;  %v849_v14 = vld [vmem:[%s2289_s3] sm:$0x1] }
 0x154   : > { %v1139_v13 = vadd.f32 %v1138_v46, %v1137_v10  ;;  %v940_v30 = vadd.f32 %v939_v26, %v938_v49  ;;  %v1043_v10 = vmul.f32 %v1965_v22, %v1965_v22  ;;  %v1160_v26 = vsel %vm784_vm2, %v1042_v27, 0.0 }
 0x155   : > { %v965_v22 = vsel %vm784_vm2, %v2028_v52, 0.0 }
 0x156   : > { %v1141_v36 = vadd.f32 %v1140_v9, %v1139_v13  ;;  %v942_v55 = vadd.f32 %v941_v18, %v940_v30  ;;  %v1162_v9 = vsel %vm784_vm2, %v1043_v10, 0.0  ;;  %v1045_v18 = vmul.f32 %v2028_v52, %v2028_v52 }
 0x157   : > { %v969_v52 = vsel %vm784_vm2, %v2086_v62, 0.0 }
 0x158   : > { %v1143_v12 = vadd.f32 %v1142_v2, %v1141_v36  ;;  %v944_v35 = vadd.f32 %v943_v16, %v942_v55  ;;  %v1164_v55 = vsel %vm784_vm2, %v1044_v47, 0.0 }
 0x15a   : > { %v946_v20 = vadd.f32 %v945_v15, %v944_v35  ;;  %v1145_v58 = vadd.f32 %v1144_v54, %v1143_v12  ;;  %v1166_v12 = vsel %vm784_vm2, %v1045_v18, 0.0  ;;  %v1047_v35 = vmul.f32 %v2086_v62, %v2086_v62 }
 0x15b   : > { %v1168_v54 = vsel %vm784_vm2, %v1046_v57, 0.0  ;;  %v973_v62 = vsel %vm784_vm2, %v2136_v63, 0.0 }
 0x15c   : > { %v948_v24 = vadd.f32 %v947_v45, %v946_v20  ;;  %v1147_v1 = vadd.f32 %v1146_v39, %v1145_v58  ;;  %v1048_v20 = vmul.f32 %v2111_v0, %v2111_v0  ;;  %v1170_v45 = vsel %vm784_vm2, %v1047_v35, 0.0 }
 0x15d   : > { %v975_v0 = vsel %vm784_vm2, %v2161_v43, 0.0 }
 0x15e   : > { %v950_v28 = vadd.f32 %v949_v17, %v948_v24  ;;  %v1149_v19 = vadd.f32 %v1148_v53, %v1147_v1  ;;  %v1172_v53 = vsel %vm784_vm2, %v1048_v20, 0.0  ;;  %v1050_v17 = vmul.f32 %v2161_v43, %v2161_v43 }
 0x160   : > { %v952_v6 = vadd.f32 %v951_v21, %v950_v28  ;;  %v1151_v56 = vadd.f32 %v1150_v48, %v1149_v19  ;;  %v1174_v19 = vsel %vm784_vm2, %v1049_v37, 0.0  ;;  %v1176_v7 = vsel %vm784_vm2, %v1050_v17, 0.0 }
 0x162   : > { %v954_v59 = vadd.f32 %v953_v25, %v952_v6  ;;  %v1153_v11 = vadd.f32 %v1152_v8, %v1151_v56 }
 0x164   : > { %v956_v38 = vadd.f32 %v955_v29, %v954_v59  ;;  %v1155_v42 = vadd.f32 %v1154_v23, %v1153_v11 }
 0x166   : > { %v1157_v60 = vadd.f32 %v1156_v3, %v1155_v42  ;;  %v958_v31 = vadd.f32 %v957_v33, %v956_v38  ;;  %v986_v42 = vld [vmem:[%s2290_s4] sm:$0x1] }
 0x168   : > { %v960_v49 = vadd.f32 %v959_v40, %v958_v31  ;;  %v1159_v46 = vadd.f32 %v1158_v44, %v1157_v60 }
 0x16a   : > { %v962_v13 = vadd.f32 %v961_v61, %v960_v49  ;;  %v1161_v30 = vadd.f32 %v1160_v26, %v1159_v46 }
 0x16c   : > { %v964_v34 = vadd.f32 %v963_v50, %v962_v13  ;;  %v1163_v36 = vadd.f32 %v1162_v9, %v1161_v30 }
 0x16e   : > { %v966_v2 = vadd.f32 %v965_v22, %v964_v34  ;;  %v1165_v16 = vadd.f32 %v1164_v55, %v1163_v36 }
 0x170   : > { %v968_v15 = vadd.f32 %v967_v4, %v966_v2  ;;  %v1167_v51 = vadd.f32 %v1166_v12, %v1165_v16 }
 0x172   : > { %v1169_v58 = vadd.f32 %v1168_v54, %v1167_v51  ;;  %v970_v39 = vadd.f32 %v969_v52, %v968_v15 }
 0x174   : > { %v1171_v24 = vadd.f32 %v1170_v45, %v1169_v58  ;;  %v972_v1 = vadd.f32 %v971_v41, %v970_v39 }
 0x176   : > { %v1173_v5 = vadd.f32 %v1172_v53, %v1171_v24  ;;  %v974_v28 = vadd.f32 %v973_v62, %v972_v1 }
 0x178   : > { %v1175_v48 = vadd.f32 %v1174_v19, %v1173_v5  ;;  %v976_v21 = vadd.f32 %v975_v0, %v974_v28 }
 0x17a   : > { %v977_v6 = vrot.slane %v976_v21, 4  ;;  %v1177_v56 = vadd.f32 %v1176_v7, %v1175_v48 }
 0x17c   : > { %v978_v8 = vadd.f32 %v977_v6, %v976_v21  ;;  %v1178_v25 = vrot.slane %v1177_v56, 4 }
 0x17e   : > { %v979_v32 = vrot.slane %v978_v8, 2  ;;  %v1179_v63 = vadd.f32 %v1178_v25, %v1177_v56 }
 0x180   : > { %v980_v59 = vadd.f32 %v979_v32, %v978_v8  ;;  %v1180_v11 = vrot.slane %v1179_v63, 2 }
 0x182   : > { %v981_v23 = vrot.slane %v980_v59, 1  ;;  %v1181_v29 = vadd.f32 %v1180_v11, %v1179_v63 }
 0x184   : > { %v982_v38 = vadd.f32 %v981_v23, %v980_v59  ;;  %v1182_v43 = vrot.slane %v1181_v29, 1 }
 0x186   : > { %v983_v3 = vadd.f32 %v982_v38, %v849_v14  ;;  %v1183_v33 = vadd.f32 %v1182_v43, %v1181_v29 }
 0x188   : > { %985 = vst.msk [vmem:[%s2289_s3] sm:$0x1] %vm984_vm3, %v983_v3  ;;  %v1184_v27 = vadd.f32 %v1183_v33, %v986_v42 }
 0x18a   : > { %1185 = vst.msk [vmem:[%s2290_s4] sm:$0x1] %vm984_vm3, %v1184_v27 }
 0x18b PF: > { %s15_s17 = sadd.s32 1, %s1586_s17   ;;  %s2291_s15 = smov %s1582_s16 }
 0x18c   : > { %p12_p6 = scmp.ge.s32.totalorder %s15_s17, 6   ;;  %s2292_s16 = smov %s2294_s18 }
 0x18e   :  { %14 = sbr.rel (!%p12_p6) target bundleno = 2 (0x2), region = 81 }

// kernel: generator_forward.17
= control target key start
LH: loop header
LB: loop body
LE: loop exit
PB: predicated region body
PF: predicated region fallthrough
CT: control target
= control target key end

     0   :  { %s1388_s9 = smov 0   ;;  %s1390_s10 = smov 0   ;;  %s1642_s0 = inlined_call_operand.vmem [shape: bf16[4,2048,32], index: 0, kind: input, shape index: {}]   ;;  %s1643_s1 = inlined_call_operand.vmem [shape: bf16[4,32,3], index: 1, kind: input, shape index: {}]   ;;  %s1644_s2 = inlined_call_operand.vmem [shape: f32[4,2048,3], index: 2, kind: output, shape index: {}]  }
   0x1   :  { %s1392_s11 = smov 0   ;;  %s1394_s12 = smov 0  }
   0x2   :  { %s1396_s13 = smov 0  }
   0x3 LB: > { %s21_s14 = sadd.s32 1, %s1363_s11  ;;  %s24_s15 = sadd.s32 1, %s1367_s12  ;;  %s1371_s13 = sphi %s1396_s13, %s12_s13   ;;  %s1367_s12 = sphi %s1394_s12, %s1648_s12   ;;  %s1363_s11 = sphi %s1392_s11, %s1647_s11   ;;  %s1359_s10 = sphi %s1390_s10, %s1646_s10   ;;  %s1355_s9 = sphi %s1388_s9, %s1645_s9  }
   0x4   : > { %p22_p0 = scmp.ge.s32.totalorder %s21_s14, 4  ;;  %p945_p1 = scmp.ge.s32.totalorder %s1371_s13, 1 }
   0x5   : > { %p143_p2 = scmp.lt.s32.totalorder %s1371_s13, 17 }
   0x6   : > { %s1650_s14 = smov (%p22_p0, %s21_s14), 0  ;;  %s1652_s15 = smov (!%p22_p0, %s24_s15), %s1367_s12 }
   0x7   : > { %p144_p3 = pnand %p945_p1, %p143_p2  ;;  %p26_p4 = scmp.ge.s32.totalorder %s1652_s15, 4 }
   0x8   : > { %s946_s16 = sshll.u32 (!%p144_p3), %s1355_s9, 6  ;;  %p179_p5 = scmp.lt.s32.totalorder (!%p144_p3), %s1359_s10, 3 }
   0x9   : > { %s1654_s15 = smov (%p26_p4, %s1652_s15), 0  ;;  %147 = sbr.rel (%p144_p3) target bundleno = 287 (0x11f), region = 28 }
   0xa   : > { %p181_p6 = scmp.lt.s32.totalorder (!%p144_p3), %s946_s16, 255 }
   0xe   : > { %s1656_s10 = smov (!%p179_p5, %s1359_s10), 3  ;;  %s1658_s16 = smov (!%p181_p6, %s946_s16), 255  ;;  %vm444_vm0 = vcmask 261120   ;;  %vm774_vm1 = vcmask 23552  }
   0xf   : > { %s947_s17 = sshll.u32 %s1656_s10, 8  ;;  %s1124_s18 = sshll.u32 %s1656_s10, 4 }
  0x10   : > { %s1418_s19 = sadd.s32 %s947_s17, %s1658_s16  ;;  %s192_s22 = scalar_lea.vmem %s1643_s1, %s1124_s18 }
  0x11   : > { %s948_s23 = sshll.u32 %s1418_s19, 2  ;;  %v1158_v0 = vld [vmem:[%s192_s22 + $0x8] sm:$0xff]  ;;  %v1157_v1 = vld [vmem:[%s192_s22] sm:$0xff]  ;;  %s953_s27 = sshll.u32 %s1418_s19, 3 }
  0x12   : > { %s1427_s26 = scalar_lea.vmem %s1642_s0, %s948_s23  ;;  %547 = vmatpush.bf16.msra.mxu0 %v1158_v0  ;;  %1159 = vmatpush.bf16.msra.mxu1 %v1158_v0  ;;  %s1497_s30 = scalar_lea.vmem %s1644_s2, %s953_s27 }
  0x13   : > { %1160 = vmatpush.bf16.msra.mxu2 %v1158_v0  ;;  %1161 = vmatpush.bf16.msra.mxu3 %v1158_v0  ;;  %v1125_v2 = vld [vmem:[%s1427_s26] sm:$0xff]  ;;  %v1126_v6 = vld [vmem:[%s1427_s26 + $0x8] sm:$0xff]  ;;  %v1127_v10 = vld [vmem:[%s1427_s26 + $0x10] sm:$0xff] }
  0x14   : > { %v1133_v3 = vld [vmem:[%s1427_s26 + $0x40] sm:$0xff]  ;;  %v1134_v7 = vld [vmem:[%s1427_s26 + $0x48] sm:$0xff]  ;;  %v1135_v11 = vld [vmem:[%s1427_s26 + $0x50] sm:$0xff] }
  0x15   : > { %v1141_v4 = vld [vmem:[%s1427_s26 + $0x80] sm:$0xff]  ;;  %v1142_v8 = vld [vmem:[%s1427_s26 + $0x88] sm:$0xff]  ;;  %v1143_v12 = vld [vmem:[%s1427_s26 + $0x90] sm:$0xff] }
  0x16   : > { %548 = vmatpush.bf16.msra.mxu0 %v1157_v1  ;;  %1162 = vmatpush.bf16.msra.mxu1 %v1157_v1  ;;  %v1149_v5 = vld [vmem:[%s1427_s26 + $0xc0] sm:$0xff]  ;;  %v1150_v9 = vld [vmem:[%s1427_s26 + $0xc8] sm:$0xff]  ;;  %v1151_v13 = vld [vmem:[%s1427_s26 + $0xd0] sm:$0xff] }
  0x17   : > { %1163 = vmatpush.bf16.msra.mxu2 %v1157_v1  ;;  %1164 = vmatpush.bf16.msra.mxu3 %v1157_v1  ;;  %v1128_v14 = vld [vmem:[%s1427_s26 + $0x18] sm:$0xff]  ;;  %v1129_v18 = vld [vmem:[%s1427_s26 + $0x20] sm:$0xff]  ;;  %v1130_v22 = vld [vmem:[%s1427_s26 + $0x28] sm:$0xff] }
  0x18   : > { %v1136_v15 = vld [vmem:[%s1427_s26 + $0x58] sm:$0xff]  ;;  %v1137_v19 = vld [vmem:[%s1427_s26 + $0x60] sm:$0xff]  ;;  %v1138_v23 = vld [vmem:[%s1427_s26 + $0x68] sm:$0xff] }
  0x19   : > { %1090 = vmatmul.msk.bf16.vlgmr.msra.gmra.mxu0 %vm444_vm0, %v1125_v2  ;;  %1098 = vmatmul.msk.bf16.vlgmr.msra.gmra.mxu1 %vm444_vm0, %v1133_v3  ;;  %v1144_v16 = vld [vmem:[%s1427_s26 + $0x98] sm:$0xff]  ;;  %v1145_v20 = vld [vmem:[%s1427_s26 + $0xa0] sm:$0xff]  ;;  %v1146_v24 = vld [vmem:[%s1427_s26 + $0xa8] sm:$0xff] }
  0x1a   : > { %1106 = vmatmul.msk.bf16.vlgmr.msra.gmra.mxu2 %vm444_vm0, %v1141_v4  ;;  %1114 = vmatmul.msk.bf16.vlgmr.msra.gmra.mxu3 %vm444_vm0, %v1149_v5  ;;  %v1152_v17 = vld [vmem:[%s1427_s26 + $0xd8] sm:$0xff]  ;;  %v1153_v21 = vld [vmem:[%s1427_s26 + $0xe0] sm:$0xff]  ;;  %v1154_v25 = vld [vmem:[%s1427_s26 + $0xe8] sm:$0xff] }
  0x1b   : > { %v1131_v26 = vld [vmem:[%s1427_s26 + $0x30] sm:$0xff]  ;;  %v1132_v30 = vld [vmem:[%s1427_s26 + $0x38] sm:$0xff] }
  0x1c   : > { %v1139_v27 = vld [vmem:[%s1427_s26 + $0x70] sm:$0xff]  ;;  %v1140_v31 = vld [vmem:[%s1427_s26 + $0x78] sm:$0xff] }
  0x1d   : > { %v1147_v28 = vld [vmem:[%s1427_s26 + $0xb0] sm:$0xff]  ;;  %v1148_v32 = vld [vmem:[%s1427_s26 + $0xb8] sm:$0xff] }
  0x1e   : > { %v1155_v29 = vld [vmem:[%s1427_s26 + $0xf0] sm:$0xff]  ;;  %v1156_v33 = vld [vmem:[%s1427_s26 + $0xf8] sm:$0xff] }
  0x29   : > { %1091 = vmatmul.msk.bf16.gmra.mxu0 %vm444_vm0, %v1126_v6  ;;  %1099 = vmatmul.msk.bf16.gmra.mxu1 %vm444_vm0, %v1134_v7 }
  0x2a   : > { %1107 = vmatmul.msk.bf16.gmra.mxu2 %vm444_vm0, %v1142_v8  ;;  %1115 = vmatmul.msk.bf16.gmra.mxu3 %vm444_vm0, %v1150_v9 }
  0x39   : > { %1092 = vmatmul.msk.bf16.gmra.mxu0 %vm444_vm0, %v1127_v10  ;;  %1100 = vmatmul.msk.bf16.gmra.mxu1 %vm444_vm0, %v1135_v11 }
  0x3a   : > { %1108 = vmatmul.msk.bf16.gmra.mxu2 %vm444_vm0, %v1143_v12  ;;  %1116 = vmatmul.msk.bf16.gmra.mxu3 %vm444_vm0, %v1151_v13 }
  0x49   : > { %1093 = vmatmul.msk.bf16.gmra.mxu0 %vm444_vm0, %v1128_v14  ;;  %1101 = vmatmul.msk.bf16.gmra.mxu1 %vm444_vm0, %v1136_v15 }
  0x4a   : > { %1109 = vmatmul.msk.bf16.gmra.mxu2 %vm444_vm0, %v1144_v16  ;;  %1117 = vmatmul.msk.bf16.gmra.mxu3 %vm444_vm0, %v1152_v17 }
  0x59   : > { %1094 = vmatmul.msk.bf16.gmra.mxu0 %vm444_vm0, %v1129_v18  ;;  %1102 = vmatmul.msk.bf16.gmra.mxu1 %vm444_vm0, %v1137_v19 }
  0x5a   : > { %1110 = vmatmul.msk.bf16.gmra.mxu2 %vm444_vm0, %v1145_v20  ;;  %1118 = vmatmul.msk.bf16.gmra.mxu3 %vm444_vm0, %v1153_v21 }
  0x69   : > { %1095 = vmatmul.msk.bf16.gmra.mxu0 %vm444_vm0, %v1130_v22  ;;  %1103 = vmatmul.msk.bf16.gmra.mxu1 %vm444_vm0, %v1138_v23 }
  0x6a   : > { %1111 = vmatmul.msk.bf16.gmra.mxu2 %vm444_vm0, %v1146_v24  ;;  %1119 = vmatmul.msk.bf16.gmra.mxu3 %vm444_vm0, %v1154_v25 }
  0x79   : > { %1096 = vmatmul.msk.bf16.gmra.mxu0 %vm444_vm0, %v1131_v26  ;;  %1104 = vmatmul.msk.bf16.gmra.mxu1 %vm444_vm0, %v1139_v27 }
  0x7a   : > { %1112 = vmatmul.msk.bf16.gmra.mxu2 %vm444_vm0, %v1147_v28  ;;  %1120 = vmatmul.msk.bf16.gmra.mxu3 %vm444_vm0, %v1155_v29 }
  0x89   : > { %1097 = vmatmul.msk.bf16.gmra.mxu0 %vm444_vm0, %v1132_v30  ;;  %1105 = vmatmul.msk.bf16.gmra.mxu1 %vm444_vm0, %v1140_v31 }
  0x8a   : > { %1113 = vmatmul.msk.bf16.gmra.mxu2 %vm444_vm0, %v1148_v32  ;;  %1121 = vmatmul.msk.bf16.gmra.mxu3 %vm444_vm0, %v1156_v33 }
  0x96   : > { %v550_v34 = vpop.f32.mrf.mxu0  ;;  %v590_v35 = vpop.f32.mrf.mxu1 }
  0x97   : > { %1205 = vtanh.f32 %v550_v34 }
  0x98   : > { %1207 = vtanh.f32 %v590_v35 }
  0x9d   : > { %v1206_v36 = vpop.eup %1205  ;;  %v630_v37 = vpop.f32.mrf.mxu2 }
  0x9e   : > { %v670_v38 = vpop.f32.mrf.mxu3  ;;  %v1208_v39 = vpop.eup %1207  ;;  %775 = vst.msk [vmem:[%s1497_s30] sm:$0xff] %vm774_vm1, %v1206_v36  ;;  %1209 = vtanh.f32 %v630_v37 }
  0x9f   : > { %v552_v40 = vpop.f32.mrf.mxu0  ;;  %v592_v41 = vpop.f32.mrf.mxu1  ;;  %791 = vst.msk [vmem:[%s1497_s30 + $0x80] sm:$0xff] %vm774_vm1, %v1208_v39  ;;  %1211 = vtanh.f32 %v670_v38 }
  0xa0   : > { %1213 = vtanh.f32 %v552_v40 }
  0xa1   : > { %1215 = vtanh.f32 %v592_v41 }
  0xa4   : > { %v1210_v42 = vpop.eup %1209 }
  0xa5   : > { %v1212_v43 = vpop.eup %1211  ;;  %807 = vst.msk [vmem:[%s1497_s30 + $0x100] sm:$0xff] %vm774_vm1, %v1210_v42  ;;  %v632_v44 = vpop.f32.mrf.mxu2 }
  0xa6   : > { %v672_v45 = vpop.f32.mrf.mxu3  ;;  %v1214_v46 = vpop.eup %1213  ;;  %823 = vst.msk [vmem:[%s1497_s30 + $0x180] sm:$0xff] %vm774_vm1, %v1212_v43  ;;  %1217 = vtanh.f32 %v632_v44 }
  0xa7   : > { %v555_v47 = vpop.f32.mrf.mxu0  ;;  %v595_v48 = vpop.f32.mrf.mxu1  ;;  %776 = vst.msk [vmem:[%s1497_s30 + $0x8] sm:$0xff] %vm774_vm1, %v1214_v46  ;;  %1219 = vtanh.f32 %v672_v45 }
  0xa8   : > { %v1216_v49 = vpop.eup %1215  ;;  %1221 = vtanh.f32 %v555_v47 }
  0xa9   : > { %792 = vst.msk [vmem:[%s1497_s30 + $0x88] sm:$0xff] %vm774_vm1, %v1216_v49  ;;  %1223 = vtanh.f32 %v595_v48 }
  0xac   : > { %v1218_v50 = vpop.eup %1217 }
  0xad   : > { %v1220_v51 = vpop.eup %1219  ;;  %808 = vst.msk [vmem:[%s1497_s30 + $0x108] sm:$0xff] %vm774_vm1, %v1218_v50  ;;  %v635_v52 = vpop.f32.mrf.mxu2 }
  0xae   : > { %v675_v53 = vpop.f32.mrf.mxu3  ;;  %v1222_v54 = vpop.eup %1221  ;;  %824 = vst.msk [vmem:[%s1497_s30 + $0x188] sm:$0xff] %vm774_vm1, %v1220_v51  ;;  %1225 = vtanh.f32 %v635_v52 }
  0xaf   : > { %v557_v55 = vpop.f32.mrf.mxu0  ;;  %v597_v56 = vpop.f32.mrf.mxu1  ;;  %777 = vst.msk [vmem:[%s1497_s30 + $0x10] sm:$0xff] %vm774_vm1, %v1222_v54  ;;  %1227 = vtanh.f32 %v675_v53 }
  0xb0   : > { %v1224_v57 = vpop.eup %1223  ;;  %1229 = vtanh.f32 %v557_v55 }
  0xb1   : > { %793 = vst.msk [vmem:[%s1497_s30 + $0x90] sm:$0xff] %vm774_vm1, %v1224_v57  ;;  %1231 = vtanh.f32 %v597_v56 }
  0xb4   : > { %v1226_v58 = vpop.eup %1225 }
  0xb5   : > { %v1228_v59 = vpop.eup %1227  ;;  %809 = vst.msk [vmem:[%s1497_s30 + $0x110] sm:$0xff] %vm774_vm1, %v1226_v58  ;;  %v637_v60 = vpop.f32.mrf.mxu2 }
  0xb6   : > { %v677_v61 = vpop.f32.mrf.mxu3  ;;  %v1230_v62 = vpop.eup %1229  ;;  %825 = vst.msk [vmem:[%s1497_s30 + $0x190] sm:$0xff] %vm774_vm1, %v1228_v59  ;;  %1233 = vtanh.f32 %v637_v60 }
  0xb7   : > { %v560_v63 = vpop.f32.mrf.mxu0  ;;  %v600_v0 = vpop.f32.mrf.mxu1  ;;  %778 = vst.msk [vmem:[%s1497_s30 + $0x18] sm:$0xff] %vm774_vm1, %v1230_v62  ;;  %1235 = vtanh.f32 %v677_v61 }
  0xb8   : > { %v1232_v1 = vpop.eup %1231  ;;  %1237 = vtanh.f32 %v560_v63 }
  0xb9   : > { %794 = vst.msk [vmem:[%s1497_s30 + $0x98] sm:$0xff] %vm774_vm1, %v1232_v1  ;;  %1239 = vtanh.f32 %v600_v0 }
  0xbc   : > { %v1234_v2 = vpop.eup %1233 }
  0xbd   : > { %v1236_v3 = vpop.eup %1235  ;;  %810 = vst.msk [vmem:[%s1497_s30 + $0x118] sm:$0xff] %vm774_vm1, %v1234_v2  ;;  %v640_v4 = vpop.f32.mrf.mxu2 }
  0xbe   : > { %v680_v5 = vpop.f32.mrf.mxu3  ;;  %v1238_v6 = vpop.eup %1237  ;;  %826 = vst.msk [vmem:[%s1497_s30 + $0x198] sm:$0xff] %vm774_vm1, %v1236_v3  ;;  %1241 = vtanh.f32 %v640_v4 }
  0xbf   : > { %v562_v7 = vpop.f32.mrf.mxu0  ;;  %v602_v8 = vpop.f32.mrf.mxu1  ;;  %779 = vst.msk [vmem:[%s1497_s30 + $0x20] sm:$0xff] %vm774_vm1, %v1238_v6  ;;  %1243 = vtanh.f32 %v680_v5 }
  0xc0   : > { %v1240_v9 = vpop.eup %1239  ;;  %1245 = vtanh.f32 %v562_v7 }
  0xc1   : > { %795 = vst.msk [vmem:[%s1497_s30 + $0xa0] sm:$0xff] %vm774_vm1, %v1240_v9  ;;  %1247 = vtanh.f32 %v602_v8 }
  0xc4   : > { %v1242_v10 = vpop.eup %1241 }
  0xc5   : > { %v1244_v11 = vpop.eup %1243  ;;  %811 = vst.msk [vmem:[%s1497_s30 + $0x120] sm:$0xff] %vm774_vm1, %v1242_v10  ;;  %v642_v12 = vpop.f32.mrf.mxu2 }
  0xc6   : > { %v682_v13 = vpop.f32.mrf.mxu3  ;;  %v1246_v14 = vpop.eup %1245  ;;  %827 = vst.msk [vmem:[%s1497_s30 + $0x1a0] sm:$0xff] %vm774_vm1, %v1244_v11  ;;  %1249 = vtanh.f32 %v642_v12 }
  0xc7   : > { %v565_v15 = vpop.f32.mrf.mxu0  ;;  %v605_v16 = vpop.f32.mrf.mxu1  ;;  %780 = vst.msk [vmem:[%s1497_s30 + $0x28] sm:$0xff] %vm774_vm1, %v1246_v14  ;;  %1251 = vtanh.f32 %v682_v13 }
  0xc8   : > { %v1248_v17 = vpop.eup %1247  ;;  %1253 = vtanh.f32 %v565_v15 }
  0xc9   : > { %796 = vst.msk [vmem:[%s1497_s30 + $0xa8] sm:$0xff] %vm774_vm1, %v1248_v17  ;;  %1255 = vtanh.f32 %v605_v16 }
  0xcc   : > { %v1250_v18 = vpop.eup %1249 }
  0xcd   : > { %v1252_v19 = vpop.eup %1251  ;;  %812 = vst.msk [vmem:[%s1497_s30 + $0x128] sm:$0xff] %vm774_vm1, %v1250_v18  ;;  %v645_v20 = vpop.f32.mrf.mxu2 }
  0xce   : > { %v685_v21 = vpop.f32.mrf.mxu3  ;;  %v1254_v22 = vpop.eup %1253  ;;  %828 = vst.msk [vmem:[%s1497_s30 + $0x1a8] sm:$0xff] %vm774_vm1, %v1252_v19  ;;  %1257 = vtanh.f32 %v645_v20 }
  0xcf   : > { %v567_v23 = vpop.f32.mrf.mxu0  ;;  %v607_v24 = vpop.f32.mrf.mxu1  ;;  %781 = vst.msk [vmem:[%s1497_s30 + $0x30] sm:$0xff] %vm774_vm1, %v1254_v22  ;;  %1259 = vtanh.f32 %v685_v21 }
  0xd0   : > { %v1256_v25 = vpop.eup %1255  ;;  %1261 = vtanh.f32 %v567_v23 }
  0xd1   : > { %797 = vst.msk [vmem:[%s1497_s30 + $0xb0] sm:$0xff] %vm774_vm1, %v1256_v25  ;;  %1263 = vtanh.f32 %v607_v24 }
  0xd4   : > { %v1258_v26 = vpop.eup %1257 }
  0xd5   : > { %v1260_v27 = vpop.eup %1259  ;;  %813 = vst.msk [vmem:[%s1497_s30 + $0x130] sm:$0xff] %vm774_vm1, %v1258_v26  ;;  %v647_v28 = vpop.f32.mrf.mxu2 }
  0xd6   : > { %v687_v29 = vpop.f32.mrf.mxu3  ;;  %v1262_v30 = vpop.eup %1261  ;;  %829 = vst.msk [vmem:[%s1497_s30 + $0x1b0] sm:$0xff] %vm774_vm1, %v1260_v27  ;;  %1265 = vtanh.f32 %v647_v28 }
  0xd7   : > { %v570_v31 = vpop.f32.mrf.mxu0  ;;  %v610_v32 = vpop.f32.mrf.mxu1  ;;  %782 = vst.msk [vmem:[%s1497_s30 + $0x38] sm:$0xff] %vm774_vm1, %v1262_v30  ;;  %1267 = vtanh.f32 %v687_v29 }
  0xd8   : > { %v1264_v33 = vpop.eup %1263  ;;  %1269 = vtanh.f32 %v570_v31 }
  0xd9   : > { %798 = vst.msk [vmem:[%s1497_s30 + $0xb8] sm:$0xff] %vm774_vm1, %v1264_v33  ;;  %1271 = vtanh.f32 %v610_v32 }
  0xdc   : > { %v1266_v34 = vpop.eup %1265 }
  0xdd   : > { %v1268_v35 = vpop.eup %1267  ;;  %814 = vst.msk [vmem:[%s1497_s30 + $0x138] sm:$0xff] %vm774_vm1, %v1266_v34  ;;  %v650_v36 = vpop.f32.mrf.mxu2 }
  0xde   : > { %v690_v37 = vpop.f32.mrf.mxu3  ;;  %v1270_v38 = vpop.eup %1269  ;;  %830 = vst.msk [vmem:[%s1497_s30 + $0x1b8] sm:$0xff] %vm774_vm1, %v1268_v35  ;;  %1273 = vtanh.f32 %v650_v36 }
  0xdf   : > { %v572_v39 = vpop.f32.mrf.mxu0  ;;  %v612_v40 = vpop.f32.mrf.mxu1  ;;  %783 = vst.msk [vmem:[%s1497_s30 + $0x40] sm:$0xff] %vm774_vm1, %v1270_v38  ;;  %1275 = vtanh.f32 %v690_v37 }
  0xe0   : > { %v1272_v41 = vpop.eup %1271  ;;  %1277 = vtanh.f32 %v572_v39 }
  0xe1   : > { %799 = vst.msk [vmem:[%s1497_s30 + $0xc0] sm:$0xff] %vm774_vm1, %v1272_v41  ;;  %1279 = vtanh.f32 %v612_v40 }
  0xe4   : > { %v1274_v42 = vpop.eup %1273 }
  0xe5   : > { %v1276_v43 = vpop.eup %1275  ;;  %815 = vst.msk [vmem:[%s1497_s30 + $0x140] sm:$0xff] %vm774_vm1, %v1274_v42  ;;  %v652_v44 = vpop.f32.mrf.mxu2 }
  0xe6   : > { %v692_v45 = vpop.f32.mrf.mxu3  ;;  %v1278_v46 = vpop.eup %1277  ;;  %831 = vst.msk [vmem:[%s1497_s30 + $0x1c0] sm:$0xff] %vm774_vm1, %v1276_v43  ;;  %1281 = vtanh.f32 %v652_v44 }
  0xe7   : > { %v575_v47 = vpop.f32.mrf.mxu0  ;;  %v615_v48 = vpop.f32.mrf.mxu1  ;;  %784 = vst.msk [vmem:[%s1497_s30 + $0x48] sm:$0xff] %vm774_vm1, %v1278_v46  ;;  %1283 = vtanh.f32 %v692_v45 }
  0xe8   : > { %v1280_v49 = vpop.eup %1279  ;;  %1285 = vtanh.f32 %v575_v47 }
  0xe9   : > { %800 = vst.msk [vmem:[%s1497_s30 + $0xc8] sm:$0xff] %vm774_vm1, %v1280_v49  ;;  %1287 = vtanh.f32 %v615_v48 }
  0xec   : > { %v1282_v50 = vpop.eup %1281 }
  0xed   : > { %v1284_v51 = vpop.eup %1283  ;;  %816 = vst.msk [vmem:[%s1497_s30 + $0x148] sm:$0xff] %vm774_vm1, %v1282_v50  ;;  %v655_v52 = vpop.f32.mrf.mxu2 }
  0xee   : > { %v695_v53 = vpop.f32.mrf.mxu3  ;;  %v1286_v54 = vpop.eup %1285  ;;  %832 = vst.msk [vmem:[%s1497_s30 + $0x1c8] sm:$0xff] %vm774_vm1, %v1284_v51  ;;  %1289 = vtanh.f32 %v655_v52 }
  0xef   : > { %v577_v55 = vpop.f32.mrf.mxu0  ;;  %v617_v56 = vpop.f32.mrf.mxu1  ;;  %785 = vst.msk [vmem:[%s1497_s30 + $0x50] sm:$0xff] %vm774_vm1, %v1286_v54  ;;  %1291 = vtanh.f32 %v695_v53 }
  0xf0   : > { %v1288_v57 = vpop.eup %1287  ;;  %1293 = vtanh.f32 %v577_v55 }
  0xf1   : > { %801 = vst.msk [vmem:[%s1497_s30 + $0xd0] sm:$0xff] %vm774_vm1, %v1288_v57  ;;  %1295 = vtanh.f32 %v617_v56 }
  0xf4   : > { %v1290_v58 = vpop.eup %1289 }
  0xf5   : > { %v1292_v59 = vpop.eup %1291  ;;  %817 = vst.msk [vmem:[%s1497_s30 + $0x150] sm:$0xff] %vm774_vm1, %v1290_v58  ;;  %v657_v60 = vpop.f32.mrf.mxu2 }
  0xf6   : > { %v697_v61 = vpop.f32.mrf.mxu3  ;;  %v1294_v62 = vpop.eup %1293  ;;  %833 = vst.msk [vmem:[%s1497_s30 + $0x1d0] sm:$0xff] %vm774_vm1, %v1292_v59  ;;  %1297 = vtanh.f32 %v657_v60 }
  0xf7   : > { %v580_v63 = vpop.f32.mrf.mxu0  ;;  %v620_v0 = vpop.f32.mrf.mxu1  ;;  %786 = vst.msk [vmem:[%s1497_s30 + $0x58] sm:$0xff] %vm774_vm1, %v1294_v62  ;;  %1299 = vtanh.f32 %v697_v61 }
  0xf8   : > { %v1296_v1 = vpop.eup %1295  ;;  %1301 = vtanh.f32 %v580_v63 }
  0xf9   : > { %802 = vst.msk [vmem:[%s1497_s30 + $0xd8] sm:$0xff] %vm774_vm1, %v1296_v1  ;;  %1303 = vtanh.f32 %v620_v0 }
  0xfc   : > { %v1298_v2 = vpop.eup %1297 }
  0xfd   : > { %v1300_v3 = vpop.eup %1299  ;;  %818 = vst.msk [vmem:[%s1497_s30 + $0x158] sm:$0xff] %vm774_vm1, %v1298_v2  ;;  %v660_v4 = vpop.f32.mrf.mxu2 }
  0xfe   : > { %v700_v5 = vpop.f32.mrf.mxu3  ;;  %v1302_v6 = vpop.eup %1301  ;;  %834 = vst.msk [vmem:[%s1497_s30 + $0x1d8] sm:$0xff] %vm774_vm1, %v1300_v3  ;;  %1305 = vtanh.f32 %v660_v4 }
  0xff   : > { %v582_v7 = vpop.f32.mrf.mxu0  ;;  %v622_v8 = vpop.f32.mrf.mxu1  ;;  %787 = vst.msk [vmem:[%s1497_s30 + $0x60] sm:$0xff] %vm774_vm1, %v1302_v6  ;;  %1307 = vtanh.f32 %v700_v5 }
 0x100   : > { %v1304_v9 = vpop.eup %1303  ;;  %1309 = vtanh.f32 %v582_v7 }
 0x101   : > { %803 = vst.msk [vmem:[%s1497_s30 + $0xe0] sm:$0xff] %vm774_vm1, %v1304_v9  ;;  %1311 = vtanh.f32 %v622_v8 }
 0x104   : > { %v1306_v10 = vpop.eup %1305 }
 0x105   : > { %v1308_v11 = vpop.eup %1307  ;;  %819 = vst.msk [vmem:[%s1497_s30 + $0x160] sm:$0xff] %vm774_vm1, %v1306_v10  ;;  %v662_v12 = vpop.f32.mrf.mxu2 }
 0x106   : > { %v702_v13 = vpop.f32.mrf.mxu3  ;;  %v1310_v14 = vpop.eup %1309  ;;  %835 = vst.msk [vmem:[%s1497_s30 + $0x1e0] sm:$0xff] %vm774_vm1, %v1308_v11  ;;  %1313 = vtanh.f32 %v662_v12 }
 0x107   : > { %v585_v15 = vpop.f32.mrf.mxu0  ;;  %v625_v16 = vpop.f32.mrf.mxu1  ;;  %788 = vst.msk [vmem:[%s1497_s30 + $0x68] sm:$0xff] %vm774_vm1, %v1310_v14  ;;  %1315 = vtanh.f32 %v702_v13 }
 0x108   : > { %v1312_v17 = vpop.eup %1311  ;;  %1317 = vtanh.f32 %v585_v15 }
 0x109   : > { %804 = vst.msk [vmem:[%s1497_s30 + $0xe8] sm:$0xff] %vm774_vm1, %v1312_v17  ;;  %1319 = vtanh.f32 %v625_v16 }
 0x10c   : > { %v1314_v18 = vpop.eup %1313 }
 0x10d   : > { %v1316_v19 = vpop.eup %1315  ;;  %820 = vst.msk [vmem:[%s1497_s30 + $0x168] sm:$0xff] %vm774_vm1, %v1314_v18  ;;  %v665_v20 = vpop.f32.mrf.mxu2 }
 0x10e   : > { %v705_v21 = vpop.f32.mrf.mxu3  ;;  %v1318_v22 = vpop.eup %1317  ;;  %836 = vst.msk [vmem:[%s1497_s30 + $0x1e8] sm:$0xff] %vm774_vm1, %v1316_v19  ;;  %1321 = vtanh.f32 %v665_v20 }
 0x10f   : > { %v587_v23 = vpop.f32.mrf.mxu0  ;;  %v627_v24 = vpop.f32.mrf.mxu1  ;;  %789 = vst.msk [vmem:[%s1497_s30 + $0x70] sm:$0xff] %vm774_vm1, %v1318_v22  ;;  %1323 = vtanh.f32 %v705_v21 }
 0x110   : > { %v1320_v25 = vpop.eup %1319  ;;  %1325 = vtanh.f32 %v587_v23 }
 0x111   : > { %805 = vst.msk [vmem:[%s1497_s30 + $0xf0] sm:$0xff] %vm774_vm1, %v1320_v25  ;;  %1327 = vtanh.f32 %v627_v24 }
 0x114   : > { %v1322_v26 = vpop.eup %1321 }
 0x115   : > { %v1324_v27 = vpop.eup %1323  ;;  %821 = vst.msk [vmem:[%s1497_s30 + $0x170] sm:$0xff] %vm774_vm1, %v1322_v26  ;;  %v667_v28 = vpop.f32.mrf.mxu2 }
 0x116   : > { %v707_v29 = vpop.f32.mrf.mxu3  ;;  %v1326_v30 = vpop.eup %1325  ;;  %837 = vst.msk [vmem:[%s1497_s30 + $0x1f0] sm:$0xff] %vm774_vm1, %v1324_v27  ;;  %1329 = vtanh.f32 %v667_v28 }
 0x117   : > { %v1328_v31 = vpop.eup %1327  ;;  %790 = vst.msk [vmem:[%s1497_s30 + $0x78] sm:$0xff] %vm774_vm1, %v1326_v30  ;;  %1331 = vtanh.f32 %v707_v29 }
 0x118   : > { %806 = vst.msk [vmem:[%s1497_s30 + $0xf8] sm:$0xff] %vm774_vm1, %v1328_v31 }
 0x11c   : > { %v1330_v32 = vpop.eup %1329 }
 0x11d   : > { %v1332_v33 = vpop.eup %1331  ;;  %822 = vst.msk [vmem:[%s1497_s30 + $0x178] sm:$0xff] %vm774_vm1, %v1330_v32 }
 0x11e   : > { %838 = vst.msk [vmem:[%s1497_s30 + $0x1f8] sm:$0xff] %vm774_vm1, %v1332_v33 }
 0x11f PF: > { %s12_s13 = sadd.s32 1, %s1371_s13   ;;  %s1645_s9 = smov %s1363_s11 }
 0x120   : > { %p9_p7 = scmp.ge.s32.totalorder %s12_s13, 18   ;;  %s1646_s10 = smov %s1367_s12 }
 0x121   : > { %s1647_s11 = smov %s1650_s14  ;;  %s1648_s12 = smov %s1654_s15 }
 0x122   :  { %11 = sbr.rel (!%p9_p7) target bundleno = 3 (0x3), region = 61 }

</bundles_post_ra>
